<compile_context>
chip_gen: v7x
topology: tpu7x:2x2x1
jax: 0.10.0
libtpu: 0.0.40
codegen_flags: <defaults>
</compile_context>

<pallas_src>
import functools

import jax
import jax.numpy as jnp
from jax.experimental import pallas as pl
from jax.experimental.pallas import tpu as pltpu


# ----------------------------------------------------------------------------
# small array helpers (usable both inside the kernel trace and outside)
# ----------------------------------------------------------------------------
def _l2_normalize(x):
    # matches torch.nn.functional.normalize(p=2, dim=-1) with eps=1e-12
    ss = jnp.sum(x * x, axis=-1, keepdims=True)
    return x * jax.lax.rsqrt(jnp.maximum(ss, 1e-24))


def _layernorm(x, g, b, eps=1e-5):
    mu = jnp.mean(x, axis=-1, keepdims=True)
    var = jnp.mean((x - mu) ** 2, axis=-1, keepdims=True)
    return (x - mu) * jax.lax.rsqrt(var + eps) * g + b


# ----------------------------------------------------------------------------
# fused L2Rec forward kernel: prologue + all transformer layers + loss
# ----------------------------------------------------------------------------
def l2rec_kernel(hist_ref, posenc_ref, hmask_ref, items_ref,
                 wqkv_ref, wo_ref, wff_ref, vecs_ref,
                 total_ref, orig_ref, unif_ref,
                 *, n_layers, n_heads, link_loss, beta):
    B, S, E = hist_ref.shape
    dh = E // n_heads
    BS = B * S
    scale = float(dh) ** -0.5

    # ---------------- prologue: embeddings + positional encoding + mask -----
    pe = _l2_normalize(posenc_ref[...])              # (S, E)
    he = _l2_normalize(hist_ref[...])                # (B, S, E)
    he = _l2_normalize(he + pe[None, :, :])
    # hoisted lane-broadcast of the history mask (reused after every layer)
    maskb = jnp.broadcast_to(hmask_ref[...], (BS, E))   # (B*S, E)
    xf = he.reshape(BS, E) * maskb                       # (B*S, E)

    vecs = vecs_ref[...]                             # (L*10, E)

    def vec_row(l, j):
        r = l * 10 + j
        return vecs[r:r + 1]                         # (1, E), static slice

    # ---------------- transformer layers (kept resident in registers/VMEM) --
    for l in range(n_layers):
        bq = vec_row(l, 0)
        bk = vec_row(l, 1)
        bv = vec_row(l, 2)
        bo = vec_row(l, 3)
        ln1_g, ln1_b = vec_row(l, 4), vec_row(l, 5)
        b1, b2 = vec_row(l, 6), vec_row(l, 7)
        ln2_g, ln2_b = vec_row(l, 8), vec_row(l, 9)

        att_out = jnp.zeros((BS, E), jnp.float32)
        base = l * 3 * n_heads
        for h in range(n_heads):
            wq_h = wqkv_ref[base + h]                       # (E, dh)
            wk_h = wqkv_ref[base + n_heads + h]             # (E, dh)
            wv_h = wqkv_ref[base + 2 * n_heads + h]         # (E, dh)
            wo_h = wo_ref[l * n_heads + h]                  # (dh, E)
            lo, hi = h * dh, (h + 1) * dh

            qh = (jnp.dot(xf, wq_h, preferred_element_type=jnp.float32)
                  + bq[:, lo:hi]).reshape(B, S, dh)
            kh = (jnp.dot(xf, wk_h, preferred_element_type=jnp.float32)
                  + bk[:, lo:hi]).reshape(B, S, dh)
            vh = (jnp.dot(xf, wv_h, preferred_element_type=jnp.float32)
                  + bv[:, lo:hi]).reshape(B, S, dh)

            s = jnp.einsum('bqd,bkd->bqk', qh, kh,
                           preferred_element_type=jnp.float32) * scale
            # attention mask is all-ones (_get_ones_mask) -> no select needed
            s = s - jnp.max(s, axis=-1, keepdims=True)
            p = jnp.exp(s)
            p = p * pl.reciprocal(jnp.sum(p, axis=-1, keepdims=True),
                                  approx=True)
            oh = jnp.einsum('bqk,bkd->bqd', p, vh,
                            preferred_element_type=jnp.float32)
            # concat(o_h) @ Wo  ==  sum_h o_h @ Wo[h-th row block]
            att_out = att_out + jnp.dot(oh.reshape(BS, dh), wo_h,
                                        preferred_element_type=jnp.float32)

        att_out = att_out + bo
        h1 = _layernorm(xf + att_out, ln1_g, ln1_b)

        f = jnp.maximum(
            jnp.dot(h1, wff_ref[l * 2], preferred_element_type=jnp.float32)
            + b1, 0.0)
        f = jnp.dot(f, wff_ref[l * 2 + 1],
                    preferred_element_type=jnp.float32) + b2
        h2 = _layernorm(h1 + f, ln2_g, ln2_b)

        xf = h2 * maskb                               # inter-layer re-mask

    # ---------------- readout: last timestep of each sequence ---------------
    hist_out = _l2_normalize(xf.reshape(B, S, E)[:, S - 1, :])      # (B, E)

    # pos / neg / random-neg item embeddings: one fused normalize, then split
    items = _l2_normalize(items_ref[...])             # (3, B, E)
    pos_e = items[0]
    neg_e = items[1]
    ran_e = items[2]

    # ---------------- linked BCE loss + uniformity regularizer --------------
    h_ = hist_out
    Bsz = h_.shape[0]

    def dot_rows(a, b):
        return jnp.sum(a * b, axis=-1, keepdims=True)  # (B, 1)

    def bce_term(x, y):
        # numerically-stable BCEWithLogitsLoss(reduction='sum') term
        return jnp.maximum(x, 0.0) - x * y + jnp.log1p(jnp.exp(-jnp.abs(x)))

    def compute_bce(hist, pe_, ne_):
        return (jnp.sum(bce_term(dot_rows(hist, pe_), 1.0)) +
                jnp.sum(bce_term(dot_rows(hist, ne_), 0.0)))

    # forward_link=True: left=(h,pos,neg); right=(h,neg,ran); orig=(h,pos,ran)
    total = compute_bce(h_, pos_e, neg_e)
    if link_loss:
        total = total + compute_bce(h_, neg_e, ran_e)
    orig = compute_bce(h_, pos_e, ran_e)

    rows = jax.lax.broadcasted_iota(jnp.int32, (Bsz, Bsz), 0)
    cols = jax.lax.broadcasted_iota(jnp.int32, (Bsz, Bsz), 1)
    triu = (cols > rows).astype(jnp.float32)

    def pdist_exp_sum(x):
        # sum_{i<j} exp(-2 * ||x_i - x_j||^2)
        sq = jnp.sum(x * x, axis=-1, keepdims=True)               # (B,1)
        g = jnp.dot(x, x.T, preferred_element_type=jnp.float32)   # (B,B)
        d2 = jnp.maximum(sq + sq.T - 2.0 * g, 0.0)
        return jnp.sum(jnp.exp(-2.0 * d2) * triu)

    unif = pdist_exp_sum(h_) + pdist_exp_sum(pos_e) + pdist_exp_sum(ran_e)
    if link_loss:
        unif = unif + pdist_exp_sum(neg_e)

    # cdist(history, random_neg): all pairs
    sqh = jnp.sum(h_ * h_, axis=-1, keepdims=True)
    sqr = jnp.sum(ran_e * ran_e, axis=-1, keepdims=True)
    g = jnp.dot(h_, ran_e.T, preferred_element_type=jnp.float32)
    d2 = jnp.maximum(sqh + sqr.T - 2.0 * g, 0.0)
    unif = unif + jnp.sum(jnp.exp(-2.0 * d2))
    unif = beta * unif

    total = total + unif                              # normalize=True

    ones = jnp.ones((1, 1), jnp.float32)
    total_ref[...] = ones * total
    orig_ref[...] = ones * orig
    unif_ref[...] = ones * unif


# ----------------------------------------------------------------------------
# parameter packing (per-layer dicts -> 4 stacked arrays, head pre-split)
# ----------------------------------------------------------------------------
def pack_params(layers, n_heads):
    E = layers[0]['wq'].shape[0]
    dh = E // n_heads
    wqkv, wo, wff, vecs = [], [], [], []
    for lp in layers:
        for name in ('wq', 'wk', 'wv'):
            w = lp[name]
            for h in range(n_heads):
                wqkv.append(w[:, h * dh:(h + 1) * dh])          # (E, dh)
        for h in range(n_heads):
            wo.append(lp['wo'][h * dh:(h + 1) * dh, :])          # (dh, E)
        wff.append(lp['w1'])
        wff.append(lp['w2'])
        for name in ('bq', 'bk', 'bv', 'bo', 'ln1_g', 'ln1_b',
                     'b1', 'b2', 'ln2_g', 'ln2_b'):
            vecs.append(lp[name].reshape(-1))                    # (E,)
    return (jnp.stack(wqkv),    # (L*3*H, E, dh)
            jnp.stack(wo),      # (L*H, dh, E)
            jnp.stack(wff),     # (L*2, E, E)
            jnp.stack(vecs))    # (L*10, E)


# ----------------------------------------------------------------------------
# L2Rec forward (thin JAX wrapper: embedding gathers + one pallas_call)
# ----------------------------------------------------------------------------
def l2rec_forward(params, config, user, pos, neg, history, history_mask,
                  random_neg):
    del user  # unused in the reference forward
    H = config['n_heads']
    L = config['n_layers']
    beta = float(config['beta_'])
    link_loss = bool(config['link_loss'])

    emb_table = params['item_embedding']                # (V, E)

    pos_raw = jnp.take(emb_table, pos, axis=0)          # (B, E)  (raw, l2 in-kernel)
    neg_raw = jnp.take(emb_table, neg, axis=0)
    ran_raw = jnp.take(emb_table, random_neg, axis=0)
    items_raw = jnp.stack([pos_raw, neg_raw, ran_raw], axis=0)   # (3, B, E)
    hist_raw = jnp.take(emb_table, history, axis=0)     # (B, S, E)
    B, S, E = hist_raw.shape

    hmask_flat = history_mask.astype(jnp.float32).reshape(B * S, 1)
    posenc = params['positional_encoding']              # (S, E)

    wqkv, wo, wff, vecs = pack_params(params['layers'], H)

    def spec(shape):
        nd = len(shape)
        return pl.BlockSpec(shape, lambda i, _nd=nd: (0,) * _nd)

    kernel = functools.partial(l2rec_kernel, n_layers=L, n_heads=H,
                               link_loss=link_loss, beta=beta)

    total, orig, unif = pl.pallas_call(
        kernel,
        grid=(1,),
        in_specs=[
            spec(hist_raw.shape),      # (B, S, E)
            spec(posenc.shape),        # (S, E)
            spec(hmask_flat.shape),    # (B*S, 1)
            spec(items_raw.shape),     # (3, B, E)
            spec(wqkv.shape),          # (L*3*H, E, dh)
            spec(wo.shape),            # (L*H, dh, E)
            spec(wff.shape),           # (L*2, E, E)
            spec(vecs.shape),          # (L*10, E)
        ],
        out_specs=[spec((1, 1)), spec((1, 1)), spec((1, 1))],
        out_shape=[jax.ShapeDtypeStruct((1, 1), jnp.float32)] * 3,
        compiler_params=pltpu.CompilerParams(
            dimension_semantics=("arbitrary",)),
    )(hist_raw, posenc, hmask_flat, items_raw, wqkv, wo, wff, vecs)
    return total[0, 0], orig[0, 0], unif[0, 0]


# ----------------------------------------------------------------------------
# deterministic parameter init (init_scheme='normal', std=0.1)
# ----------------------------------------------------------------------------
def init_params(key, num_item, embed_size, seq_len, n_layers):
    def nrm(k, shape, std=0.1):
        return std * jax.random.normal(k, shape, jnp.float32)

    keys = jax.random.split(key, 2 + n_layers)
    params = {
        'item_embedding': nrm(keys[0], (num_item, embed_size)),
        'positional_encoding': nrm(keys[1], (seq_len, embed_size)),
        'layers': [],
    }
    E = embed_size
    for li in range(n_layers):
        lk = jax.random.split(keys[2 + li], 6)
        layer = {
            'wq': nrm(lk[0], (E, E)), 'bq': jnp.zeros((1, E), jnp.float32),
            'wk': nrm(lk[1], (E, E)), 'bk': jnp.zeros((1, E), jnp.float32),
            'wv': nrm(lk[2], (E, E)), 'bv': jnp.zeros((1, E), jnp.float32),
            'wo': nrm(lk[3], (E, E)), 'bo': jnp.zeros((1, E), jnp.float32),
            'ln1_g': jnp.ones((1, E), jnp.float32),
            'ln1_b': jnp.zeros((1, E), jnp.float32),
            'w1': nrm(lk[4], (E, E)), 'b1': jnp.zeros((1, E), jnp.float32),
            'w2': nrm(lk[5], (E, E)), 'b2': jnp.zeros((1, E), jnp.float32),
            'ln2_g': jnp.ones((1, E), jnp.float32),
            'ln2_b': jnp.zeros((1, E), jnp.float32),
        }
        params['layers'].append(layer)
    return params


if __name__ == "__main__":
    config = dict(
        weight_decay=1e-4, embed_size=32, n_layers=2, n_heads=2,
        drop_out=0.0, seq_len=8, loss_type='BCE', init_scheme='normal',
        link_loss=True, forward_link=True, beta_=0.05,
    )
    num_user, num_item = 10, 50
    B, S = 2, config['seq_len']

    key = jax.random.PRNGKey(0)
    kp, kd = jax.random.split(key)
    params = init_params(kp, num_item, config['embed_size'], S,
                         config['n_layers'])

    kd = jax.random.split(kd, 6)
    user = jax.random.randint(kd[0], (B,), 0, num_user, dtype=jnp.int32)
    pos = jax.random.randint(kd[1], (B,), 0, num_item, dtype=jnp.int32)
    neg = jax.random.randint(kd[2], (B,), 0, num_item, dtype=jnp.int32)
    random_neg = jax.random.randint(kd[3], (B,), 0, num_item, dtype=jnp.int32)
    history = jax.random.randint(kd[4], (B, S), 0, num_item, dtype=jnp.int32)
    history_mask = (jax.random.uniform(kd[5], (B, S)) > 0.2).astype(jnp.float32)

    fwd = jax.jit(functools.partial(l2rec_forward, params, config))
    total_loss, orig_loss, unif_reg = fwd(user, pos, neg, history,
                                          history_mask, random_neg)
    jax.block_until_ready((total_loss, orig_loss, unif_reg))
    print("KERNEL_OK")
</pallas_src>

<mosaic_0001>
module attributes {stable_mosaic.version = 11 : i64} {
  func.func @l2rec_kernel(%arg0: i32, %arg1: memref<2x8x32xf32, #tpu.memory_space<vmem>>, %arg2: memref<8x32xf32, #tpu.memory_space<vmem>>, %arg3: memref<16x1xf32, #tpu.memory_space<vmem>>, %arg4: memref<3x2x32xf32, #tpu.memory_space<vmem>>, %arg5: memref<12x32x16xf32, #tpu.memory_space<vmem>>, %arg6: memref<4x16x32xf32, #tpu.memory_space<vmem>>, %arg7: memref<4x32x32xf32, #tpu.memory_space<vmem>>, %arg8: memref<20x32xf32, #tpu.memory_space<vmem>>, %arg9: memref<1x1xf32, #tpu.memory_space<vmem>>, %arg10: memref<1x1xf32, #tpu.memory_space<vmem>>, %arg11: memref<1x1xf32, #tpu.memory_space<vmem>>) attributes {dimension_semantics = [#tpu.dimension_semantics<arbitrary>], iteration_bounds = array<i64: 1>, scalar_prefetch = 0 : i64, scratch_operands = 0 : i64, tpu.core_type = #tpu.core_type<tc>, window_params = [{pipeline_mode = #tpu.pipeline_mode<synchronous>, transform_indices = @transform_0, window_bounds = array<i64: 2, 8, 32>}, {pipeline_mode = #tpu.pipeline_mode<synchronous>, transform_indices = @transform_1, window_bounds = array<i64: 8, 32>}, {pipeline_mode = #tpu.pipeline_mode<synchronous>, transform_indices = @transform_2, window_bounds = array<i64: 16, 1>}, {pipeline_mode = #tpu.pipeline_mode<synchronous>, transform_indices = @transform_3, window_bounds = array<i64: 3, 2, 32>}, {pipeline_mode = #tpu.pipeline_mode<synchronous>, transform_indices = @transform_4, window_bounds = array<i64: 12, 32, 16>}, {pipeline_mode = #tpu.pipeline_mode<synchronous>, transform_indices = @transform_5, window_bounds = array<i64: 4, 16, 32>}, {pipeline_mode = #tpu.pipeline_mode<synchronous>, transform_indices = @transform_6, window_bounds = array<i64: 4, 32, 32>}, {pipeline_mode = #tpu.pipeline_mode<synchronous>, transform_indices = @transform_7, window_bounds = array<i64: 20, 32>}, {pipeline_mode = #tpu.pipeline_mode<synchronous>, transform_indices = @transform_8, window_bounds = array<i64: 1, 1>}, {pipeline_mode = #tpu.pipeline_mode<synchronous>, transform_indices = @transform_9, window_bounds = array<i64: 1, 1>}, {pipeline_mode = #tpu.pipeline_mode<synchronous>, transform_indices = @transform_10, window_bounds = array<i64: 1, 1>}]} {
    %c0 = arith.constant 0 : index
    %c0_0 = arith.constant 0 : index
    %0 = vector.load %arg2[%c0, %c0_0] : memref<8x32xf32, #tpu.memory_space<vmem>>, vector<8x32xf32>
    %1 = arith.mulf %0, %0 : vector<8x32xf32>
    %cst = arith.constant dense<0.000000e+00> : vector<8xf32>
    %2 = vector.multi_reduction <add>, %1, %cst [1] : vector<8x32xf32> to vector<8xf32>
    %3 = vector.shape_cast %2 : vector<8xf32> to vector<8x1xf32>
    %cst_1 = arith.constant 1.000000e-24 : f32
    %4 = vector.broadcast %cst_1 : f32 to vector<8x1xf32>
    %5 = arith.maximumf %3, %4 : vector<8x1xf32>
    %6 = math.rsqrt %5 : vector<8x1xf32>
    %7 = vector.broadcast %6 : vector<8x1xf32> to vector<8x32xf32>
    %8 = arith.mulf %0, %7 : vector<8x32xf32>
    %c0_2 = arith.constant 0 : index
    %c0_3 = arith.constant 0 : index
    %c0_4 = arith.constant 0 : index
    %9 = vector.load %arg1[%c0_2, %c0_3, %c0_4] : memref<2x8x32xf32, #tpu.memory_space<vmem>>, vector<2x8x32xf32>
    %10 = arith.mulf %9, %9 : vector<2x8x32xf32>
    %cst_5 = arith.constant dense<0.000000e+00> : vector<2x8xf32>
    %11 = vector.multi_reduction <add>, %10, %cst_5 [2] : vector<2x8x32xf32> to vector<2x8xf32>
    %12 = vector.shape_cast %11 : vector<2x8xf32> to vector<2x8x1xf32>
    %cst_6 = arith.constant 1.000000e-24 : f32
    %13 = vector.broadcast %cst_6 : f32 to vector<2x8x1xf32>
    %14 = arith.maximumf %12, %13 : vector<2x8x1xf32>
    %15 = math.rsqrt %14 : vector<2x8x1xf32>
    %16 = vector.broadcast %15 : vector<2x8x1xf32> to vector<2x8x32xf32>
    %17 = arith.mulf %9, %16 : vector<2x8x32xf32>
    %18 = vector.shape_cast %8 : vector<8x32xf32> to vector<1x8x32xf32>
    %19 = vector.broadcast %18 : vector<1x8x32xf32> to vector<2x8x32xf32>
    %20 = arith.addf %17, %19 : vector<2x8x32xf32>
    %21 = arith.mulf %20, %20 : vector<2x8x32xf32>
    %cst_7 = arith.constant dense<0.000000e+00> : vector<2x8xf32>
    %22 = vector.multi_reduction <add>, %21, %cst_7 [2] : vector<2x8x32xf32> to vector<2x8xf32>
    %23 = vector.shape_cast %22 : vector<2x8xf32> to vector<2x8x1xf32>
    %cst_8 = arith.constant 1.000000e-24 : f32
    %24 = vector.broadcast %cst_8 : f32 to vector<2x8x1xf32>
    %25 = arith.maximumf %23, %24 : vector<2x8x1xf32>
    %26 = math.rsqrt %25 : vector<2x8x1xf32>
    %27 = vector.broadcast %26 : vector<2x8x1xf32> to vector<2x8x32xf32>
    %28 = arith.mulf %20, %27 : vector<2x8x32xf32>
    %c0_9 = arith.constant 0 : index
    %c0_10 = arith.constant 0 : index
    %29 = vector.load %arg3[%c0_9, %c0_10] : memref<16x1xf32, #tpu.memory_space<vmem>>, vector<16x1xf32>
    %30 = vector.shape_cast %29 : vector<16x1xf32> to vector<16x1xf32>
    %31 = vector.broadcast %30 : vector<16x1xf32> to vector<16x32xf32>
    %32 = vector.shape_cast %28 : vector<2x8x32xf32> to vector<16x32xf32>
    %33 = arith.mulf %32, %31 : vector<16x32xf32>
    %c0_11 = arith.constant 0 : index
    %c0_12 = arith.constant 0 : index
    %34 = vector.load %arg8[%c0_11, %c0_12] : memref<20x32xf32, #tpu.memory_space<vmem>>, vector<20x32xf32>
    %35 = vector.extract_strided_slice %34 {offsets = [0, 0], sizes = [1, 32], strides = [1, 1]} : vector<20x32xf32> to vector<1x32xf32>
    %36 = vector.extract_strided_slice %34 {offsets = [1, 0], sizes = [1, 32], strides = [1, 1]} : vector<20x32xf32> to vector<1x32xf32>
    %37 = vector.extract_strided_slice %34 {offsets = [2, 0], sizes = [1, 32], strides = [1, 1]} : vector<20x32xf32> to vector<1x32xf32>
    %38 = vector.extract_strided_slice %34 {offsets = [3, 0], sizes = [1, 32], strides = [1, 1]} : vector<20x32xf32> to vector<1x32xf32>
    %39 = vector.extract_strided_slice %34 {offsets = [4, 0], sizes = [1, 32], strides = [1, 1]} : vector<20x32xf32> to vector<1x32xf32>
    %40 = vector.extract_strided_slice %34 {offsets = [5, 0], sizes = [1, 32], strides = [1, 1]} : vector<20x32xf32> to vector<1x32xf32>
    %41 = vector.extract_strided_slice %34 {offsets = [6, 0], sizes = [1, 32], strides = [1, 1]} : vector<20x32xf32> to vector<1x32xf32>
    %42 = vector.extract_strided_slice %34 {offsets = [7, 0], sizes = [1, 32], strides = [1, 1]} : vector<20x32xf32> to vector<1x32xf32>
    %43 = vector.extract_strided_slice %34 {offsets = [8, 0], sizes = [1, 32], strides = [1, 1]} : vector<20x32xf32> to vector<1x32xf32>
    %44 = vector.extract_strided_slice %34 {offsets = [9, 0], sizes = [1, 32], strides = [1, 1]} : vector<20x32xf32> to vector<1x32xf32>
    %cst_13 = arith.constant 0.000000e+00 : f32
    %45 = vector.broadcast %cst_13 : f32 to vector<16x32xf32>
    %c0_14 = arith.constant 0 : index
    %c0_15 = arith.constant 0 : index
    %c0_16 = arith.constant 0 : index
    %46 = vector.load %arg5[%c0_14, %c0_15, %c0_16] : memref<12x32x16xf32, #tpu.memory_space<vmem>>, vector<1x32x16xf32>
    %47 = vector.shape_cast %46 : vector<1x32x16xf32> to vector<32x16xf32>
    %c2 = arith.constant 2 : index
    %c0_17 = arith.constant 0 : index
    %c0_18 = arith.constant 0 : index
    %48 = vector.load %arg5[%c2, %c0_17, %c0_18] : memref<12x32x16xf32, #tpu.memory_space<vmem>>, vector<1x32x16xf32>
    %49 = vector.shape_cast %48 : vector<1x32x16xf32> to vector<32x16xf32>
    %c4 = arith.constant 4 : index
    %c0_19 = arith.constant 0 : index
    %c0_20 = arith.constant 0 : index
    %50 = vector.load %arg5[%c4, %c0_19, %c0_20] : memref<12x32x16xf32, #tpu.memory_space<vmem>>, vector<1x32x16xf32>
    %51 = vector.shape_cast %50 : vector<1x32x16xf32> to vector<32x16xf32>
    %c0_21 = arith.constant 0 : index
    %c0_22 = arith.constant 0 : index
    %c0_23 = arith.constant 0 : index
    %52 = vector.load %arg6[%c0_21, %c0_22, %c0_23] : memref<4x16x32xf32, #tpu.memory_space<vmem>>, vector<1x16x32xf32>
    %53 = vector.shape_cast %52 : vector<1x16x32xf32> to vector<16x32xf32>
    %cst_24 = arith.constant dense<0.000000e+00> : vector<16x16xf32>
    %54 = tpu.matmul %33, %47, %cst_24 {dimension_numbers = #tpu.dot_dimension_numbers<[1], [0], [0], [1], [0, 0, 1, 1], [], []>} : vector<16x32xf32>, vector<32x16xf32>, vector<16x16xf32> -> vector<16x16xf32>
    %55 = vector.extract_strided_slice %35 {offsets = [0, 0], sizes = [1, 16], strides = [1, 1]} : vector<1x32xf32> to vector<1x16xf32>
    %56 = vector.broadcast %55 : vector<1x16xf32> to vector<16x16xf32>
    %57 = arith.addf %54, %56 : vector<16x16xf32>
    %58 = vector.shape_cast %57 : vector<16x16xf32> to vector<2x8x16xf32>
    %cst_25 = arith.constant dense<0.000000e+00> : vector<16x16xf32>
    %59 = tpu.matmul %33, %49, %cst_25 {dimension_numbers = #tpu.dot_dimension_numbers<[1], [0], [0], [1], [0, 0, 1, 1], [], []>} : vector<16x32xf32>, vector<32x16xf32>, vector<16x16xf32> -> vector<16x16xf32>
    %60 = vector.extract_strided_slice %36 {offsets = [0, 0], sizes = [1, 16], strides = [1, 1]} : vector<1x32xf32> to vector<1x16xf32>
    %61 = vector.broadcast %60 : vector<1x16xf32> to vector<16x16xf32>
    %62 = arith.addf %59, %61 : vector<16x16xf32>
    %63 = vector.shape_cast %62 : vector<16x16xf32> to vector<2x8x16xf32>
    %cst_26 = arith.constant dense<0.000000e+00> : vector<16x16xf32>
    %64 = tpu.matmul %33, %51, %cst_26 {dimension_numbers = #tpu.dot_dimension_numbers<[1], [0], [0], [1], [0, 0, 1, 1], [], []>} : vector<16x32xf32>, vector<32x16xf32>, vector<16x16xf32> -> vector<16x16xf32>
    %65 = vector.extract_strided_slice %37 {offsets = [0, 0], sizes = [1, 16], strides = [1, 1]} : vector<1x32xf32> to vector<1x16xf32>
    %66 = vector.broadcast %65 : vector<1x16xf32> to vector<16x16xf32>
    %67 = arith.addf %64, %66 : vector<16x16xf32>
    %68 = vector.shape_cast %67 : vector<16x16xf32> to vector<2x8x16xf32>
    "tpu.trace_start"() <{level = 10 : i32, message = "bqd,bkd->bqk"}> : () -> ()
    %cst_27 = arith.constant dense<0.000000e+00> : vector<2x8x8xf32>
    %69 = tpu.matmul %58, %63, %cst_27 {dimension_numbers = #tpu.dot_dimension_numbers<[2], [2], [1], [1], [0, 0, 0, 1, 1, 1], [0], [0]>} : vector<2x8x16xf32>, vector<2x8x16xf32>, vector<2x8x8xf32> -> vector<2x8x8xf32>
    "tpu.trace_stop"() : () -> ()
    %cst_28 = arith.constant 2.500000e-01 : f32
    %70 = vector.broadcast %cst_28 : f32 to vector<2x8x8xf32>
    %71 = arith.mulf %69, %70 : vector<2x8x8xf32>
    %cst_29 = arith.constant dense<0xFF800000> : vector<2x8xf32>
    %72 = vector.multi_reduction <maximumf>, %71, %cst_29 [2] : vector<2x8x8xf32> to vector<2x8xf32>
    %73 = vector.shape_cast %72 : vector<2x8xf32> to vector<2x8x1xf32>
    %74 = vector.broadcast %73 : vector<2x8x1xf32> to vector<2x8x8xf32>
    %75 = arith.subf %71, %74 : vector<2x8x8xf32>
    %76 = math.exp %75 : vector<2x8x8xf32>
    %cst_30 = arith.constant dense<0.000000e+00> : vector<2x8xf32>
    %77 = vector.multi_reduction <add>, %76, %cst_30 [2] : vector<2x8x8xf32> to vector<2x8xf32>
    %78 = vector.shape_cast %77 : vector<2x8xf32> to vector<2x8x1xf32>
    %79 = tpu.reciprocal %78 {approx = true} : vector<2x8x1xf32> -> vector<2x8x1xf32>
    %80 = vector.broadcast %79 : vector<2x8x1xf32> to vector<2x8x8xf32>
    %81 = arith.mulf %76, %80 : vector<2x8x8xf32>
    "tpu.trace_start"() <{level = 10 : i32, message = "bqk,bkd->bqd"}> : () -> ()
    %cst_31 = arith.constant dense<0.000000e+00> : vector<2x8x16xf32>
    %82 = tpu.matmul %81, %68, %cst_31 {dimension_numbers = #tpu.dot_dimension_numbers<[2], [1], [1], [2], [0, 0, 0, 1, 1, 2], [0], [0]>} : vector<2x8x8xf32>, vector<2x8x16xf32>, vector<2x8x16xf32> -> vector<2x8x16xf32>
    "tpu.trace_stop"() : () -> ()
    %83 = vector.shape_cast %82 : vector<2x8x16xf32> to vector<16x16xf32>
    %cst_32 = arith.constant dense<0.000000e+00> : vector<16x32xf32>
    %84 = tpu.matmul %83, %53, %cst_32 {dimension_numbers = #tpu.dot_dimension_numbers<[1], [0], [0], [1], [0, 0, 1, 1], [], []>} : vector<16x16xf32>, vector<16x32xf32>, vector<16x32xf32> -> vector<16x32xf32>
    %85 = arith.addf %45, %84 : vector<16x32xf32>
    %c1 = arith.constant 1 : index
    %c0_33 = arith.constant 0 : index
    %c0_34 = arith.constant 0 : index
    %86 = vector.load %arg5[%c1, %c0_33, %c0_34] : memref<12x32x16xf32, #tpu.memory_space<vmem>>, vector<1x32x16xf32>
    %87 = vector.shape_cast %86 : vector<1x32x16xf32> to vector<32x16xf32>
    %c3 = arith.constant 3 : index
    %c0_35 = arith.constant 0 : index
    %c0_36 = arith.constant 0 : index
    %88 = vector.load %arg5[%c3, %c0_35, %c0_36] : memref<12x32x16xf32, #tpu.memory_space<vmem>>, vector<1x32x16xf32>
    %89 = vector.shape_cast %88 : vector<1x32x16xf32> to vector<32x16xf32>
    %c5 = arith.constant 5 : index
    %c0_37 = arith.constant 0 : index
    %c0_38 = arith.constant 0 : index
    %90 = vector.load %arg5[%c5, %c0_37, %c0_38] : memref<12x32x16xf32, #tpu.memory_space<vmem>>, vector<1x32x16xf32>
    %91 = vector.shape_cast %90 : vector<1x32x16xf32> to vector<32x16xf32>
    %c1_39 = arith.constant 1 : index
    %c0_40 = arith.constant 0 : index
    %c0_41 = arith.constant 0 : index
    %92 = vector.load %arg6[%c1_39, %c0_40, %c0_41] : memref<4x16x32xf32, #tpu.memory_space<vmem>>, vector<1x16x32xf32>
    %93 = vector.shape_cast %92 : vector<1x16x32xf32> to vector<16x32xf32>
    %cst_42 = arith.constant dense<0.000000e+00> : vector<16x16xf32>
    %94 = tpu.matmul %33, %87, %cst_42 {dimension_numbers = #tpu.dot_dimension_numbers<[1], [0], [0], [1], [0, 0, 1, 1], [], []>} : vector<16x32xf32>, vector<32x16xf32>, vector<16x16xf32> -> vector<16x16xf32>
    %95 = vector.extract_strided_slice %35 {offsets = [0, 16], sizes = [1, 16], strides = [1, 1]} : vector<1x32xf32> to vector<1x16xf32>
    %96 = vector.broadcast %95 : vector<1x16xf32> to vector<16x16xf32>
    %97 = arith.addf %94, %96 : vector<16x16xf32>
    %98 = vector.shape_cast %97 : vector<16x16xf32> to vector<2x8x16xf32>
    %cst_43 = arith.constant dense<0.000000e+00> : vector<16x16xf32>
    %99 = tpu.matmul %33, %89, %cst_43 {dimension_numbers = #tpu.dot_dimension_numbers<[1], [0], [0], [1], [0, 0, 1, 1], [], []>} : vector<16x32xf32>, vector<32x16xf32>, vector<16x16xf32> -> vector<16x16xf32>
    %100 = vector.extract_strided_slice %36 {offsets = [0, 16], sizes = [1, 16], strides = [1, 1]} : vector<1x32xf32> to vector<1x16xf32>
    %101 = vector.broadcast %100 : vector<1x16xf32> to vector<16x16xf32>
    %102 = arith.addf %99, %101 : vector<16x16xf32>
    %103 = vector.shape_cast %102 : vector<16x16xf32> to vector<2x8x16xf32>
    %cst_44 = arith.constant dense<0.000000e+00> : vector<16x16xf32>
    %104 = tpu.matmul %33, %91, %cst_44 {dimension_numbers = #tpu.dot_dimension_numbers<[1], [0], [0], [1], [0, 0, 1, 1], [], []>} : vector<16x32xf32>, vector<32x16xf32>, vector<16x16xf32> -> vector<16x16xf32>
    %105 = vector.extract_strided_slice %37 {offsets = [0, 16], sizes = [1, 16], strides = [1, 1]} : vector<1x32xf32> to vector<1x16xf32>
    %106 = vector.broadcast %105 : vector<1x16xf32> to vector<16x16xf32>
    %107 = arith.addf %104, %106 : vector<16x16xf32>
    %108 = vector.shape_cast %107 : vector<16x16xf32> to vector<2x8x16xf32>
    "tpu.trace_start"() <{level = 10 : i32, message = "bqd,bkd->bqk"}> : () -> ()
    %cst_45 = arith.constant dense<0.000000e+00> : vector<2x8x8xf32>
    %109 = tpu.matmul %98, %103, %cst_45 {dimension_numbers = #tpu.dot_dimension_numbers<[2], [2], [1], [1], [0, 0, 0, 1, 1, 1], [0], [0]>} : vector<2x8x16xf32>, vector<2x8x16xf32>, vector<2x8x8xf32> -> vector<2x8x8xf32>
    "tpu.trace_stop"() : () -> ()
    %cst_46 = arith.constant 2.500000e-01 : f32
    %110 = vector.broadcast %cst_46 : f32 to vector<2x8x8xf32>
    %111 = arith.mulf %109, %110 : vector<2x8x8xf32>
    %cst_47 = arith.constant dense<0xFF800000> : vector<2x8xf32>
    %112 = vector.multi_reduction <maximumf>, %111, %cst_47 [2] : vector<2x8x8xf32> to vector<2x8xf32>
    %113 = vector.shape_cast %112 : vector<2x8xf32> to vector<2x8x1xf32>
    %114 = vector.broadcast %113 : vector<2x8x1xf32> to vector<2x8x8xf32>
    %115 = arith.subf %111, %114 : vector<2x8x8xf32>
    %116 = math.exp %115 : vector<2x8x8xf32>
    %cst_48 = arith.constant dense<0.000000e+00> : vector<2x8xf32>
    %117 = vector.multi_reduction <add>, %116, %cst_48 [2] : vector<2x8x8xf32> to vector<2x8xf32>
    %118 = vector.shape_cast %117 : vector<2x8xf32> to vector<2x8x1xf32>
    %119 = tpu.reciprocal %118 {approx = true} : vector<2x8x1xf32> -> vector<2x8x1xf32>
    %120 = vector.broadcast %119 : vector<2x8x1xf32> to vector<2x8x8xf32>
    %121 = arith.mulf %116, %120 : vector<2x8x8xf32>
    "tpu.trace_start"() <{level = 10 : i32, message = "bqk,bkd->bqd"}> : () -> ()
    %cst_49 = arith.constant dense<0.000000e+00> : vector<2x8x16xf32>
    %122 = tpu.matmul %121, %108, %cst_49 {dimension_numbers = #tpu.dot_dimension_numbers<[2], [1], [1], [2], [0, 0, 0, 1, 1, 2], [0], [0]>} : vector<2x8x8xf32>, vector<2x8x16xf32>, vector<2x8x16xf32> -> vector<2x8x16xf32>
    "tpu.trace_stop"() : () -> ()
    %123 = vector.shape_cast %122 : vector<2x8x16xf32> to vector<16x16xf32>
    %cst_50 = arith.constant dense<0.000000e+00> : vector<16x32xf32>
    %124 = tpu.matmul %123, %93, %cst_50 {dimension_numbers = #tpu.dot_dimension_numbers<[1], [0], [0], [1], [0, 0, 1, 1], [], []>} : vector<16x16xf32>, vector<16x32xf32>, vector<16x32xf32> -> vector<16x32xf32>
    %125 = arith.addf %85, %124 : vector<16x32xf32>
    %126 = vector.broadcast %38 : vector<1x32xf32> to vector<16x32xf32>
    %127 = arith.addf %125, %126 : vector<16x32xf32>
    %128 = arith.addf %33, %127 : vector<16x32xf32>
    %cst_51 = arith.constant dense<0.000000e+00> : vector<16xf32>
    %129 = vector.multi_reduction <add>, %128, %cst_51 [1] : vector<16x32xf32> to vector<16xf32>
    %130 = vector.shape_cast %129 : vector<16xf32> to vector<16x1xf32>
    %cst_52 = arith.constant 3.200000e+01 : f32
    %131 = vector.broadcast %cst_52 : f32 to vector<16x1xf32>
    %132 = arith.divf %130, %131 : vector<16x1xf32>
    %133 = vector.broadcast %132 : vector<16x1xf32> to vector<16x32xf32>
    %134 = arith.subf %128, %133 : vector<16x32xf32>
    %135 = arith.mulf %134, %134 : vector<16x32xf32>
    %cst_53 = arith.constant dense<0.000000e+00> : vector<16xf32>
    %136 = vector.multi_reduction <add>, %135, %cst_53 [1] : vector<16x32xf32> to vector<16xf32>
    %137 = vector.shape_cast %136 : vector<16xf32> to vector<16x1xf32>
    %cst_54 = arith.constant 3.200000e+01 : f32
    %138 = vector.broadcast %cst_54 : f32 to vector<16x1xf32>
    %139 = arith.divf %137, %138 : vector<16x1xf32>
    %140 = vector.broadcast %132 : vector<16x1xf32> to vector<16x32xf32>
    %141 = arith.subf %128, %140 : vector<16x32xf32>
    %cst_55 = arith.constant 9.99999974E-6 : f32
    %142 = vector.broadcast %cst_55 : f32 to vector<16x1xf32>
    %143 = arith.addf %139, %142 : vector<16x1xf32>
    %144 = math.rsqrt %143 : vector<16x1xf32>
    %145 = vector.broadcast %144 : vector<16x1xf32> to vector<16x32xf32>
    %146 = arith.mulf %141, %145 : vector<16x32xf32>
    %147 = vector.broadcast %39 : vector<1x32xf32> to vector<16x32xf32>
    %148 = arith.mulf %146, %147 : vector<16x32xf32>
    %149 = vector.broadcast %40 : vector<1x32xf32> to vector<16x32xf32>
    %150 = arith.addf %148, %149 : vector<16x32xf32>
    %c0_56 = arith.constant 0 : index
    %c0_57 = arith.constant 0 : index
    %c0_58 = arith.constant 0 : index
    %151 = vector.load %arg7[%c0_56, %c0_57, %c0_58] : memref<4x32x32xf32, #tpu.memory_space<vmem>>, vector<1x32x32xf32>
    %152 = vector.shape_cast %151 : vector<1x32x32xf32> to vector<32x32xf32>
    %cst_59 = arith.constant dense<0.000000e+00> : vector<16x32xf32>
    %153 = tpu.matmul %150, %152, %cst_59 {dimension_numbers = #tpu.dot_dimension_numbers<[1], [0], [0], [1], [0, 0, 1, 1], [], []>} : vector<16x32xf32>, vector<32x32xf32>, vector<16x32xf32> -> vector<16x32xf32>
    %154 = vector.broadcast %41 : vector<1x32xf32> to vector<16x32xf32>
    %155 = arith.addf %153, %154 : vector<16x32xf32>
    %cst_60 = arith.constant 0.000000e+00 : f32
    %156 = vector.broadcast %cst_60 : f32 to vector<16x32xf32>
    %157 = arith.maximumf %155, %156 : vector<16x32xf32>
    %c1_61 = arith.constant 1 : index
    %c0_62 = arith.constant 0 : index
    %c0_63 = arith.constant 0 : index
    %158 = vector.load %arg7[%c1_61, %c0_62, %c0_63] : memref<4x32x32xf32, #tpu.memory_space<vmem>>, vector<1x32x32xf32>
    %159 = vector.shape_cast %158 : vector<1x32x32xf32> to vector<32x32xf32>
    %cst_64 = arith.constant dense<0.000000e+00> : vector<16x32xf32>
    %160 = tpu.matmul %157, %159, %cst_64 {dimension_numbers = #tpu.dot_dimension_numbers<[1], [0], [0], [1], [0, 0, 1, 1], [], []>} : vector<16x32xf32>, vector<32x32xf32>, vector<16x32xf32> -> vector<16x32xf32>
    %161 = vector.broadcast %42 : vector<1x32xf32> to vector<16x32xf32>
    %162 = arith.addf %160, %161 : vector<16x32xf32>
    %163 = arith.addf %150, %162 : vector<16x32xf32>
    %cst_65 = arith.constant dense<0.000000e+00> : vector<16xf32>
    %164 = vector.multi_reduction <add>, %163, %cst_65 [1] : vector<16x32xf32> to vector<16xf32>
    %165 = vector.shape_cast %164 : vector<16xf32> to vector<16x1xf32>
    %cst_66 = arith.constant 3.200000e+01 : f32
    %166 = vector.broadcast %cst_66 : f32 to vector<16x1xf32>
    %167 = arith.divf %165, %166 : vector<16x1xf32>
    %168 = vector.broadcast %167 : vector<16x1xf32> to vector<16x32xf32>
    %169 = arith.subf %163, %168 : vector<16x32xf32>
    %170 = arith.mulf %169, %169 : vector<16x32xf32>
    %cst_67 = arith.constant dense<0.000000e+00> : vector<16xf32>
    %171 = vector.multi_reduction <add>, %170, %cst_67 [1] : vector<16x32xf32> to vector<16xf32>
    %172 = vector.shape_cast %171 : vector<16xf32> to vector<16x1xf32>
    %cst_68 = arith.constant 3.200000e+01 : f32
    %173 = vector.broadcast %cst_68 : f32 to vector<16x1xf32>
    %174 = arith.divf %172, %173 : vector<16x1xf32>
    %175 = vector.broadcast %167 : vector<16x1xf32> to vector<16x32xf32>
    %176 = arith.subf %163, %175 : vector<16x32xf32>
    %cst_69 = arith.constant 9.99999974E-6 : f32
    %177 = vector.broadcast %cst_69 : f32 to vector<16x1xf32>
    %178 = arith.addf %174, %177 : vector<16x1xf32>
    %179 = math.rsqrt %178 : vector<16x1xf32>
    %180 = vector.broadcast %179 : vector<16x1xf32> to vector<16x32xf32>
    %181 = arith.mulf %176, %180 : vector<16x32xf32>
    %182 = vector.broadcast %43 : vector<1x32xf32> to vector<16x32xf32>
    %183 = arith.mulf %181, %182 : vector<16x32xf32>
    %184 = vector.broadcast %44 : vector<1x32xf32> to vector<16x32xf32>
    %185 = arith.addf %183, %184 : vector<16x32xf32>
    %186 = arith.mulf %185, %31 : vector<16x32xf32>
    %187 = vector.extract_strided_slice %34 {offsets = [10, 0], sizes = [1, 32], strides = [1, 1]} : vector<20x32xf32> to vector<1x32xf32>
    %188 = vector.extract_strided_slice %34 {offsets = [11, 0], sizes = [1, 32], strides = [1, 1]} : vector<20x32xf32> to vector<1x32xf32>
    %189 = vector.extract_strided_slice %34 {offsets = [12, 0], sizes = [1, 32], strides = [1, 1]} : vector<20x32xf32> to vector<1x32xf32>
    %190 = vector.extract_strided_slice %34 {offsets = [13, 0], sizes = [1, 32], strides = [1, 1]} : vector<20x32xf32> to vector<1x32xf32>
    %191 = vector.extract_strided_slice %34 {offsets = [14, 0], sizes = [1, 32], strides = [1, 1]} : vector<20x32xf32> to vector<1x32xf32>
    %192 = vector.extract_strided_slice %34 {offsets = [15, 0], sizes = [1, 32], strides = [1, 1]} : vector<20x32xf32> to vector<1x32xf32>
    %193 = vector.extract_strided_slice %34 {offsets = [16, 0], sizes = [1, 32], strides = [1, 1]} : vector<20x32xf32> to vector<1x32xf32>
    %194 = vector.extract_strided_slice %34 {offsets = [17, 0], sizes = [1, 32], strides = [1, 1]} : vector<20x32xf32> to vector<1x32xf32>
    %195 = vector.extract_strided_slice %34 {offsets = [18, 0], sizes = [1, 32], strides = [1, 1]} : vector<20x32xf32> to vector<1x32xf32>
    %196 = vector.extract_strided_slice %34 {offsets = [19, 0], sizes = [1, 32], strides = [1, 1]} : vector<20x32xf32> to vector<1x32xf32>
    %cst_70 = arith.constant 0.000000e+00 : f32
    %197 = vector.broadcast %cst_70 : f32 to vector<16x32xf32>
    %c6 = arith.constant 6 : index
    %c0_71 = arith.constant 0 : index
    %c0_72 = arith.constant 0 : index
    %198 = vector.load %arg5[%c6, %c0_71, %c0_72] : memref<12x32x16xf32, #tpu.memory_space<vmem>>, vector<1x32x16xf32>
    %199 = vector.shape_cast %198 : vector<1x32x16xf32> to vector<32x16xf32>
    %c8 = arith.constant 8 : index
    %c0_73 = arith.constant 0 : index
    %c0_74 = arith.constant 0 : index
    %200 = vector.load %arg5[%c8, %c0_73, %c0_74] : memref<12x32x16xf32, #tpu.memory_space<vmem>>, vector<1x32x16xf32>
    %201 = vector.shape_cast %200 : vector<1x32x16xf32> to vector<32x16xf32>
    %c10 = arith.constant 10 : index
    %c0_75 = arith.constant 0 : index
    %c0_76 = arith.constant 0 : index
    %202 = vector.load %arg5[%c10, %c0_75, %c0_76] : memref<12x32x16xf32, #tpu.memory_space<vmem>>, vector<1x32x16xf32>
    %203 = vector.shape_cast %202 : vector<1x32x16xf32> to vector<32x16xf32>
    %c2_77 = arith.constant 2 : index
    %c0_78 = arith.constant 0 : index
    %c0_79 = arith.constant 0 : index
    %204 = vector.load %arg6[%c2_77, %c0_78, %c0_79] : memref<4x16x32xf32, #tpu.memory_space<vmem>>, vector<1x16x32xf32>
    %205 = vector.shape_cast %204 : vector<1x16x32xf32> to vector<16x32xf32>
    %cst_80 = arith.constant dense<0.000000e+00> : vector<16x16xf32>
    %206 = tpu.matmul %186, %199, %cst_80 {dimension_numbers = #tpu.dot_dimension_numbers<[1], [0], [0], [1], [0, 0, 1, 1], [], []>} : vector<16x32xf32>, vector<32x16xf32>, vector<16x16xf32> -> vector<16x16xf32>
    %207 = vector.extract_strided_slice %187 {offsets = [0, 0], sizes = [1, 16], strides = [1, 1]} : vector<1x32xf32> to vector<1x16xf32>
    %208 = vector.broadcast %207 : vector<1x16xf32> to vector<16x16xf32>
    %209 = arith.addf %206, %208 : vector<16x16xf32>
    %210 = vector.shape_cast %209 : vector<16x16xf32> to vector<2x8x16xf32>
    %cst_81 = arith.constant dense<0.000000e+00> : vector<16x16xf32>
    %211 = tpu.matmul %186, %201, %cst_81 {dimension_numbers = #tpu.dot_dimension_numbers<[1], [0], [0], [1], [0, 0, 1, 1], [], []>} : vector<16x32xf32>, vector<32x16xf32>, vector<16x16xf32> -> vector<16x16xf32>
    %212 = vector.extract_strided_slice %188 {offsets = [0, 0], sizes = [1, 16], strides = [1, 1]} : vector<1x32xf32> to vector<1x16xf32>
    %213 = vector.broadcast %212 : vector<1x16xf32> to vector<16x16xf32>
    %214 = arith.addf %211, %213 : vector<16x16xf32>
    %215 = vector.shape_cast %214 : vector<16x16xf32> to vector<2x8x16xf32>
    %cst_82 = arith.constant dense<0.000000e+00> : vector<16x16xf32>
    %216 = tpu.matmul %186, %203, %cst_82 {dimension_numbers = #tpu.dot_dimension_numbers<[1], [0], [0], [1], [0, 0, 1, 1], [], []>} : vector<16x32xf32>, vector<32x16xf32>, vector<16x16xf32> -> vector<16x16xf32>
    %217 = vector.extract_strided_slice %189 {offsets = [0, 0], sizes = [1, 16], strides = [1, 1]} : vector<1x32xf32> to vector<1x16xf32>
    %218 = vector.broadcast %217 : vector<1x16xf32> to vector<16x16xf32>
    %219 = arith.addf %216, %218 : vector<16x16xf32>
    %220 = vector.shape_cast %219 : vector<16x16xf32> to vector<2x8x16xf32>
    "tpu.trace_start"() <{level = 10 : i32, message = "bqd,bkd->bqk"}> : () -> ()
    %cst_83 = arith.constant dense<0.000000e+00> : vector<2x8x8xf32>
    %221 = tpu.matmul %210, %215, %cst_83 {dimension_numbers = #tpu.dot_dimension_numbers<[2], [2], [1], [1], [0, 0, 0, 1, 1, 1], [0], [0]>} : vector<2x8x16xf32>, vector<2x8x16xf32>, vector<2x8x8xf32> -> vector<2x8x8xf32>
    "tpu.trace_stop"() : () -> ()
    %cst_84 = arith.constant 2.500000e-01 : f32
    %222 = vector.broadcast %cst_84 : f32 to vector<2x8x8xf32>
    %223 = arith.mulf %221, %222 : vector<2x8x8xf32>
    %cst_85 = arith.constant dense<0xFF800000> : vector<2x8xf32>
    %224 = vector.multi_reduction <maximumf>, %223, %cst_85 [2] : vector<2x8x8xf32> to vector<2x8xf32>
    %225 = vector.shape_cast %224 : vector<2x8xf32> to vector<2x8x1xf32>
    %226 = vector.broadcast %225 : vector<2x8x1xf32> to vector<2x8x8xf32>
    %227 = arith.subf %223, %226 : vector<2x8x8xf32>
    %228 = math.exp %227 : vector<2x8x8xf32>
    %cst_86 = arith.constant dense<0.000000e+00> : vector<2x8xf32>
    %229 = vector.multi_reduction <add>, %228, %cst_86 [2] : vector<2x8x8xf32> to vector<2x8xf32>
    %230 = vector.shape_cast %229 : vector<2x8xf32> to vector<2x8x1xf32>
    %231 = tpu.reciprocal %230 {approx = true} : vector<2x8x1xf32> -> vector<2x8x1xf32>
    %232 = vector.broadcast %231 : vector<2x8x1xf32> to vector<2x8x8xf32>
    %233 = arith.mulf %228, %232 : vector<2x8x8xf32>
    "tpu.trace_start"() <{level = 10 : i32, message = "bqk,bkd->bqd"}> : () -> ()
    %cst_87 = arith.constant dense<0.000000e+00> : vector<2x8x16xf32>
    %234 = tpu.matmul %233, %220, %cst_87 {dimension_numbers = #tpu.dot_dimension_numbers<[2], [1], [1], [2], [0, 0, 0, 1, 1, 2], [0], [0]>} : vector<2x8x8xf32>, vector<2x8x16xf32>, vector<2x8x16xf32> -> vector<2x8x16xf32>
    "tpu.trace_stop"() : () -> ()
    %235 = vector.shape_cast %234 : vector<2x8x16xf32> to vector<16x16xf32>
    %cst_88 = arith.constant dense<0.000000e+00> : vector<16x32xf32>
    %236 = tpu.matmul %235, %205, %cst_88 {dimension_numbers = #tpu.dot_dimension_numbers<[1], [0], [0], [1], [0, 0, 1, 1], [], []>} : vector<16x16xf32>, vector<16x32xf32>, vector<16x32xf32> -> vector<16x32xf32>
    %237 = arith.addf %197, %236 : vector<16x32xf32>
    %c7 = arith.constant 7 : index
    %c0_89 = arith.constant 0 : index
    %c0_90 = arith.constant 0 : index
    %238 = vector.load %arg5[%c7, %c0_89, %c0_90] : memref<12x32x16xf32, #tpu.memory_space<vmem>>, vector<1x32x16xf32>
    %239 = vector.shape_cast %238 : vector<1x32x16xf32> to vector<32x16xf32>
    %c9 = arith.constant 9 : index
    %c0_91 = arith.constant 0 : index
    %c0_92 = arith.constant 0 : index
    %240 = vector.load %arg5[%c9, %c0_91, %c0_92] : memref<12x32x16xf32, #tpu.memory_space<vmem>>, vector<1x32x16xf32>
    %241 = vector.shape_cast %240 : vector<1x32x16xf32> to vector<32x16xf32>
    %c11 = arith.constant 11 : index
    %c0_93 = arith.constant 0 : index
    %c0_94 = arith.constant 0 : index
    %242 = vector.load %arg5[%c11, %c0_93, %c0_94] : memref<12x32x16xf32, #tpu.memory_space<vmem>>, vector<1x32x16xf32>
    %243 = vector.shape_cast %242 : vector<1x32x16xf32> to vector<32x16xf32>
    %c3_95 = arith.constant 3 : index
    %c0_96 = arith.constant 0 : index
    %c0_97 = arith.constant 0 : index
    %244 = vector.load %arg6[%c3_95, %c0_96, %c0_97] : memref<4x16x32xf32, #tpu.memory_space<vmem>>, vector<1x16x32xf32>
    %245 = vector.shape_cast %244 : vector<1x16x32xf32> to vector<16x32xf32>
    %cst_98 = arith.constant dense<0.000000e+00> : vector<16x16xf32>
    %246 = tpu.matmul %186, %239, %cst_98 {dimension_numbers = #tpu.dot_dimension_numbers<[1], [0], [0], [1], [0, 0, 1, 1], [], []>} : vector<16x32xf32>, vector<32x16xf32>, vector<16x16xf32> -> vector<16x16xf32>
    %247 = vector.extract_strided_slice %187 {offsets = [0, 16], sizes = [1, 16], strides = [1, 1]} : vector<1x32xf32> to vector<1x16xf32>
    %248 = vector.broadcast %247 : vector<1x16xf32> to vector<16x16xf32>
    %249 = arith.addf %246, %248 : vector<16x16xf32>
    %250 = vector.shape_cast %249 : vector<16x16xf32> to vector<2x8x16xf32>
    %cst_99 = arith.constant dense<0.000000e+00> : vector<16x16xf32>
    %251 = tpu.matmul %186, %241, %cst_99 {dimension_numbers = #tpu.dot_dimension_numbers<[1], [0], [0], [1], [0, 0, 1, 1], [], []>} : vector<16x32xf32>, vector<32x16xf32>, vector<16x16xf32> -> vector<16x16xf32>
    %252 = vector.extract_strided_slice %188 {offsets = [0, 16], sizes = [1, 16], strides = [1, 1]} : vector<1x32xf32> to vector<1x16xf32>
    %253 = vector.broadcast %252 : vector<1x16xf32> to vector<16x16xf32>
    %254 = arith.addf %251, %253 : vector<16x16xf32>
    %255 = vector.shape_cast %254 : vector<16x16xf32> to vector<2x8x16xf32>
    %cst_100 = arith.constant dense<0.000000e+00> : vector<16x16xf32>
    %256 = tpu.matmul %186, %243, %cst_100 {dimension_numbers = #tpu.dot_dimension_numbers<[1], [0], [0], [1], [0, 0, 1, 1], [], []>} : vector<16x32xf32>, vector<32x16xf32>, vector<16x16xf32> -> vector<16x16xf32>
    %257 = vector.extract_strided_slice %189 {offsets = [0, 16], sizes = [1, 16], strides = [1, 1]} : vector<1x32xf32> to vector<1x16xf32>
    %258 = vector.broadcast %257 : vector<1x16xf32> to vector<16x16xf32>
    %259 = arith.addf %256, %258 : vector<16x16xf32>
    %260 = vector.shape_cast %259 : vector<16x16xf32> to vector<2x8x16xf32>
    "tpu.trace_start"() <{level = 10 : i32, message = "bqd,bkd->bqk"}> : () -> ()
    %cst_101 = arith.constant dense<0.000000e+00> : vector<2x8x8xf32>
    %261 = tpu.matmul %250, %255, %cst_101 {dimension_numbers = #tpu.dot_dimension_numbers<[2], [2], [1], [1], [0, 0, 0, 1, 1, 1], [0], [0]>} : vector<2x8x16xf32>, vector<2x8x16xf32>, vector<2x8x8xf32> -> vector<2x8x8xf32>
    "tpu.trace_stop"() : () -> ()
    %cst_102 = arith.constant 2.500000e-01 : f32
    %262 = vector.broadcast %cst_102 : f32 to vector<2x8x8xf32>
    %263 = arith.mulf %261, %262 : vector<2x8x8xf32>
    %cst_103 = arith.constant dense<0xFF800000> : vector<2x8xf32>
    %264 = vector.multi_reduction <maximumf>, %263, %cst_103 [2] : vector<2x8x8xf32> to vector<2x8xf32>
    %265 = vector.shape_cast %264 : vector<2x8xf32> to vector<2x8x1xf32>
    %266 = vector.broadcast %265 : vector<2x8x1xf32> to vector<2x8x8xf32>
    %267 = arith.subf %263, %266 : vector<2x8x8xf32>
    %268 = math.exp %267 : vector<2x8x8xf32>
    %cst_104 = arith.constant dense<0.000000e+00> : vector<2x8xf32>
    %269 = vector.multi_reduction <add>, %268, %cst_104 [2] : vector<2x8x8xf32> to vector<2x8xf32>
    %270 = vector.shape_cast %269 : vector<2x8xf32> to vector<2x8x1xf32>
    %271 = tpu.reciprocal %270 {approx = true} : vector<2x8x1xf32> -> vector<2x8x1xf32>
    %272 = vector.broadcast %271 : vector<2x8x1xf32> to vector<2x8x8xf32>
    %273 = arith.mulf %268, %272 : vector<2x8x8xf32>
    "tpu.trace_start"() <{level = 10 : i32, message = "bqk,bkd->bqd"}> : () -> ()
    %cst_105 = arith.constant dense<0.000000e+00> : vector<2x8x16xf32>
    %274 = tpu.matmul %273, %260, %cst_105 {dimension_numbers = #tpu.dot_dimension_numbers<[2], [1], [1], [2], [0, 0, 0, 1, 1, 2], [0], [0]>} : vector<2x8x8xf32>, vector<2x8x16xf32>, vector<2x8x16xf32> -> vector<2x8x16xf32>
    "tpu.trace_stop"() : () -> ()
    %275 = vector.shape_cast %274 : vector<2x8x16xf32> to vector<16x16xf32>
    %cst_106 = arith.constant dense<0.000000e+00> : vector<16x32xf32>
    %276 = tpu.matmul %275, %245, %cst_106 {dimension_numbers = #tpu.dot_dimension_numbers<[1], [0], [0], [1], [0, 0, 1, 1], [], []>} : vector<16x16xf32>, vector<16x32xf32>, vector<16x32xf32> -> vector<16x32xf32>
    %277 = arith.addf %237, %276 : vector<16x32xf32>
    %278 = vector.broadcast %190 : vector<1x32xf32> to vector<16x32xf32>
    %279 = arith.addf %277, %278 : vector<16x32xf32>
    %280 = arith.addf %186, %279 : vector<16x32xf32>
    %cst_107 = arith.constant dense<0.000000e+00> : vector<16xf32>
    %281 = vector.multi_reduction <add>, %280, %cst_107 [1] : vector<16x32xf32> to vector<16xf32>
    %282 = vector.shape_cast %281 : vector<16xf32> to vector<16x1xf32>
    %cst_108 = arith.constant 3.200000e+01 : f32
    %283 = vector.broadcast %cst_108 : f32 to vector<16x1xf32>
    %284 = arith.divf %282, %283 : vector<16x1xf32>
    %285 = vector.broadcast %284 : vector<16x1xf32> to vector<16x32xf32>
    %286 = arith.subf %280, %285 : vector<16x32xf32>
    %287 = arith.mulf %286, %286 : vector<16x32xf32>
    %cst_109 = arith.constant dense<0.000000e+00> : vector<16xf32>
    %288 = vector.multi_reduction <add>, %287, %cst_109 [1] : vector<16x32xf32> to vector<16xf32>
    %289 = vector.shape_cast %288 : vector<16xf32> to vector<16x1xf32>
    %cst_110 = arith.constant 3.200000e+01 : f32
    %290 = vector.broadcast %cst_110 : f32 to vector<16x1xf32>
    %291 = arith.divf %289, %290 : vector<16x1xf32>
    %292 = vector.broadcast %284 : vector<16x1xf32> to vector<16x32xf32>
    %293 = arith.subf %280, %292 : vector<16x32xf32>
    %cst_111 = arith.constant 9.99999974E-6 : f32
    %294 = vector.broadcast %cst_111 : f32 to vector<16x1xf32>
    %295 = arith.addf %291, %294 : vector<16x1xf32>
    %296 = math.rsqrt %295 : vector<16x1xf32>
    %297 = vector.broadcast %296 : vector<16x1xf32> to vector<16x32xf32>
    %298 = arith.mulf %293, %297 : vector<16x32xf32>
    %299 = vector.broadcast %191 : vector<1x32xf32> to vector<16x32xf32>
    %300 = arith.mulf %298, %299 : vector<16x32xf32>
    %301 = vector.broadcast %192 : vector<1x32xf32> to vector<16x32xf32>
    %302 = arith.addf %300, %301 : vector<16x32xf32>
    %c2_112 = arith.constant 2 : index
    %c0_113 = arith.constant 0 : index
    %c0_114 = arith.constant 0 : index
    %303 = vector.load %arg7[%c2_112, %c0_113, %c0_114] : memref<4x32x32xf32, #tpu.memory_space<vmem>>, vector<1x32x32xf32>
    %304 = vector.shape_cast %303 : vector<1x32x32xf32> to vector<32x32xf32>
    %cst_115 = arith.constant dense<0.000000e+00> : vector<16x32xf32>
    %305 = tpu.matmul %302, %304, %cst_115 {dimension_numbers = #tpu.dot_dimension_numbers<[1], [0], [0], [1], [0, 0, 1, 1], [], []>} : vector<16x32xf32>, vector<32x32xf32>, vector<16x32xf32> -> vector<16x32xf32>
    %306 = vector.broadcast %193 : vector<1x32xf32> to vector<16x32xf32>
    %307 = arith.addf %305, %306 : vector<16x32xf32>
    %cst_116 = arith.constant 0.000000e+00 : f32
    %308 = vector.broadcast %cst_116 : f32 to vector<16x32xf32>
    %309 = arith.maximumf %307, %308 : vector<16x32xf32>
    %c3_117 = arith.constant 3 : index
    %c0_118 = arith.constant 0 : index
    %c0_119 = arith.constant 0 : index
    %310 = vector.load %arg7[%c3_117, %c0_118, %c0_119] : memref<4x32x32xf32, #tpu.memory_space<vmem>>, vector<1x32x32xf32>
    %311 = vector.shape_cast %310 : vector<1x32x32xf32> to vector<32x32xf32>
    %cst_120 = arith.constant dense<0.000000e+00> : vector<16x32xf32>
    %312 = tpu.matmul %309, %311, %cst_120 {dimension_numbers = #tpu.dot_dimension_numbers<[1], [0], [0], [1], [0, 0, 1, 1], [], []>} : vector<16x32xf32>, vector<32x32xf32>, vector<16x32xf32> -> vector<16x32xf32>
    %313 = vector.broadcast %194 : vector<1x32xf32> to vector<16x32xf32>
    %314 = arith.addf %312, %313 : vector<16x32xf32>
    %315 = arith.addf %302, %314 : vector<16x32xf32>
    %cst_121 = arith.constant dense<0.000000e+00> : vector<16xf32>
    %316 = vector.multi_reduction <add>, %315, %cst_121 [1] : vector<16x32xf32> to vector<16xf32>
    %317 = vector.shape_cast %316 : vector<16xf32> to vector<16x1xf32>
    %cst_122 = arith.constant 3.200000e+01 : f32
    %318 = vector.broadcast %cst_122 : f32 to vector<16x1xf32>
    %319 = arith.divf %317, %318 : vector<16x1xf32>
    %320 = vector.broadcast %319 : vector<16x1xf32> to vector<16x32xf32>
    %321 = arith.subf %315, %320 : vector<16x32xf32>
    %322 = arith.mulf %321, %321 : vector<16x32xf32>
    %cst_123 = arith.constant dense<0.000000e+00> : vector<16xf32>
    %323 = vector.multi_reduction <add>, %322, %cst_123 [1] : vector<16x32xf32> to vector<16xf32>
    %324 = vector.shape_cast %323 : vector<16xf32> to vector<16x1xf32>
    %cst_124 = arith.constant 3.200000e+01 : f32
    %325 = vector.broadcast %cst_124 : f32 to vector<16x1xf32>
    %326 = arith.divf %324, %325 : vector<16x1xf32>
    %327 = vector.broadcast %319 : vector<16x1xf32> to vector<16x32xf32>
    %328 = arith.subf %315, %327 : vector<16x32xf32>
    %cst_125 = arith.constant 9.99999974E-6 : f32
    %329 = vector.broadcast %cst_125 : f32 to vector<16x1xf32>
    %330 = arith.addf %326, %329 : vector<16x1xf32>
    %331 = math.rsqrt %330 : vector<16x1xf32>
    %332 = vector.broadcast %331 : vector<16x1xf32> to vector<16x32xf32>
    %333 = arith.mulf %328, %332 : vector<16x32xf32>
    %334 = vector.broadcast %195 : vector<1x32xf32> to vector<16x32xf32>
    %335 = arith.mulf %333, %334 : vector<16x32xf32>
    %336 = vector.broadcast %196 : vector<1x32xf32> to vector<16x32xf32>
    %337 = arith.addf %335, %336 : vector<16x32xf32>
    %338 = arith.mulf %337, %31 : vector<16x32xf32>
    %339 = vector.shape_cast %338 : vector<16x32xf32> to vector<2x8x32xf32>
    %340 = vector.extract_strided_slice %339 {offsets = [0, 7, 0], sizes = [2, 1, 32], strides = [1, 1, 1]} : vector<2x8x32xf32> to vector<2x1x32xf32>
    %341 = vector.shape_cast %340 : vector<2x1x32xf32> to vector<2x32xf32>
    %342 = arith.mulf %341, %341 : vector<2x32xf32>
    %cst_126 = arith.constant dense<0.000000e+00> : vector<2xf32>
    %343 = vector.multi_reduction <add>, %342, %cst_126 [1] : vector<2x32xf32> to vector<2xf32>
    %344 = vector.shape_cast %343 : vector<2xf32> to vector<2x1xf32>
    %cst_127 = arith.constant 1.000000e-24 : f32
    %345 = vector.broadcast %cst_127 : f32 to vector<2x1xf32>
    %346 = arith.maximumf %344, %345 : vector<2x1xf32>
    %347 = math.rsqrt %346 : vector<2x1xf32>
    %348 = vector.broadcast %347 : vector<2x1xf32> to vector<2x32xf32>
    %349 = arith.mulf %341, %348 : vector<2x32xf32>
    %c0_128 = arith.constant 0 : index
    %c0_129 = arith.constant 0 : index
    %c0_130 = arith.constant 0 : index
    %350 = vector.load %arg4[%c0_128, %c0_129, %c0_130] : memref<3x2x32xf32, #tpu.memory_space<vmem>>, vector<3x2x32xf32>
    %351 = arith.mulf %350, %350 : vector<3x2x32xf32>
    %cst_131 = arith.constant dense<0.000000e+00> : vector<3x2xf32>
    %352 = vector.multi_reduction <add>, %351, %cst_131 [2] : vector<3x2x32xf32> to vector<3x2xf32>
    %353 = vector.shape_cast %352 : vector<3x2xf32> to vector<3x2x1xf32>
    %cst_132 = arith.constant 1.000000e-24 : f32
    %354 = vector.broadcast %cst_132 : f32 to vector<3x2x1xf32>
    %355 = arith.maximumf %353, %354 : vector<3x2x1xf32>
    %356 = math.rsqrt %355 : vector<3x2x1xf32>
    %357 = vector.broadcast %356 : vector<3x2x1xf32> to vector<3x2x32xf32>
    %358 = arith.mulf %350, %357 : vector<3x2x32xf32>
    %359 = vector.extract_strided_slice %358 {offsets = [0, 0, 0], sizes = [1, 2, 32], strides = [1, 1, 1]} : vector<3x2x32xf32> to vector<1x2x32xf32>
    %360 = vector.shape_cast %359 : vector<1x2x32xf32> to vector<2x32xf32>
    %361 = vector.extract_strided_slice %358 {offsets = [1, 0, 0], sizes = [1, 2, 32], strides = [1, 1, 1]} : vector<3x2x32xf32> to vector<1x2x32xf32>
    %362 = vector.shape_cast %361 : vector<1x2x32xf32> to vector<2x32xf32>
    %363 = vector.extract_strided_slice %358 {offsets = [2, 0, 0], sizes = [1, 2, 32], strides = [1, 1, 1]} : vector<3x2x32xf32> to vector<1x2x32xf32>
    %364 = vector.shape_cast %363 : vector<1x2x32xf32> to vector<2x32xf32>
    %365 = arith.mulf %349, %360 : vector<2x32xf32>
    %cst_133 = arith.constant dense<0.000000e+00> : vector<2xf32>
    %366 = vector.multi_reduction <add>, %365, %cst_133 [1] : vector<2x32xf32> to vector<2xf32>
    %367 = vector.shape_cast %366 : vector<2xf32> to vector<2x1xf32>
    %cst_134 = arith.constant 0.000000e+00 : f32
    %368 = vector.broadcast %cst_134 : f32 to vector<2x1xf32>
    %369 = arith.maximumf %367, %368 : vector<2x1xf32>
    %cst_135 = arith.constant 1.000000e+00 : f32
    %370 = vector.broadcast %cst_135 : f32 to vector<2x1xf32>
    %371 = arith.mulf %367, %370 : vector<2x1xf32>
    %372 = arith.subf %369, %371 : vector<2x1xf32>
    %373 = math.absf %367 : vector<2x1xf32>
    %cst_136 = arith.constant 0.000000e+00 : f32
    %374 = vector.broadcast %cst_136 : f32 to vector<2x1xf32>
    %375 = arith.subf %374, %373 : vector<2x1xf32>
    %376 = math.exp %375 : vector<2x1xf32>
    %377 = math.log1p %376 : vector<2x1xf32>
    %378 = arith.addf %372, %377 : vector<2x1xf32>
    %379 = vector.shape_cast %378 : vector<2x1xf32> to vector<1x2x1xf32>
    %cst_137 = arith.constant dense<0.000000e+00> : vector<1xf32>
    %380 = vector.multi_reduction <add>, %379, %cst_137 [1, 2] : vector<1x2x1xf32> to vector<1xf32>
    %381 = vector.shape_cast %380 : vector<1xf32> to vector<1x1x1xf32>
    %382 = vector.extract %381[0, 0, 0] : f32 from vector<1x1x1xf32>
    %383 = arith.mulf %349, %362 : vector<2x32xf32>
    %cst_138 = arith.constant dense<0.000000e+00> : vector<2xf32>
    %384 = vector.multi_reduction <add>, %383, %cst_138 [1] : vector<2x32xf32> to vector<2xf32>
    %385 = vector.shape_cast %384 : vector<2xf32> to vector<2x1xf32>
    %cst_139 = arith.constant 0.000000e+00 : f32
    %386 = vector.broadcast %cst_139 : f32 to vector<2x1xf32>
    %387 = arith.maximumf %385, %386 : vector<2x1xf32>
    %cst_140 = arith.constant 0.000000e+00 : f32
    %388 = vector.broadcast %cst_140 : f32 to vector<2x1xf32>
    %389 = arith.mulf %385, %388 : vector<2x1xf32>
    %390 = arith.subf %387, %389 : vector<2x1xf32>
    %391 = math.absf %385 : vector<2x1xf32>
    %cst_141 = arith.constant 0.000000e+00 : f32
    %392 = vector.broadcast %cst_141 : f32 to vector<2x1xf32>
    %393 = arith.subf %392, %391 : vector<2x1xf32>
    %394 = math.exp %393 : vector<2x1xf32>
    %395 = math.log1p %394 : vector<2x1xf32>
    %396 = arith.addf %390, %395 : vector<2x1xf32>
    %397 = vector.shape_cast %396 : vector<2x1xf32> to vector<1x2x1xf32>
    %cst_142 = arith.constant dense<0.000000e+00> : vector<1xf32>
    %398 = vector.multi_reduction <add>, %397, %cst_142 [1, 2] : vector<1x2x1xf32> to vector<1xf32>
    %399 = vector.shape_cast %398 : vector<1xf32> to vector<1x1x1xf32>
    %400 = vector.extract %399[0, 0, 0] : f32 from vector<1x1x1xf32>
    %401 = arith.addf %382, %400 : f32
    %402 = arith.mulf %349, %362 : vector<2x32xf32>
    %cst_143 = arith.constant dense<0.000000e+00> : vector<2xf32>
    %403 = vector.multi_reduction <add>, %402, %cst_143 [1] : vector<2x32xf32> to vector<2xf32>
    %404 = vector.shape_cast %403 : vector<2xf32> to vector<2x1xf32>
    %cst_144 = arith.constant 0.000000e+00 : f32
    %405 = vector.broadcast %cst_144 : f32 to vector<2x1xf32>
    %406 = arith.maximumf %404, %405 : vector<2x1xf32>
    %cst_145 = arith.constant 1.000000e+00 : f32
    %407 = vector.broadcast %cst_145 : f32 to vector<2x1xf32>
    %408 = arith.mulf %404, %407 : vector<2x1xf32>
    %409 = arith.subf %406, %408 : vector<2x1xf32>
    %410 = math.absf %404 : vector<2x1xf32>
    %cst_146 = arith.constant 0.000000e+00 : f32
    %411 = vector.broadcast %cst_146 : f32 to vector<2x1xf32>
    %412 = arith.subf %411, %410 : vector<2x1xf32>
    %413 = math.exp %412 : vector<2x1xf32>
    %414 = math.log1p %413 : vector<2x1xf32>
    %415 = arith.addf %409, %414 : vector<2x1xf32>
    %416 = vector.shape_cast %415 : vector<2x1xf32> to vector<1x2x1xf32>
    %cst_147 = arith.constant dense<0.000000e+00> : vector<1xf32>
    %417 = vector.multi_reduction <add>, %416, %cst_147 [1, 2] : vector<1x2x1xf32> to vector<1xf32>
    %418 = vector.shape_cast %417 : vector<1xf32> to vector<1x1x1xf32>
    %419 = vector.extract %418[0, 0, 0] : f32 from vector<1x1x1xf32>
    %420 = arith.mulf %349, %364 : vector<2x32xf32>
    %cst_148 = arith.constant dense<0.000000e+00> : vector<2xf32>
    %421 = vector.multi_reduction <add>, %420, %cst_148 [1] : vector<2x32xf32> to vector<2xf32>
    %422 = vector.shape_cast %421 : vector<2xf32> to vector<2x1xf32>
    %cst_149 = arith.constant 0.000000e+00 : f32
    %423 = vector.broadcast %cst_149 : f32 to vector<2x1xf32>
    %424 = arith.maximumf %422, %423 : vector<2x1xf32>
    %cst_150 = arith.constant 0.000000e+00 : f32
    %425 = vector.broadcast %cst_150 : f32 to vector<2x1xf32>
    %426 = arith.mulf %422, %425 : vector<2x1xf32>
    %427 = arith.subf %424, %426 : vector<2x1xf32>
    %428 = math.absf %422 : vector<2x1xf32>
    %cst_151 = arith.constant 0.000000e+00 : f32
    %429 = vector.broadcast %cst_151 : f32 to vector<2x1xf32>
    %430 = arith.subf %429, %428 : vector<2x1xf32>
    %431 = math.exp %430 : vector<2x1xf32>
    %432 = math.log1p %431 : vector<2x1xf32>
    %433 = arith.addf %427, %432 : vector<2x1xf32>
    %434 = vector.shape_cast %433 : vector<2x1xf32> to vector<1x2x1xf32>
    %cst_152 = arith.constant dense<0.000000e+00> : vector<1xf32>
    %435 = vector.multi_reduction <add>, %434, %cst_152 [1, 2] : vector<1x2x1xf32> to vector<1xf32>
    %436 = vector.shape_cast %435 : vector<1xf32> to vector<1x1x1xf32>
    %437 = vector.extract %436[0, 0, 0] : f32 from vector<1x1x1xf32>
    %438 = arith.addf %419, %437 : f32
    %439 = arith.addf %401, %438 : f32
    %440 = arith.mulf %349, %360 : vector<2x32xf32>
    %cst_153 = arith.constant dense<0.000000e+00> : vector<2xf32>
    %441 = vector.multi_reduction <add>, %440, %cst_153 [1] : vector<2x32xf32> to vector<2xf32>
    %442 = vector.shape_cast %441 : vector<2xf32> to vector<2x1xf32>
    %cst_154 = arith.constant 0.000000e+00 : f32
    %443 = vector.broadcast %cst_154 : f32 to vector<2x1xf32>
    %444 = arith.maximumf %442, %443 : vector<2x1xf32>
    %cst_155 = arith.constant 1.000000e+00 : f32
    %445 = vector.broadcast %cst_155 : f32 to vector<2x1xf32>
    %446 = arith.mulf %442, %445 : vector<2x1xf32>
    %447 = arith.subf %444, %446 : vector<2x1xf32>
    %448 = math.absf %442 : vector<2x1xf32>
    %cst_156 = arith.constant 0.000000e+00 : f32
    %449 = vector.broadcast %cst_156 : f32 to vector<2x1xf32>
    %450 = arith.subf %449, %448 : vector<2x1xf32>
    %451 = math.exp %450 : vector<2x1xf32>
    %452 = math.log1p %451 : vector<2x1xf32>
    %453 = arith.addf %447, %452 : vector<2x1xf32>
    %454 = vector.shape_cast %453 : vector<2x1xf32> to vector<1x2x1xf32>
    %cst_157 = arith.constant dense<0.000000e+00> : vector<1xf32>
    %455 = vector.multi_reduction <add>, %454, %cst_157 [1, 2] : vector<1x2x1xf32> to vector<1xf32>
    %456 = vector.shape_cast %455 : vector<1xf32> to vector<1x1x1xf32>
    %457 = vector.extract %456[0, 0, 0] : f32 from vector<1x1x1xf32>
    %458 = arith.mulf %349, %364 : vector<2x32xf32>
    %cst_158 = arith.constant dense<0.000000e+00> : vector<2xf32>
    %459 = vector.multi_reduction <add>, %458, %cst_158 [1] : vector<2x32xf32> to vector<2xf32>
    %460 = vector.shape_cast %459 : vector<2xf32> to vector<2x1xf32>
    %cst_159 = arith.constant 0.000000e+00 : f32
    %461 = vector.broadcast %cst_159 : f32 to vector<2x1xf32>
    %462 = arith.maximumf %460, %461 : vector<2x1xf32>
    %cst_160 = arith.constant 0.000000e+00 : f32
    %463 = vector.broadcast %cst_160 : f32 to vector<2x1xf32>
    %464 = arith.mulf %460, %463 : vector<2x1xf32>
    %465 = arith.subf %462, %464 : vector<2x1xf32>
    %466 = math.absf %460 : vector<2x1xf32>
    %cst_161 = arith.constant 0.000000e+00 : f32
    %467 = vector.broadcast %cst_161 : f32 to vector<2x1xf32>
    %468 = arith.subf %467, %466 : vector<2x1xf32>
    %469 = math.exp %468 : vector<2x1xf32>
    %470 = math.log1p %469 : vector<2x1xf32>
    %471 = arith.addf %465, %470 : vector<2x1xf32>
    %472 = vector.shape_cast %471 : vector<2x1xf32> to vector<1x2x1xf32>
    %cst_162 = arith.constant dense<0.000000e+00> : vector<1xf32>
    %473 = vector.multi_reduction <add>, %472, %cst_162 [1, 2] : vector<1x2x1xf32> to vector<1xf32>
    %474 = vector.shape_cast %473 : vector<1xf32> to vector<1x1x1xf32>
    %475 = vector.extract %474[0, 0, 0] : f32 from vector<1x1x1xf32>
    %476 = arith.addf %457, %475 : f32
    %477 = tpu.iota {dimensions = array<i32: 0>} : vector<2x2xi32>
    %478 = tpu.iota {dimensions = array<i32: 1>} : vector<2x2xi32>
    %479 = arith.cmpi sgt, %478, %477 : vector<2x2xi32>
    %480 = arith.extui %479 : vector<2x2xi1> to vector<2x2xi32>
    %481 = arith.sitofp %480 : vector<2x2xi32> to vector<2x2xf32>
    %482 = arith.mulf %349, %349 : vector<2x32xf32>
    %cst_163 = arith.constant dense<0.000000e+00> : vector<2xf32>
    %483 = vector.multi_reduction <add>, %482, %cst_163 [1] : vector<2x32xf32> to vector<2xf32>
    %484 = vector.shape_cast %483 : vector<2xf32> to vector<2x1xf32>
    %485 = tpu.transpose %349, [1, 0] : vector<2x32xf32> -> vector<32x2xf32>
    %cst_164 = arith.constant dense<0.000000e+00> : vector<2x2xf32>
    %486 = tpu.matmul %349, %485, %cst_164 {dimension_numbers = #tpu.dot_dimension_numbers<[1], [0], [0], [1], [0, 0, 1, 1], [], []>} : vector<2x32xf32>, vector<32x2xf32>, vector<2x2xf32> -> vector<2x2xf32>
    %487 = tpu.transpose %484, [1, 0] : vector<2x1xf32> -> vector<1x2xf32>
    %488 = vector.broadcast %484 : vector<2x1xf32> to vector<2x2xf32>
    %489 = vector.broadcast %487 : vector<1x2xf32> to vector<2x2xf32>
    %490 = arith.addf %488, %489 : vector<2x2xf32>
    %cst_165 = arith.constant 2.000000e+00 : f32
    %491 = vector.broadcast %cst_165 : f32 to vector<2x2xf32>
    %492 = arith.mulf %491, %486 : vector<2x2xf32>
    %493 = arith.subf %490, %492 : vector<2x2xf32>
    %cst_166 = arith.constant 0.000000e+00 : f32
    %494 = vector.broadcast %cst_166 : f32 to vector<2x2xf32>
    %495 = arith.maximumf %493, %494 : vector<2x2xf32>
    %cst_167 = arith.constant -2.000000e+00 : f32
    %496 = vector.broadcast %cst_167 : f32 to vector<2x2xf32>
    %497 = arith.mulf %496, %495 : vector<2x2xf32>
    %498 = math.exp %497 : vector<2x2xf32>
    %499 = arith.mulf %498, %481 : vector<2x2xf32>
    %500 = vector.shape_cast %499 : vector<2x2xf32> to vector<1x2x2xf32>
    %cst_168 = arith.constant dense<0.000000e+00> : vector<1xf32>
    %501 = vector.multi_reduction <add>, %500, %cst_168 [1, 2] : vector<1x2x2xf32> to vector<1xf32>
    %502 = vector.shape_cast %501 : vector<1xf32> to vector<1x1x1xf32>
    %503 = vector.extract %502[0, 0, 0] : f32 from vector<1x1x1xf32>
    %504 = arith.mulf %360, %360 : vector<2x32xf32>
    %cst_169 = arith.constant dense<0.000000e+00> : vector<2xf32>
    %505 = vector.multi_reduction <add>, %504, %cst_169 [1] : vector<2x32xf32> to vector<2xf32>
    %506 = vector.shape_cast %505 : vector<2xf32> to vector<2x1xf32>
    %507 = tpu.transpose %360, [1, 0] : vector<2x32xf32> -> vector<32x2xf32>
    %cst_170 = arith.constant dense<0.000000e+00> : vector<2x2xf32>
    %508 = tpu.matmul %360, %507, %cst_170 {dimension_numbers = #tpu.dot_dimension_numbers<[1], [0], [0], [1], [0, 0, 1, 1], [], []>} : vector<2x32xf32>, vector<32x2xf32>, vector<2x2xf32> -> vector<2x2xf32>
    %509 = tpu.transpose %506, [1, 0] : vector<2x1xf32> -> vector<1x2xf32>
    %510 = vector.broadcast %506 : vector<2x1xf32> to vector<2x2xf32>
    %511 = vector.broadcast %509 : vector<1x2xf32> to vector<2x2xf32>
    %512 = arith.addf %510, %511 : vector<2x2xf32>
    %cst_171 = arith.constant 2.000000e+00 : f32
    %513 = vector.broadcast %cst_171 : f32 to vector<2x2xf32>
    %514 = arith.mulf %513, %508 : vector<2x2xf32>
    %515 = arith.subf %512, %514 : vector<2x2xf32>
    %cst_172 = arith.constant 0.000000e+00 : f32
    %516 = vector.broadcast %cst_172 : f32 to vector<2x2xf32>
    %517 = arith.maximumf %515, %516 : vector<2x2xf32>
    %cst_173 = arith.constant -2.000000e+00 : f32
    %518 = vector.broadcast %cst_173 : f32 to vector<2x2xf32>
    %519 = arith.mulf %518, %517 : vector<2x2xf32>
    %520 = math.exp %519 : vector<2x2xf32>
    %521 = arith.mulf %520, %481 : vector<2x2xf32>
    %522 = vector.shape_cast %521 : vector<2x2xf32> to vector<1x2x2xf32>
    %cst_174 = arith.constant dense<0.000000e+00> : vector<1xf32>
    %523 = vector.multi_reduction <add>, %522, %cst_174 [1, 2] : vector<1x2x2xf32> to vector<1xf32>
    %524 = vector.shape_cast %523 : vector<1xf32> to vector<1x1x1xf32>
    %525 = vector.extract %524[0, 0, 0] : f32 from vector<1x1x1xf32>
    %526 = arith.addf %503, %525 : f32
    %527 = arith.mulf %364, %364 : vector<2x32xf32>
    %cst_175 = arith.constant dense<0.000000e+00> : vector<2xf32>
    %528 = vector.multi_reduction <add>, %527, %cst_175 [1] : vector<2x32xf32> to vector<2xf32>
    %529 = vector.shape_cast %528 : vector<2xf32> to vector<2x1xf32>
    %530 = tpu.transpose %364, [1, 0] : vector<2x32xf32> -> vector<32x2xf32>
    %cst_176 = arith.constant dense<0.000000e+00> : vector<2x2xf32>
    %531 = tpu.matmul %364, %530, %cst_176 {dimension_numbers = #tpu.dot_dimension_numbers<[1], [0], [0], [1], [0, 0, 1, 1], [], []>} : vector<2x32xf32>, vector<32x2xf32>, vector<2x2xf32> -> vector<2x2xf32>
    %532 = tpu.transpose %529, [1, 0] : vector<2x1xf32> -> vector<1x2xf32>
    %533 = vector.broadcast %529 : vector<2x1xf32> to vector<2x2xf32>
    %534 = vector.broadcast %532 : vector<1x2xf32> to vector<2x2xf32>
    %535 = arith.addf %533, %534 : vector<2x2xf32>
    %cst_177 = arith.constant 2.000000e+00 : f32
    %536 = vector.broadcast %cst_177 : f32 to vector<2x2xf32>
    %537 = arith.mulf %536, %531 : vector<2x2xf32>
    %538 = arith.subf %535, %537 : vector<2x2xf32>
    %cst_178 = arith.constant 0.000000e+00 : f32
    %539 = vector.broadcast %cst_178 : f32 to vector<2x2xf32>
    %540 = arith.maximumf %538, %539 : vector<2x2xf32>
    %cst_179 = arith.constant -2.000000e+00 : f32
    %541 = vector.broadcast %cst_179 : f32 to vector<2x2xf32>
    %542 = arith.mulf %541, %540 : vector<2x2xf32>
    %543 = math.exp %542 : vector<2x2xf32>
    %544 = arith.mulf %543, %481 : vector<2x2xf32>
    %545 = vector.shape_cast %544 : vector<2x2xf32> to vector<1x2x2xf32>
    %cst_180 = arith.constant dense<0.000000e+00> : vector<1xf32>
    %546 = vector.multi_reduction <add>, %545, %cst_180 [1, 2] : vector<1x2x2xf32> to vector<1xf32>
    %547 = vector.shape_cast %546 : vector<1xf32> to vector<1x1x1xf32>
    %548 = vector.extract %547[0, 0, 0] : f32 from vector<1x1x1xf32>
    %549 = arith.addf %526, %548 : f32
    %550 = arith.mulf %362, %362 : vector<2x32xf32>
    %cst_181 = arith.constant dense<0.000000e+00> : vector<2xf32>
    %551 = vector.multi_reduction <add>, %550, %cst_181 [1] : vector<2x32xf32> to vector<2xf32>
    %552 = vector.shape_cast %551 : vector<2xf32> to vector<2x1xf32>
    %553 = tpu.transpose %362, [1, 0] : vector<2x32xf32> -> vector<32x2xf32>
    %cst_182 = arith.constant dense<0.000000e+00> : vector<2x2xf32>
    %554 = tpu.matmul %362, %553, %cst_182 {dimension_numbers = #tpu.dot_dimension_numbers<[1], [0], [0], [1], [0, 0, 1, 1], [], []>} : vector<2x32xf32>, vector<32x2xf32>, vector<2x2xf32> -> vector<2x2xf32>
    %555 = tpu.transpose %552, [1, 0] : vector<2x1xf32> -> vector<1x2xf32>
    %556 = vector.broadcast %552 : vector<2x1xf32> to vector<2x2xf32>
    %557 = vector.broadcast %555 : vector<1x2xf32> to vector<2x2xf32>
    %558 = arith.addf %556, %557 : vector<2x2xf32>
    %cst_183 = arith.constant 2.000000e+00 : f32
    %559 = vector.broadcast %cst_183 : f32 to vector<2x2xf32>
    %560 = arith.mulf %559, %554 : vector<2x2xf32>
    %561 = arith.subf %558, %560 : vector<2x2xf32>
    %cst_184 = arith.constant 0.000000e+00 : f32
    %562 = vector.broadcast %cst_184 : f32 to vector<2x2xf32>
    %563 = arith.maximumf %561, %562 : vector<2x2xf32>
    %cst_185 = arith.constant -2.000000e+00 : f32
    %564 = vector.broadcast %cst_185 : f32 to vector<2x2xf32>
    %565 = arith.mulf %564, %563 : vector<2x2xf32>
    %566 = math.exp %565 : vector<2x2xf32>
    %567 = arith.mulf %566, %481 : vector<2x2xf32>
    %568 = vector.shape_cast %567 : vector<2x2xf32> to vector<1x2x2xf32>
    %cst_186 = arith.constant dense<0.000000e+00> : vector<1xf32>
    %569 = vector.multi_reduction <add>, %568, %cst_186 [1, 2] : vector<1x2x2xf32> to vector<1xf32>
    %570 = vector.shape_cast %569 : vector<1xf32> to vector<1x1x1xf32>
    %571 = vector.extract %570[0, 0, 0] : f32 from vector<1x1x1xf32>
    %572 = arith.addf %549, %571 : f32
    %573 = arith.mulf %349, %349 : vector<2x32xf32>
    %cst_187 = arith.constant dense<0.000000e+00> : vector<2xf32>
    %574 = vector.multi_reduction <add>, %573, %cst_187 [1] : vector<2x32xf32> to vector<2xf32>
    %575 = vector.shape_cast %574 : vector<2xf32> to vector<2x1xf32>
    %576 = arith.mulf %364, %364 : vector<2x32xf32>
    %cst_188 = arith.constant dense<0.000000e+00> : vector<2xf32>
    %577 = vector.multi_reduction <add>, %576, %cst_188 [1] : vector<2x32xf32> to vector<2xf32>
    %578 = vector.shape_cast %577 : vector<2xf32> to vector<2x1xf32>
    %579 = tpu.transpose %364, [1, 0] : vector<2x32xf32> -> vector<32x2xf32>
    %cst_189 = arith.constant dense<0.000000e+00> : vector<2x2xf32>
    %580 = tpu.matmul %349, %579, %cst_189 {dimension_numbers = #tpu.dot_dimension_numbers<[1], [0], [0], [1], [0, 0, 1, 1], [], []>} : vector<2x32xf32>, vector<32x2xf32>, vector<2x2xf32> -> vector<2x2xf32>
    %581 = tpu.transpose %578, [1, 0] : vector<2x1xf32> -> vector<1x2xf32>
    %582 = vector.broadcast %575 : vector<2x1xf32> to vector<2x2xf32>
    %583 = vector.broadcast %581 : vector<1x2xf32> to vector<2x2xf32>
    %584 = arith.addf %582, %583 : vector<2x2xf32>
    %cst_190 = arith.constant 2.000000e+00 : f32
    %585 = vector.broadcast %cst_190 : f32 to vector<2x2xf32>
    %586 = arith.mulf %585, %580 : vector<2x2xf32>
    %587 = arith.subf %584, %586 : vector<2x2xf32>
    %cst_191 = arith.constant 0.000000e+00 : f32
    %588 = vector.broadcast %cst_191 : f32 to vector<2x2xf32>
    %589 = arith.maximumf %587, %588 : vector<2x2xf32>
    %cst_192 = arith.constant -2.000000e+00 : f32
    %590 = vector.broadcast %cst_192 : f32 to vector<2x2xf32>
    %591 = arith.mulf %590, %589 : vector<2x2xf32>
    %592 = math.exp %591 : vector<2x2xf32>
    %593 = vector.shape_cast %592 : vector<2x2xf32> to vector<1x2x2xf32>
    %cst_193 = arith.constant dense<0.000000e+00> : vector<1xf32>
    %594 = vector.multi_reduction <add>, %593, %cst_193 [1, 2] : vector<1x2x2xf32> to vector<1xf32>
    %595 = vector.shape_cast %594 : vector<1xf32> to vector<1x1x1xf32>
    %596 = vector.extract %595[0, 0, 0] : f32 from vector<1x1x1xf32>
    %597 = arith.addf %572, %596 : f32
    %cst_194 = arith.constant 5.000000e-02 : f32
    %598 = arith.mulf %cst_194, %597 : f32
    %599 = arith.addf %439, %598 : f32
    %cst_195 = arith.constant 1.000000e+00 : f32
    %600 = vector.broadcast %cst_195 : f32 to vector<1x1xf32>
    %601 = vector.broadcast %599 : f32 to vector<1x1xf32>
    %602 = arith.mulf %600, %601 : vector<1x1xf32>
    %c0_196 = arith.constant 0 : index
    %c0_197 = arith.constant 0 : index
    %603 = vector.load %arg9[%c0_196, %c0_197] : memref<1x1xf32, #tpu.memory_space<vmem>>, vector<1x1xf32>
    tpu.vector_store %arg9[%c0_196, %c0_197], %602 {strides = array<i32>} : memref<1x1xf32, #tpu.memory_space<vmem>>, vector<1x1xf32>,
    %604 = vector.broadcast %476 : f32 to vector<1x1xf32>
    %605 = arith.mulf %600, %604 : vector<1x1xf32>
    %c0_198 = arith.constant 0 : index
    %c0_199 = arith.constant 0 : index
    %606 = vector.load %arg10[%c0_198, %c0_199] : memref<1x1xf32, #tpu.memory_space<vmem>>, vector<1x1xf32>
    tpu.vector_store %arg10[%c0_198, %c0_199], %605 {strides = array<i32>} : memref<1x1xf32, #tpu.memory_space<vmem>>, vector<1x1xf32>,
    %607 = vector.broadcast %598 : f32 to vector<1x1xf32>
    %608 = arith.mulf %600, %607 : vector<1x1xf32>
    %c0_200 = arith.constant 0 : index
    %c0_201 = arith.constant 0 : index
    %609 = vector.load %arg11[%c0_200, %c0_201] : memref<1x1xf32, #tpu.memory_space<vmem>>, vector<1x1xf32>
    tpu.vector_store %arg11[%c0_200, %c0_201], %608 {strides = array<i32>} : memref<1x1xf32, #tpu.memory_space<vmem>>, vector<1x1xf32>,
    return
  }
  func.func @transform_0(%arg0: i32) -> (i32, i32, i32) {
    %c0_i32 = arith.constant 0 : i32
    %c0_i32_0 = arith.constant 0 : i32
    %c0_i32_1 = arith.constant 0 : i32
    %c0_i32_2 = arith.constant 0 : i32
    return %c0_i32, %c0_i32_0, %c0_i32_1 : i32, i32, i32
  }
  func.func @transform_1(%arg0: i32) -> (i32, i32) {
    %c0_i32 = arith.constant 0 : i32
    %c0_i32_0 = arith.constant 0 : i32
    %c0_i32_1 = arith.constant 0 : i32
    return %c0_i32, %c0_i32_0 : i32, i32
  }
  func.func @transform_2(%arg0: i32) -> (i32, i32) {
    %c0_i32 = arith.constant 0 : i32
    %c0_i32_0 = arith.constant 0 : i32
    %c0_i32_1 = arith.constant 0 : i32
    return %c0_i32, %c0_i32_0 : i32, i32
  }
  func.func @transform_3(%arg0: i32) -> (i32, i32, i32) {
    %c0_i32 = arith.constant 0 : i32
    %c0_i32_0 = arith.constant 0 : i32
    %c0_i32_1 = arith.constant 0 : i32
    %c0_i32_2 = arith.constant 0 : i32
    return %c0_i32, %c0_i32_0, %c0_i32_1 : i32, i32, i32
  }
  func.func @transform_4(%arg0: i32) -> (i32, i32, i32) {
    %c0_i32 = arith.constant 0 : i32
    %c0_i32_0 = arith.constant 0 : i32
    %c0_i32_1 = arith.constant 0 : i32
    %c0_i32_2 = arith.constant 0 : i32
    return %c0_i32, %c0_i32_0, %c0_i32_1 : i32, i32, i32
  }
  func.func @transform_5(%arg0: i32) -> (i32, i32, i32) {
    %c0_i32 = arith.constant 0 : i32
    %c0_i32_0 = arith.constant 0 : i32
    %c0_i32_1 = arith.constant 0 : i32
    %c0_i32_2 = arith.constant 0 : i32
    return %c0_i32, %c0_i32_0, %c0_i32_1 : i32, i32, i32
  }
  func.func @transform_6(%arg0: i32) -> (i32, i32, i32) {
    %c0_i32 = arith.constant 0 : i32
    %c0_i32_0 = arith.constant 0 : i32
    %c0_i32_1 = arith.constant 0 : i32
    %c0_i32_2 = arith.constant 0 : i32
    return %c0_i32, %c0_i32_0, %c0_i32_1 : i32, i32, i32
  }
  func.func @transform_7(%arg0: i32) -> (i32, i32) {
    %c0_i32 = arith.constant 0 : i32
    %c0_i32_0 = arith.constant 0 : i32
    %c0_i32_1 = arith.constant 0 : i32
    return %c0_i32, %c0_i32_0 : i32, i32
  }
  func.func @transform_8(%arg0: i32) -> (i32, i32) {
    %c0_i32 = arith.constant 0 : i32
    %c0_i32_0 = arith.constant 0 : i32
    %c0_i32_1 = arith.constant 0 : i32
    return %c0_i32, %c0_i32_0 : i32, i32
  }
  func.func @transform_9(%arg0: i32) -> (i32, i32) {
    %c0_i32 = arith.constant 0 : i32
    %c0_i32_0 = arith.constant 0 : i32
    %c0_i32_1 = arith.constant 0 : i32
    return %c0_i32, %c0_i32_0 : i32, i32
  }
  func.func @transform_10(%arg0: i32) -> (i32, i32) {
    %c0_i32 = arith.constant 0 : i32
    %c0_i32_0 = arith.constant 0 : i32
    %c0_i32_1 = arith.constant 0 : i32
    return %c0_i32, %c0_i32_0 : i32, i32
  }
}

</mosaic_0001>

<bundles_post_ra>
// kernel: l2rec_forward.1
= control target key start
LH: loop header
LB: loop body
LE: loop exit
PB: predicated region body
PF: predicated region fallthrough
CT: control target
= control target key end

     0   :  { %16 = vsyncpa [#allocation3], 0  ;;  %s5901_s0 = inlined_call_operand.vmem [shape: f32[2,8,32], index: 0, kind: input, shape index: {}]   ;;  %s5902_s1 = inlined_call_operand.vmem [shape: f32[8,32], index: 1, kind: input, shape index: {}]   ;;  %s5903_s2 = inlined_call_operand.vmem [shape: f32[16,1], index: 2, kind: input, shape index: {}]   ;;  %s5904_s3 = inlined_call_operand.vmem [shape: f32[3,2,32], index: 3, kind: input, shape index: {}]   ;;  %s5905_s4 = inlined_call_operand.hbm [shape: f32[12,32,16], index: 4, kind: input, shape index: {}]   ;;  %s5906_s5 = inlined_call_operand.vmem [shape: f32[4,16,32], index: 5, kind: input, shape index: {}]   ;;  %s5907_s6 = inlined_call_operand.vmem [shape: f32[4,32,32], index: 6, kind: input, shape index: {}]   ;;  %s5908_s7 = inlined_call_operand.vmem [shape: f32[20,32], index: 7, kind: input, shape index: {}]   ;;  %s5909_s8 = inlined_call_operand.hbm [shape: f32[1,1], index: 8, kind: output, shape index: {0}]   ;;  %s5910_s9 = inlined_call_operand.hbm [shape: f32[1,1], index: 9, kind: output, shape index: {1}]   ;;  %s5911_s10 = inlined_call_operand.hbm [shape: f32[1,1], index: 10, kind: output, shape index: {2}]  }
   0x1   :  { %17 = vsyncpa [#allocation4], 0 }
   0x2   :  { %18 = vsyncpa [#allocation7], 0  ;;  %s5228_s13 = smov [#allocation2]   ;;  %s5134_s17 = scalar_lea.hbm %s5905_s4, 6144 }
   0x3   :  { %s32_s14 = sshll.u32 %s5228_s13, 4  ;;  %p5135_p0 = scmp.ne.s32.totalorder %s5905_s4, %s5134_s17  ;;  %s33_s14 = int_to_ptr.vmem [resolvable:$true] %s32_s14 }
   0x4   :  { %p5138_p1 = scmp.lt.u32.totalorder %s5134_s17, %s5905_s4 }
   0x6   :  { %p5140_p2 = pnand %p5138_p1, %p5135_p0 }
   0x8   :  { %5143 = shalt.err (!%p5140_p2)
}
   0x9   :  { %s5144_s22 = scalar_lea.vmem %s33_s14, 6144  ;;  %p5149_p4 = scmp.lt.s32.totalorder %s33_s14, %s33_s14 }
   0xa   :  { %p5145_p3 = scmp.ne.s32.totalorder %s33_s14, %s5144_s22  ;;  %p5150_p5 = scmp.lt.s32.totalorder %s5144_s22, %s5144_s22 }
   0xc   :  { %p5151_p6 = por %p5150_p5, %p5149_p4 }
   0xe   :  { %p5152_p7 = pnand %p5151_p6, %p5145_p3 }
  0x10   :  { %5155 = shalt.err (!%p5152_p7)
}
  0x11   :  { %s5229_s23 = smov 128   ;;  %s5230_s24 = smov 8  }
  0x12   :  { %38 = dma.hbm_to_vmem [thread:$0]  %s5905_s4, 6144, %s33_s14, [#allocation3], %s5229_s23, %s5229_s23, %s5230_s24  }
  0x13   :  { %5222 = dma.done.wait [#allocation3], 6144  }
  0x14   :  { %5223 = vsyncadd [#allocation3], 4294961152  ;;  %vm50_vm0 = vcmask 261120   ;;  %v58_v0 = vld [vmem:[%s5901_s0 + $0x8] sm:$0xff]  ;;  %v48_v1 = vld [vmem:[%s5902_s1] sm:$0xff]  ;;  %v5231_v9 = vmov 0   ;;  %v122_v61 = vlaneseq }
  0x15   :  { %v57_v2 = vld [vmem:[%s5901_s0] sm:$0xff]  ;;  %v60_v3 = vmul.f32 %v58_v0, %v58_v0  ;;  %v49_v4 = vmul.f32 %v48_v1, %v48_v1  ;;  %5027 = vset.pattern.permute.xlu0 %v5231_v9  ;;  %5026 = vset.pattern.permute.xlu1 %v5231_v9  ;;  %v90_v29 = vld [vmem:[%s5903_s2 + $0x8] sm:$0xff]  ;;  %v108_v36 = vld [vmem:[#allocation2 + $0x10] sm:$0xff]  ;;  %v5232_v60 = vmov 0.0   ;;  %vm5233_vm1 = vmmov 0   ;;  %s5234_s15 = smov 112  }
  0x16   :  { %v59_v5 = vmul.f32 %v57_v2, %v57_v2  ;;  %v89_v28 = vld [vmem:[%s5903_s2] sm:$0xff]  ;;  %v107_v31 = vld [vmem:[#allocation2 + $0x8] sm:$0xff]  ;;  %v109_v37 = vld [vmem:[#allocation2 + $0x18] sm:$0xff]  ;;  %v5354_v62 = vshrl.u32 %v122_v61, 7  ;;  %vm365_vm2 = vcmask 130048   ;;  %vm520_vm3 = vcmask 64512  }
  0x17   :  { %v64_v6 = vsel %vm50_vm0, %v60_v3, 0.0  ;;  %v51_v7 = vsel %vm50_vm0, %v49_v4, 0.0  ;;  %v106_v30 = vld [vmem:[#allocation2] sm:$0xff]  ;;  %v112_v34 = vld [vmem:[#allocation2 + $0x48] sm:$0xff]  ;;  %v4854_v38 = vpack.c.bf16 %v109_v37, %v108_v36  ;;  %v113_v39 = vld [vmem:[#allocation2 + $0x50] sm:$0xff]  ;;  %vm3301_vm4 = vcmask 253952  }
  0x18   :  { %65 = vadd.xlane.f32.xlu1 %v64_v6  ;;  %52 = vadd.xlane.f32.xlu0 %v51_v7  ;;  %v61_v8 = vsel %vm50_vm0, %v59_v5, 0.0  ;;  %v111_v32 = vld [vmem:[#allocation2 + $0x40] sm:$0xff]  ;;  %v4850_v33 = vpack.c.bf16 %v107_v31, %v106_v30  ;;  %v114_v40 = vld [vmem:[#allocation2 + $0x58] sm:$0xff]  ;;  %v117_v43 = vld [vmem:[#allocation2 + $0x88] sm:$0xff]  ;;  %v5357_v63 = vsub.s32 1, %v5354_v62  ;;  %v5372_v9 = vsub.s32 2, %v5354_v62 }
  0x19   :  { %v4858_v35 = vpack.c.bf16 %v112_v34, %v111_v32  ;;  %v4862_v41 = vpack.c.bf16 %v114_v40, %v113_v39  ;;  %v116_v42 = vld [vmem:[#allocation2 + $0x80] sm:$0xff]  ;;  %v118_v55 = vld [vmem:[#allocation2 + $0x90] sm:$0xff]  ;;  %v119_v56 = vld [vmem:[#allocation2 + $0x98] sm:$0xff]  ;;  %vm3297_vm5 = vcmask 261127   ;;  %vm3322_vm6 = vcmask 254976   ;;  %s5235_s26 = smov [#allocation6]  }
  0x1a   :  { %4851 = vmatprep.subr.bf16.mxu0 %v4850_v33  ;;  %v4866_v44 = vpack.c.bf16 %v117_v43, %v116_v42  ;;  %v4870_v59 = vpack.c.bf16 %v119_v56, %v118_v55  ;;  %v695_v36 = vld [vmem:[#allocation2 + $0x60] sm:$0xff]  ;;  %v696_v37 = vld [vmem:[#allocation2 + $0x68] sm:$0xff]  ;;  %vm3593_vm7 = vcmask 1041409   ;;  %vm3393_vm8 = vcmask 1040384   ;;  %s4268_s27 = sshll.u32 %s5235_s26, 4  ;;  %s4269_s27 = int_to_ptr.vmem [resolvable:$true] %s4268_s27 }
  0x1b   :  { %4853 = vmatpush3.bf16.msra.mxu0 %v4850_v33  ;;  %4859 = vmatprep.subr.bf16.mxu1 %v4858_v35  ;;  %v690_v39 = vld [vmem:[#allocation2 + $0x20] sm:$0xff]  ;;  %v691_v40 = vld [vmem:[#allocation2 + $0x28] sm:$0xff]  ;;  %vm3398_vm10 = vcmask 1024   ;;  %s5156_s11 = scalar_lea.vmem %s4269_s27, 16  ;;  %s5160_s12 = scalar_lea.vmem %s4269_s27, 32 }
  0x1c   :  { %62 = vadd.xlane.f32.xlu0 %v61_v8  ;;  %4861 = vmatpush3.bf16.msra.mxu1 %v4858_v35  ;;  %v700_v56 = vld [vmem:[#allocation2 + $0xa0] sm:$0xff]  ;;  %p5157_p8 = scmp.ne.s32.totalorder %s4269_s27, %s5156_s11  ;;  %p5161_p9 = scmp.lt.s32.totalorder %s4269_s27, %s4269_s27 }
  0x1d   :  { %4855 = vmatprep.subr.bf16.mxu0 %v4854_v38  ;;  %4863 = vmatprep.subr.bf16.mxu1 %v4862_v41  ;;  %p5162_p10 = scmp.lt.s32.totalorder %s5160_s12, %s5156_s11 }
  0x1f   :  { %4857 = vmatpush3.bf16.msra.mxu0 %v4854_v38  ;;  %v4882_v38 = vpack.c.bf16 %v696_v37, %v695_v36  ;;  %p5163_p11 = por %p5162_p10, %p5161_p9 }
  0x20   :  { %4865 = vmatpush3.bf16.msra.mxu1 %v4862_v41  ;;  %4867 = vmatprep.subr.bf16.mxu0 %v4866_v44  ;;  %v4874_v41 = vpack.c.bf16 %v691_v40, %v690_v39 }
  0x21   :  { %4574 = vmatprep.subr.mxu1 %v5232_v60  ;;  %p5164_p12 = pnand %p5163_p11, %p5157_p8 }
  0xa5   :  { %v66_v10 = vpop.xlane.xlu1 %65  ;;  %v53_v11 = vpop.xlane.xlu0 %52 }
  0xa6   :  { %v68_v12 = vmax.f32 %v66_v10, 1e-24  ;;  %v54_v13 = vmax.f32 %v53_v11, 1e-24 }
  0xa8   :  { %5028 = vrsqrt.f32 %v68_v12 }
  0xa9   :  { %5030 = vrsqrt.f32 %v54_v13  ;;  %v63_v14 = vpop.xlane.xlu0 %62 }
  0xaa   :  { %v67_v15 = vmax.f32 %v63_v14, 1e-24 }
  0xac   :  { %5032 = vrsqrt.f32 %v67_v15 }
  0xb2   :  { %v5029_v16 = vpop.eup %5028 }
  0xb3   :  { %v5031_v17 = vpop.eup %5030  ;;  %v72_v18 = vmul.f32 %v5029_v16, %v58_v0  ;;  %v5362_v0 = vld [vmem:[%s5908_s7] sm:$0xff] }
  0xb4   :  { %v56_v19 = vmul.f32 %v5031_v17, %v48_v1  ;;  %v5365_v1 = vsub.s32 0, %v5354_v62  ;;  %v5378_v12 = vrot.slane %v5362_v0, %v5372_v9 }
  0xb6   :  { %v5033_v20 = vpop.eup %5032  ;;  %v74_v21 = vadd.f32 %v72_v18, %v56_v19  ;;  %v125_v5 = vrot.slane %v5362_v0, %v5365_v1 }
  0xb7   :  { %v71_v22 = vmul.f32 %v5033_v20, %v57_v2  ;;  %v210_v2 = vrot.slane %v5362_v0, %v5357_v63 }
  0xb8   :  { %v76_v23 = vmul.f32 %v74_v21, %v74_v21 }
  0xb9   :  { %v73_v24 = vadd.f32 %v71_v22, %v56_v19 }
  0xba   :  { %v80_v25 = vsel %vm50_vm0, %v76_v23, 0.0 }
  0xbb   :  { %81 = vadd.xlane.f32.xlu0 %v80_v25  ;;  %v75_v26 = vmul.f32 %v73_v24, %v73_v24 }
  0xbd   :  { %v77_v27 = vsel %vm50_vm0, %v75_v26, 0.0 }
  0xbe   :  { %78 = vadd.xlane.f32.xlu1 %v77_v27 }
  0xcf   :  { %93 = vperm.xlu1 %5026, %v89_v28  }
  0xd1   :  { %98 = vperm.xlu0 %5027, %v90_v29  }
 0x148   :  { %v82_v45 = vpop.xlane.xlu0 %81 }
 0x149   :  { %v84_v46 = vmax.f32 %v82_v45, 1e-24  ;;  %v698_v45 = vld [vmem:[#allocation2 + $0x78] sm:$0xff] }
 0x14b   :  { %5034 = vrsqrt.f32 %v84_v46  ;;  %v79_v47 = vpop.xlane.xlu1 %78 }
 0x14c   :  { %v83_v48 = vmax.f32 %v79_v47, 1e-24 }
 0x14e   :  { %5036 = vrsqrt.f32 %v83_v48 }
 0x14f   :  { %v5325_v52 = vpop.permute.xlu1 %93 }
 0x150   :  { %v5327_v53 = vpop.permute.xlu0 %98 }
 0x155   :  { %v5035_v49 = vpop.eup %5034 }
 0x156   :  { %v88_v51 = vmul.f32 %v5035_v49, %v74_v21  ;;  %v692_v49 = vld [vmem:[#allocation2 + $0x30] sm:$0xff] }
 0x158   :  { %v5037_v50 = vpop.eup %5036  ;;  %v5333_v58 = vmul.f32 %v5327_v53, %v88_v51 }
 0x159   :  { %v87_v54 = vmul.f32 %v5037_v50, %v73_v24  ;;  %v693_v50 = vld [vmem:[#allocation2 + $0x38] sm:$0xff] }
 0x15a   :  { %v4878_v55 = vpack.c.bf16 %v693_v50, %v692_v49 }
 0x15b   :  { %v5330_v57 = vmul.f32 %v5325_v52, %v87_v54 }
 0x15d   :  { %4549 = vmatprep.mubr.msk.f32.mxu0 %vm50_vm0, %v5330_v57  ;;  %4560 = vmatprep.mubr.msk.f32.mxu1 %vm50_vm0, %v5330_v57 }
 0x15e   :  { %4550 = vmatmul.mubr.msk.f32.vlgmr.msra.gmra.mrb[0].mxu0 %vm50_vm0, %v5333_v58  ;;  %4561 = vmatmul.mubr.msk.f32.vlgmr.msra.gmra.mrb[0].mxu1 %vm50_vm0, %v5333_v58 }
 0x15f   :  { %4869 = vmatpush3.bf16.msra.mxu0 %v4866_v44  ;;  %4571 = vmatprep.mubr.msk.f32.mxu0 %vm50_vm0, %v5330_v57  ;;  %v697_v44 = vld [vmem:[#allocation2 + $0x70] sm:$0xff] }
 0x160   :  { %4871 = vmatprep.subr.bf16.mxu0 %v4870_v59  ;;  %4576 = vmatprep.mubr.msk.f32.mxu1 %vm5233_vm1, %v5232_v60  ;;  %v4886_v48 = vpack.c.bf16 %v698_v45, %v697_v44 }
 0x163   :  { %4873 = vmatpush3.bf16.msra.mxu0 %v4870_v59  ;;  %v701_v59 = vld [vmem:[#allocation2 + $0xa8] sm:$0xff] }
 0x164   :  { %4584 = vmatprep.subr.mxu0 %v5232_v60 }
 0x166   :  { %4572 = vmatmul.mubr.msk.f32.vlgmr.msra.gmra.mrb[2].mxu0 %vm50_vm0, %v5333_v58 }
 0x167   :  { %4586 = vmatprep.mubr.msk.f32.mxu0 %vm5233_vm1, %v5232_v60 }
 0x231   :  { %v4551_v3 = vpop.f32.mrb[0].mxu0  ;;  %v4562_v4 = vpop.f32.mrb[0].mxu1 }
 0x232   :  { %v198_v6 = vpop.f32.mrb[1].mxu0  ;;  %v277_v7 = vpop.f32.mrb[1].mxu1  ;;  %v283_v11 = vadd.f32 %v4562_v4, %v210_v2  ;;  %v204_v14 = vadd.f32 %v4551_v3, %v125_v5  ;;  %v702_v3 = vld [vmem:[#allocation2 + $0xb0] sm:$0xff]  ;;  %v703_v4 = vld [vmem:[#allocation2 + $0xb8] sm:$0xff] }
 0x233   :  { %v278_v8 = vadd.f32 %v277_v7, %v210_v2  ;;  %v199_v10 = vadd.f32 %v198_v6, %v125_v5 }
 0x235   :  { %4575 = vmatpush3.xpose.msk.msra.mxu1 %vm365_vm2, %v278_v8 }
 0x236   :  { %4579 = vmatprep.subr.mxu1 %v5232_v60 }
 0x238   :  { %4577 = vmatmul.mubr.msk.f32.vlgmr.msra.gmra.mrb[2].mxu1 %vm365_vm2, %v199_v10 }
 0x239   :  { %v4573_v13 = vpop.f32.mrb[2].mxu0  ;;  %4580 = vmatpush3.xpose.msk.msra.mxu1 %vm365_vm2, %v283_v11  ;;  %4581 = vmatprep.mubr.msk.f32.mxu1 %vm5233_vm1, %v5232_v60 }
 0x23a   :  { %v356_v15 = vpop.f32.mrb[3].mxu0  ;;  %4589 = vmatprep.subr.mxu1 %v5232_v60  ;;  %v362_v16 = vadd.f32 %v4573_v13, %v5378_v12 }
 0x23b   :  { %v357_v17 = vadd.f32 %v356_v15, %v5378_v12 }
 0x23c   :  { %4582 = vmatmul.mubr.msk.f32.vlgmr.msra.gmra.mrb[4].mxu1 %vm365_vm2, %v204_v14 }
 0x23d   :  { %4585 = vmatpush3.msra.mxu0 %v357_v17  ;;  %4590 = vmatpush3.msra.mxu1 %v362_v16 }
 0x23e   :  { %4591 = vmatprep.mubr.msk.f32.mxu1 %vm5233_vm1, %v5232_v60  ;;  %4883 = vmatprep.subr.bf16.mxu1 %v4882_v38 }
 0x23f   :  { %4875 = vmatprep.subr.bf16.mxu0 %v4874_v41 }
 0x30b   :  { %v438_v18 = vpop.f32.mrb[2].mxu1 }
 0x30c   :  { %v518_v19 = vmul.f32 0.25, %v438_v18  ;;  %v4578_v20 = vpop.f32.mrb[3].mxu1 }
 0x30e   :  { %v521_v21 = vsel %vm520_vm3, %v518_v19, -inf }
 0x30f   :  { %522 = vmax.xlane.f32.xlu0 %v521_v21  ;;  %v514_v22 = vpop.f32.mrb[4].mxu1 }
 0x310   :  { %v519_v23 = vmul.f32 0.25, %v514_v22  ;;  %v4583_v24 = vpop.f32.mrb[5].mxu1 }
 0x312   :  { %v524_v25 = vsel %vm520_vm3, %v519_v23, -inf }
 0x313   :  { %525 = vmax.xlane.f32.xlu1 %v524_v25 }
 0x39c   :  { %v523_v26 = vpop.xlane.xlu0 %522 }
 0x39d   :  { %v527_v27 = vsub.f32 %v518_v19, %v523_v26 }
 0x39f   :  { %v529_v30 = vmul.f32 1.442695, %v527_v27 }
 0x3a0   :  { %v526_v28 = vpop.xlane.xlu1 %525 }
 0x3a1   :  { %v528_v29 = vsub.f32 %v519_v23, %v526_v28 }
 0x3a3   :  { %v531_v31 = vmul.f32 1.442695, %v528_v29 }
 0x3a5   :  { %5038 = vpow2.f32 %v531_v31 }
 0x3a6   :  { %5040 = vpow2.f32 %v529_v30 }
 0x3af   :  { %v5039_v32 = vpop.eup %5038 }
 0x3b0   :  { %v536_v33 = vsel %vm520_vm3, %v5039_v32, 0.0  ;;  %v5041_v34 = vpop.eup %5040 }
 0x3b1   :  { %537 = vadd.xlane.f32.xlu1 %v536_v33  ;;  %v533_v35 = vsel %vm520_vm3, %v5041_v34, 0.0 }
 0x3b5   :  { %534 = vadd.xlane.f32.xlu1 %v533_v35 }
 0x3c6   :  { %787 = vrot.lane.b32.xlu1 %v210_v2, %s5234_s15  ;;  %v4890_v2 = vpack.c.bf16 %v701_v59, %v700_v56  ;;  %v121_v56 = vld [vmem:[%s5906_s5 + $0x8] sm:$0xff] }
 0x3ca   :  { %708 = vrot.lane.b32.xlu1 %v125_v5, %s5234_s15  ;;  %v4894_v5 = vpack.c.bf16 %v703_v4, %v702_v3 }
 0x43e   :  { %v538_v42 = vpop.xlane.xlu1 %537 }
 0x43f   :  { %5042 = vrcp.f32 %v538_v42 }
 0x442   :  { %v535_v43 = vpop.xlane.xlu1 %534 }
 0x443   :  { %5044 = vrcp.f32 %v535_v43 }
 0x446   :  { %v788_v11 = vpop.permute.xlu1 %787 }
 0x449   :  { %v5043_v46 = vpop.eup %5042 }
 0x44a   :  { %v542_v47 = vmul.f32 %v5043_v46, %v5039_v32  ;;  %v709_v16 = vpop.permute.xlu1 %708 }
 0x44c   :  { %4592 = vmatmul.mubr.msk.f32.vlgmr.msra.gmra.mrb[6].mxu1 %vm520_vm3, %v542_v47 }
 0x44d   :  { %v5045_v51 = vpop.eup %5044  ;;  %4885 = vmatpush3.bf16.msra.mxu1 %v4882_v38  ;;  %4613 = vmatprep.mubr.msk.f32.mxu1 %vm50_vm0, %v5330_v57 }
 0x44e   :  { %v541_v54 = vmul.f32 %v5045_v51, %v5041_v34  ;;  %4887 = vmatprep.subr.bf16.mxu1 %v4886_v48  ;;  %v4307_v51 = vld [vmem:[%s5906_s5 + $0x18] sm:$0xff] }
 0x450   :  { %4587 = vmatmul.mubr.msk.f32.vlgmr.msra.gmra.mrb[4].mxu0 %vm520_vm3, %v541_v54 }
 0x451   :  { %4877 = vmatpush3.bf16.msra.mxu0 %v4874_v41  ;;  %4889 = vmatpush3.bf16.msra.mxu1 %v4886_v48 }
 0x452   :  { %4602 = vmatprep.mubr.msk.f32.mxu0 %vm50_vm0, %v5330_v57  ;;  %4879 = vmatprep.subr.bf16.mxu0 %v4878_v55 }
 0x453   :  { %4627 = vmatprep.subr.mxu1 %v5232_v60 }
 0x454   :  { %4614 = vmatmul.mubr.msk.f32.vlgmr.msra.gmra.mrb[8].mxu1 %vm50_vm0, %v5333_v58 }
 0x455   :  { %4881 = vmatpush3.bf16.msra.mxu0 %v4878_v55  ;;  %4629 = vmatprep.mubr.msk.f32.mxu1 %vm5233_vm1, %v5232_v60  ;;  %v120_v55 = vld [vmem:[%s5906_s5] sm:$0xff] }
 0x456   :  { %4891 = vmatprep.subr.bf16.mxu0 %v4890_v2  ;;  %v4902_v59 = vpack.c.bf16 %v121_v56, %v120_v55  ;;  %v4329_v55 = vld [vmem:[%s5907_s6 + $0x38] sm:$0xff] }
 0x458   :  { %4603 = vmatmul.mubr.msk.f32.vlgmr.msra.gmra.mrb[6].mxu0 %vm50_vm0, %v5333_v58 }
 0x459   :  { %4893 = vmatpush3.bf16.msra.mxu0 %v4890_v2  ;;  %4624 = vmatprep.mubr.msk.f32.mxu0 %vm50_vm0, %v5330_v57 }
 0x45a   :  { %4895 = vmatprep.subr.bf16.mxu0 %v4894_v5 }
 0x45d   :  { %4897 = vmatpush3.bf16.msra.mxu0 %v4894_v5 }
 0x45e   :  { %4637 = vmatprep.subr.mxu0 %v5232_v60 }
 0x460   :  { %4625 = vmatmul.mubr.msk.f32.vlgmr.msra.gmra.mrb[8].mxu0 %vm50_vm0, %v5333_v58 }
 0x461   :  { %4639 = vmatprep.mubr.msk.f32.mxu0 %vm5233_vm1, %v5232_v60 }
 0x51f   :  { %v5416_v6 = vpop.f32.mrb[6].mxu1 }
 0x520   :  { %v4593_v7 = vpop.f32.mrb[7].mxu1 }
 0x521   :  { %v5457_v7 = vsub.s32 3, %v5354_v62 }
 0x523   :  { %v5418_v8 = vpop.f32.mrb[4].mxu0 }
 0x524   :  { %v4588_v10 = vpop.f32.mrb[5].mxu0 }
 0x525   :  { %v1431_v10 = vrot.slane %v5362_v0, %v5457_v7 }
 0x527   :  { %v4615_v13 = vpop.f32.mrb[8].mxu1 }
 0x528   :  { %v856_v14 = vpop.f32.mrb[9].mxu1  ;;  %v862_v20 = vadd.f32 %v4615_v13, %v788_v11 }
 0x529   :  { %v857_v15 = vadd.f32 %v856_v14, %v788_v11 }
 0x52b   :  { %v4604_v17 = vpop.f32.mrb[6].mxu0  ;;  %4628 = vmatpush3.xpose.msk.msra.mxu1 %vm365_vm2, %v857_v15 }
 0x52c   :  { %v777_v18 = vpop.f32.mrb[7].mxu0  ;;  %4632 = vmatprep.subr.mxu1 %v5232_v60  ;;  %v783_v21 = vadd.f32 %v4604_v17, %v709_v16 }
 0x52d   :  { %v778_v19 = vadd.f32 %v777_v18, %v709_v16 }
 0x52f   :  { %4630 = vmatmul.mubr.msk.f32.vlgmr.msra.gmra.mrb[10].mxu1 %vm365_vm2, %v778_v19 }
 0x530   :  { %4633 = vmatpush3.xpose.msk.msra.mxu1 %vm365_vm2, %v862_v20  ;;  %4634 = vmatprep.mubr.msk.f32.mxu1 %vm5233_vm1, %v5232_v60 }
 0x531   :  { %4642 = vmatprep.subr.mxu1 %v5232_v60 }
 0x533   :  { %v4626_v22 = vpop.f32.mrb[8].mxu0  ;;  %4635 = vmatmul.mubr.msk.f32.vlgmr.msra.gmra.mrb[12].mxu1 %vm365_vm2, %v783_v21 }
 0x534   :  { %v935_v23 = vpop.f32.mrb[9].mxu0  ;;  %4644 = vmatprep.mubr.msk.f32.mxu1 %vm5233_vm1, %v5232_v60 }
 0x602   :  { %v1016_v24 = vpop.f32.mrb[10].mxu1 }
 0x603   :  { %v1096_v25 = vmul.f32 0.25, %v1016_v24  ;;  %v4631_v26 = vpop.f32.mrb[11].mxu1 }
 0x605   :  { %v1098_v27 = vsel %vm520_vm3, %v1096_v25, -inf }
 0x606   :  { %1099 = vmax.xlane.f32.xlu0 %v1098_v27  ;;  %v1092_v28 = vpop.f32.mrb[12].mxu1  ;;  %v1476_v27 = vld [vmem:[%s5907_s6 + $0x8] sm:$0xff] }
 0x607   :  { %v1097_v29 = vmul.f32 0.25, %v1092_v28  ;;  %v4636_v30 = vpop.f32.mrb[13].mxu1 }
 0x608   :  { %v1478_v30 = vld [vmem:[%s5907_s6 + $0x18] sm:$0xff] }
 0x609   :  { %v1101_v31 = vsel %vm520_vm3, %v1097_v29, -inf }
 0x60a   :  { %1102 = vmax.xlane.f32.xlu1 %v1101_v31 }
 0x693   :  { %v1100_v32 = vpop.xlane.xlu0 %1099 }
 0x694   :  { %v1104_v33 = vsub.f32 %v1096_v25, %v1100_v32  ;;  %v4326_v32 = vld [vmem:[%s5907_s6 + $0x20] sm:$0xff] }
 0x696   :  { %v1106_v34 = vmul.f32 1.442695, %v1104_v33  ;;  %v4327_v33 = vld [vmem:[%s5907_s6 + $0x28] sm:$0xff] }
 0x697   :  { %v1103_v35 = vpop.xlane.xlu1 %1102 }
 0x698   :  { %5046 = vpow2.f32 %v1106_v34  ;;  %v1105_v36 = vsub.f32 %v1097_v29, %v1103_v35  ;;  %v1477_v29 = vld [vmem:[%s5907_s6 + $0x10] sm:$0xff]  ;;  %v4914_v34 = vpack.c.bf16 %v4327_v33, %v4326_v32  ;;  %v1704_v32 = vld [vmem:[#allocation2 + $0x100] sm:$0xff]  ;;  %v1705_v33 = vld [vmem:[#allocation2 + $0x108] sm:$0xff] }
 0x699   :  { %v4910_v31 = vpack.c.bf16 %v1478_v30, %v1477_v29  ;;  %v1699_v29 = vld [vmem:[#allocation2 + $0xc0] sm:$0xff]  ;;  %v1700_v30 = vld [vmem:[#allocation2 + $0xc8] sm:$0xff] }
 0x69a   :  { %v1108_v37 = vmul.f32 1.442695, %v1105_v36 }
 0x69c   :  { %5048 = vpow2.f32 %v1108_v37 }
 0x6a2   :  { %v5047_v38 = vpop.eup %5046 }
 0x6a3   :  { %v1110_v39 = vsel %vm520_vm3, %v5047_v38, 0.0 }
 0x6a4   :  { %1111 = vadd.xlane.f32.xlu0 %v1110_v39 }
 0x6a6   :  { %v5049_v40 = vpop.eup %5048 }
 0x6a7   :  { %v1113_v41 = vsel %vm520_vm3, %v5049_v40, 0.0 }
 0x6a8   :  { %1114 = vadd.xlane.f32.xlu0 %v1113_v41  ;;  %v1465_v41 = vsub.s32 4, %v5354_v62 }
 0x6be   :  { %866 = vrot.lane.b32.xlu0 %v5378_v12, %s5234_s15  ;;  %v4306_v12 = vld [vmem:[%s5906_s5 + $0x10] sm:$0xff] }
 0x6bf   :  { %v4898_v54 = vpack.c.bf16 %v4307_v51, %v4306_v12 }
 0x731   :  { %v1112_v42 = vpop.xlane.xlu0 %1111 }
 0x732   :  { %5050 = vrcp.f32 %v1112_v42  ;;  %v1471_v42 = vsub.s32 5, %v5354_v62 }
 0x735   :  { %v1115_v43 = vpop.xlane.xlu0 %1114 }
 0x736   :  { %5052 = vrcp.f32 %v1115_v43  ;;  %v1466_v43 = vrot.slane %v5362_v0, %v1465_v41 }
 0x739   :  { %v867_v44 = vpop.permute.xlu0 %866 }
 0x73a   :  { %v936_v45 = vadd.f32 %v935_v23, %v867_v44  ;;  %v941_v46 = vadd.f32 %v4626_v22, %v867_v44 }
 0x73c   :  { %v5051_v47 = vpop.eup %5050  ;;  %4638 = vmatpush3.msra.mxu0 %v936_v45  ;;  %4643 = vmatpush3.msra.mxu1 %v941_v46  ;;  %v1472_v46 = vrot.slane %v5362_v0, %v1471_v42 }
 0x73d   :  { %v1118_v48 = vmul.f32 %v5051_v47, %v5047_v38  ;;  %4899 = vmatprep.subr.bf16.mxu0 %v4898_v54 }
 0x73f   :  { %4640 = vmatmul.mubr.msk.f32.vlgmr.msra.gmra.mrb[10].mxu0 %vm520_vm3, %v1118_v48 }
 0x740   :  { %v5053_v49 = vpop.eup %5052  ;;  %4901 = vmatpush3.bf16.msra.mxu0 %v4898_v54  ;;  %v4328_v54 = vld [vmem:[%s5907_s6 + $0x30] sm:$0xff] }
 0x741   :  { %v1119_v50 = vmul.f32 %v5053_v49, %v5049_v40  ;;  %4903 = vmatprep.subr.bf16.mxu0 %v4902_v59  ;;  %v4918_v56 = vpack.c.bf16 %v4329_v55, %v4328_v54 }
 0x743   :  { %4645 = vmatmul.mubr.msk.f32.vlgmr.msra.gmra.mrb[14].mxu1 %vm520_vm3, %v1119_v50 }
 0x812   :  { %v1189_v2 = vpop.f32.mrb[10].mxu0 }
 0x813   :  { %v4641_v3 = vpop.f32.mrb[11].mxu0  ;;  %4651 = vmatprep.mubr.msk.f32.mxu0 %vm365_vm2, %v1189_v2 }
 0x816   :  { %v1262_v4 = vpop.f32.mrb[14].mxu1 }
 0x817   :  { %v4646_v5 = vpop.f32.mrb[15].mxu1  ;;  %4652 = vmatmul.mubr.msk.f32.vlgmr.msra.gmra.mrb[12].mxu0 %vm365_vm2, %v1262_v4 }
 0x818   :  { %4905 = vmatpush3.bf16.msra.mxu0 %v4902_v59  ;;  %4658 = vmatprep.mubr.msk.f32.mxu0 %vm365_vm2, %v5418_v8  ;;  %v1481_v59 = vsub.s32 6, %v5354_v62 }
 0x819   :  { %4915 = vmatprep.subr.bf16.mxu0 %v4914_v34 }
 0x81a   :  { %v1482_v2 = vrot.slane %v5362_v0, %v1481_v59 }
 0x81f   :  { %4659 = vmatmul.mubr.msk.f32.vlgmr.msra.gmra.mrb[12].mxu0 %vm365_vm2, %v5416_v6 }
 0x820   :  { %4917 = vmatpush3.bf16.msra.mxu0 %v4914_v34  ;;  %v4930_v34 = vpack.c.bf16 %v1705_v33, %v1704_v32 }
 0x821   :  { %4919 = vmatprep.subr.bf16.mxu0 %v4918_v56 }
 0x824   :  { %4921 = vmatpush3.bf16.msra.mxu0 %v4918_v56 }
 0x825   :  { %4931 = vmatprep.subr.bf16.mxu0 %v4930_v34 }
 0x8f2   :  { %v4660_v11 = vpop.f32.mrb[12].mxu0 }
 0x8f3   :  { %v1433_v13 = vadd.f32 %v4660_v11, %v1431_v10  ;;  %v1419_v14 = vpop.f32.mrb[13].mxu0 }
 0x8f4   :  { %v1432_v15 = vadd.f32 %v1431_v10, %v1419_v14  ;;  %v1573_v14 = vsub.s32 7, %v5354_v62 }
 0x8f5   :  { %v1435_v16 = vadd.f32 %v1433_v13, %v5333_v58 }
 0x8f6   :  { %v1434_v17 = vadd.f32 %v1432_v15, %v5330_v57  ;;  %v1475_v57 = vld [vmem:[%s5907_s6] sm:$0xff]  ;;  %v1574_v15 = vrot.slane %v5362_v0, %v1573_v14 }
 0x8f7   :  { %v1439_v18 = vsel %vm50_vm0, %v1435_v16, 0.0  ;;  %v4906_v28 = vpack.c.bf16 %v1476_v27, %v1475_v57 }
 0x8f8   :  { %1440 = vadd.xlane.f32.xlu1 %v1439_v18  ;;  %v1436_v8 = vsel %vm50_vm0, %v1434_v17, 0.0 }
 0x8f9   :  { %1437 = vadd.xlane.f32.xlu0 %v1436_v8  ;;  %4907 = vmatprep.subr.bf16.mxu1 %v4906_v28 }
 0x8fa   :  { %4909 = vmatpush3.bf16.msra.mxu1 %v4906_v28 }
 0x8fb   :  { %4911 = vmatprep.subr.bf16.mxu1 %v4910_v31 }
 0x8fe   :  { %4913 = vmatpush3.bf16.msra.mxu1 %v4910_v31  ;;  %v4922_v31 = vpack.c.bf16 %v1700_v30, %v1699_v29 }
 0x900   :  { %4923 = vmatprep.subr.bf16.mxu1 %v4922_v31 }
 0x985   :  { %v1441_v6 = vpop.xlane.xlu1 %1440 }
 0x986   :  { %v1444_v19 = vmul.f32 0.03125, %v1441_v6  ;;  %v1438_v20 = vpop.xlane.xlu0 %1437 }
 0x987   :  { %v1443_v21 = vmul.f32 0.03125, %v1438_v20 }
 0x988   :  { %v1446_v22 = vsub.f32 %v1435_v16, %v1444_v19 }
 0x989   :  { %v1445_v23 = vsub.f32 %v1434_v17, %v1443_v21 }
 0x98a   :  { %v1448_v26 = vmul.f32 %v1446_v22, %v1446_v22 }
 0x98b   :  { %v1447_v24 = vmul.f32 %v1445_v23, %v1445_v23 }
 0x98c   :  { %v1452_v58 = vsel %vm50_vm0, %v1448_v26, 0.0 }
 0x98d   :  { %v1449_v25 = vsel %vm50_vm0, %v1447_v24, 0.0 }
 0x98e   :  { %1450 = vadd.xlane.f32.xlu1 %v1449_v25 }
 0x992   :  { %1453 = vadd.xlane.f32.xlu1 %v1452_v58 }
 0xa1b   :  { %v1451_v35 = vpop.xlane.xlu1 %1450 }
 0xa1c   :  { %v1455_v36 = vmul.f32 0.03125, %v1451_v35  ;;  %v1701_v35 = vld [vmem:[#allocation2 + $0xd0] sm:$0xff] }
 0xa1e   :  { %v1457_v37 = vadd.f32 1e-05, %v1455_v36  ;;  %v1702_v36 = vld [vmem:[#allocation2 + $0xd8] sm:$0xff] }
 0xa1f   :  { %v1454_v38 = vpop.xlane.xlu1 %1453 }
 0xa20   :  { %5054 = vrsqrt.f32 %v1457_v37  ;;  %v1456_v39 = vmul.f32 0.03125, %v1454_v38  ;;  %v4926_v37 = vpack.c.bf16 %v1702_v36, %v1701_v35  ;;  %v1706_v38 = vld [vmem:[#allocation2 + $0x110] sm:$0xff] }
 0xa22   :  { %v1458_v40 = vadd.f32 1e-05, %v1456_v39  ;;  %v1707_v39 = vld [vmem:[#allocation2 + $0x118] sm:$0xff] }
 0xa24   :  { %5056 = vrsqrt.f32 %v1458_v40  ;;  %v4934_v40 = vpack.c.bf16 %v1707_v39, %v1706_v38 }
 0xa2a   :  { %v5055_v44 = vpop.eup %5054 }
 0xa2b   :  { %v1461_v45 = vmul.f32 %v5055_v44, %v1445_v23  ;;  %v1710_v44 = vld [vmem:[#allocation2 + $0x148] sm:$0xff] }
 0xa2d   :  { %v1467_v47 = vmul.f32 %v1466_v43, %v1461_v45 }
 0xa2e   :  { %v5057_v48 = vpop.eup %5056 }
 0xa2f   :  { %v1462_v49 = vmul.f32 %v5057_v48, %v1446_v22  ;;  %v1473_v50 = vadd.f32 %v1472_v46, %v1467_v47 }
 0xa31   :  { %v1468_v12 = vmul.f32 %v1466_v43, %v1462_v49  ;;  %4669 = vmatprep.mubr.msk.f32.mxu1 %vm50_vm0, %v1473_v50  ;;  %v1709_v43 = vld [vmem:[#allocation2 + $0x140] sm:$0xff] }
 0xa32   :  { %v4938_v45 = vpack.c.bf16 %v1710_v44, %v1709_v43 }
 0xa33   :  { %v1474_v51 = vadd.f32 %v1472_v46, %v1468_v12 }
 0xa35   :  { %4670 = vmatmul.mubr.msk.f32.vlgmr.msra.gmra.mrb[16].mxu1 %vm50_vm0, %v1474_v51 }
 0xa36   :  { %4925 = vmatpush3.bf16.msra.mxu1 %v4922_v31 }
 0xa37   :  { %4927 = vmatprep.subr.bf16.mxu1 %v4926_v37 }
 0xa3a   :  { %4929 = vmatpush3.bf16.msra.mxu1 %v4926_v37 }
 0xa3b   :  { %4939 = vmatprep.subr.bf16.mxu1 %v4938_v45 }
 0xb08   :  { %v4671_v3 = vpop.f32.mrb[16].mxu1 }
 0xb09   :  { %v1561_v4 = vadd.f32 %v4671_v3, %v1482_v2  ;;  %v1555_v5 = vpop.f32.mrb[17].mxu1 }
 0xb0a   :  { %v1556_v10 = vadd.f32 %v1555_v5, %v1482_v2 }
 0xb0b   :  { %v1565_v13 = vmax.f32 %v1561_v4, 0.0 }
 0xb0c   :  { %v1564_v11 = vmax.f32 %v1556_v10, 0.0 }
 0xb0e   :  { %4680 = vmatprep.mubr.msk.f32.mxu0 %vm50_vm0, %v1564_v11 }
 0xb0f   :  { %4681 = vmatmul.mubr.msk.f32.vlgmr.msra.gmra.mrb[14].mxu0 %vm50_vm0, %v1565_v13 }
 0xb10   :  { %4933 = vmatpush3.bf16.msra.mxu0 %v4930_v34 }
 0xb11   :  { %4935 = vmatprep.subr.bf16.mxu0 %v4934_v40 }
 0xb14   :  { %4937 = vmatpush3.bf16.msra.mxu0 %v4934_v40 }
 0xb15   :  { %4716 = vmatprep.subr.mxu0 %v5232_v60 }
 0xbe2   :  { %v4682_v16 = vpop.f32.mrb[14].mxu0 }
 0xbe3   :  { %v1647_v17 = vpop.f32.mrb[15].mxu0  ;;  %v1653_v18 = vadd.f32 %v4682_v16, %v1574_v15  ;;  %v1712_v16 = vld [vmem:[#allocation2 + $0x158] sm:$0xff] }
 0xbe4   :  { %v1648_v8 = vadd.f32 %v1647_v17, %v1574_v15  ;;  %v1711_v15 = vld [vmem:[#allocation2 + $0x150] sm:$0xff] }
 0xbe5   :  { %v1657_v20 = vadd.f32 %v1653_v18, %v1474_v51  ;;  %v5519_v51 = vld [vmem:[%s5908_s7 + $0x8] sm:$0xff] }
 0xbe6   :  { %v1656_v6 = vadd.f32 %v1648_v8, %v1473_v50  ;;  %v1687_v54 = vrot.slane %v5519_v51, %v5365_v1  ;;  %v1693_v56 = vrot.slane %v5519_v51, %v5357_v63  ;;  %v4942_v8 = vpack.c.bf16 %v1712_v16, %v1711_v15  ;;  %v2285_v15 = vld [vmem:[#allocation2 + $0xf8] sm:$0xff] }
 0xbe7   :  { %v1661_v21 = vsel %vm50_vm0, %v1657_v20, 0.0 }
 0xbe8   :  { %v1658_v19 = vsel %vm50_vm0, %v1656_v6, 0.0 }
 0xbe9   :  { %1659 = vadd.xlane.f32.xlu1 %v1658_v19  ;;  %v1719_v19 = vrot.slane %v5519_v51, %v5372_v9 }
 0xbed   :  { %1662 = vadd.xlane.f32.xlu1 %v1661_v21 }
 0xc76   :  { %v1660_v22 = vpop.xlane.xlu1 %1659 }
 0xc77   :  { %v1664_v23 = vmul.f32 0.03125, %v1660_v22 }
 0xc79   :  { %v1666_v24 = vsub.f32 %v1656_v6, %v1664_v23  ;;  %v1804_v6 = vrot.slane %v5519_v51, %v5457_v7 }
 0xc7a   :  { %v1663_v25 = vpop.xlane.xlu1 %1662 }
 0xc7b   :  { %v1665_v26 = vmul.f32 0.03125, %v1663_v25  ;;  %v1668_v58 = vmul.f32 %v1666_v24, %v1666_v24 }
 0xc7d   :  { %v1667_v57 = vsub.f32 %v1657_v20, %v1665_v26  ;;  %v1670_v0 = vsel %vm50_vm0, %v1668_v58, 0.0 }
 0xc7e   :  { %1671 = vadd.xlane.f32.xlu1 %v1670_v0 }
 0xc7f   :  { %v1669_v27 = vmul.f32 %v1667_v57, %v1667_v57 }
 0xc81   :  { %v1673_v28 = vsel %vm50_vm0, %v1669_v27, 0.0 }
 0xc82   :  { %1674 = vadd.xlane.f32.xlu1 %v1673_v28 }
 0xd0b   :  { %v1672_v46 = vpop.xlane.xlu1 %1671 }
 0xd0c   :  { %v1676_v47 = vmul.f32 0.03125, %v1672_v46 }
 0xd0e   :  { %v1678_v48 = vadd.f32 1e-05, %v1676_v47 }
 0xd0f   :  { %v1675_v49 = vpop.xlane.xlu1 %1674 }
 0xd10   :  { %5058 = vrsqrt.f32 %v1678_v48  ;;  %v1677_v50 = vmul.f32 0.03125, %v1675_v49  ;;  %v2287_v49 = vld [vmem:[#allocation2 + $0x120] sm:$0xff] }
 0xd12   :  { %v1679_v12 = vadd.f32 1e-05, %v1677_v50  ;;  %v2288_v50 = vld [vmem:[#allocation2 + $0x128] sm:$0xff] }
 0xd14   :  { %5060 = vrsqrt.f32 %v1679_v12  ;;  %v4954_v12 = vpack.c.bf16 %v2288_v50, %v2287_v49 }
 0xd1a   :  { %v5059_v55 = vpop.eup %5058 }
 0xd1b   :  { %v1682_v2 = vmul.f32 %v5059_v55, %v1666_v24  ;;  %v2283_v55 = vld [vmem:[#allocation2 + $0xe8] sm:$0xff] }
 0xd1d   :  { %v1688_v3 = vmul.f32 %v1687_v54, %v1682_v2 }
 0xd1e   :  { %v5061_v4 = vpop.eup %5060 }
 0xd1f   :  { %v1694_v5 = vadd.f32 %v1693_v56, %v1688_v3  ;;  %v1683_v10 = vmul.f32 %v5061_v4, %v1667_v57  ;;  %v5558_v57 = vrot.slane %v5519_v51, %v1465_v41  ;;  %v2289_v4 = vld [vmem:[#allocation2 + $0x130] sm:$0xff] }
 0xd21   :  { %v5526_v11 = vmul.f32 %v1694_v5, %v5325_v52  ;;  %v1689_v13 = vmul.f32 %v1687_v54, %v1683_v10  ;;  %v2282_v54 = vld [vmem:[#allocation2 + $0xe0] sm:$0xff]  ;;  %v2290_v5 = vld [vmem:[#allocation2 + $0x138] sm:$0xff] }
 0xd23   :  { %v1695_v17 = vadd.f32 %v1693_v56, %v1689_v13  ;;  %4691 = vmatprep.mubr.msk.f32.mxu1 %vm50_vm0, %v5526_v11  ;;  %4702 = vmatprep.mubr.msk.f32.mxu0 %vm50_vm0, %v5526_v11  ;;  %v4946_v56 = vpack.c.bf16 %v2283_v55, %v2282_v54  ;;  %v2284_v13 = vld [vmem:[#allocation2 + $0xf0] sm:$0xff] }
 0xd25   :  { %v5533_v18 = vmul.f32 %v1695_v17, %v5327_v53 }
 0xd27   :  { %4692 = vmatmul.mubr.msk.f32.vlgmr.msra.gmra.mrb[18].mxu1 %vm50_vm0, %v5533_v18  ;;  %4703 = vmatmul.mubr.msk.f32.vlgmr.msra.gmra.mrb[16].mxu0 %vm50_vm0, %v5533_v18 }
 0xd28   :  { %4941 = vmatpush3.bf16.msra.mxu1 %v4938_v45  ;;  %4713 = vmatprep.mubr.msk.f32.mxu1 %vm50_vm0, %v5526_v11 }
 0xd29   :  { %4943 = vmatprep.subr.bf16.mxu1 %v4942_v8  ;;  %4718 = vmatprep.mubr.msk.f32.mxu0 %vm5233_vm1, %v5232_v60 }
 0xd2c   :  { %4945 = vmatpush3.bf16.msra.mxu1 %v4942_v8 }
 0xd2d   :  { %4721 = vmatprep.subr.mxu1 %v5232_v60 }
 0xd2f   :  { %4714 = vmatmul.mubr.msk.f32.vlgmr.msra.gmra.mrb[20].mxu1 %vm50_vm0, %v5533_v18 }
 0xd30   :  { %4723 = vmatprep.mubr.msk.f32.mxu1 %vm5233_vm1, %v5232_v60 }
 0xdfa   :  { %v4693_v20 = vpop.f32.mrb[18].mxu1  ;;  %v4704_v21 = vpop.f32.mrb[16].mxu0 }
 0xdfb   :  { %v1877_v22 = vadd.f32 %v4704_v21, %v1804_v6  ;;  %v1792_v23 = vpop.f32.mrb[19].mxu1  ;;  %v1871_v24 = vpop.f32.mrb[17].mxu0  ;;  %v1798_v26 = vadd.f32 %v4693_v20, %v1719_v19  ;;  %v2292_v20 = vld [vmem:[#allocation2 + $0x160] sm:$0xff]  ;;  %v2293_v21 = vld [vmem:[#allocation2 + $0x168] sm:$0xff] }
 0xdfc   :  { %v1872_v25 = vadd.f32 %v1871_v24, %v1804_v6  ;;  %v1793_v58 = vadd.f32 %v1792_v23, %v1719_v19  ;;  %v2294_v23 = vld [vmem:[#allocation2 + $0x170] sm:$0xff]  ;;  %v2295_v24 = vld [vmem:[#allocation2 + $0x178] sm:$0xff] }
 0xdfd   :  { %4722 = vmatpush3.xpose.msk.msra.mxu1 %vm365_vm2, %v1877_v22  ;;  %v4962_v22 = vpack.c.bf16 %v2293_v21, %v2292_v20  ;;  %v4347_v21 = vld [vmem:[%s5906_s5 + $0x38] sm:$0xff] }
 0xdfe   :  { %4717 = vmatpush3.xpose.msk.msra.mxu0 %vm365_vm2, %v1872_v25  ;;  %4731 = vmatprep.subr.mxu1 %v5232_v60  ;;  %v4966_v25 = vpack.c.bf16 %v2295_v24, %v2294_v23  ;;  %v4332_v23 = vld [vmem:[%s5906_s5 + $0x20] sm:$0xff]  ;;  %v4333_v24 = vld [vmem:[%s5906_s5 + $0x28] sm:$0xff] }
 0xdff   :  { %4726 = vmatprep.subr.mxu0 %v5232_v60 }
 0xe00   :  { %4724 = vmatmul.mubr.msk.f32.vlgmr.msra.gmra.mrb[22].mxu1 %vm365_vm2, %v1798_v26 }
 0xe01   :  { %4719 = vmatmul.mubr.msk.f32.vlgmr.msra.gmra.mrb[18].mxu0 %vm365_vm2, %v1793_v58  ;;  %4733 = vmatprep.mubr.msk.f32.mxu1 %vm5233_vm1, %v5232_v60 }
 0xe02   :  { %v4715_v0 = vpop.f32.mrb[20].mxu1  ;;  %4728 = vmatprep.mubr.msk.f32.mxu0 %vm5233_vm1, %v5232_v60 }
 0xe03   :  { %v1956_v27 = vadd.f32 %v4715_v0, %v5558_v57  ;;  %v1950_v28 = vpop.f32.mrb[21].mxu1 }
 0xe04   :  { %v1951_v29 = vadd.f32 %v1950_v28, %v5558_v57 }
 0xe05   :  { %4732 = vmatpush3.msra.mxu1 %v1956_v27 }
 0xe06   :  { %4727 = vmatpush3.msra.mxu0 %v1951_v29  ;;  %4955 = vmatprep.subr.bf16.mxu1 %v4954_v12 }
 0xe07   :  { %4947 = vmatprep.subr.bf16.mxu0 %v4946_v56 }
 0xed3   :  { %v2107_v41 = vpop.f32.mrb[22].mxu1 }
 0xed4   :  { %v2112_v30 = vmul.f32 0.25, %v2107_v41  ;;  %v2031_v31 = vpop.f32.mrb[18].mxu0  ;;  %v4725_v32 = vpop.f32.mrb[23].mxu1 }
 0xed5   :  { %v2111_v33 = vmul.f32 0.25, %v2031_v31  ;;  %v4720_v34 = vpop.f32.mrb[19].mxu0 }
 0xed6   :  { %v2116_v35 = vsel %vm520_vm3, %v2112_v30, -inf }
 0xed7   :  { %2117 = vmax.xlane.f32.xlu0 %v2116_v35  ;;  %v2113_v36 = vsel %vm520_vm3, %v2111_v33, -inf }
 0xed8   :  { %2114 = vmax.xlane.f32.xlu1 %v2113_v36 }
 0xf64   :  { %v2118_v37 = vpop.xlane.xlu0 %2117 }
 0xf65   :  { %v2120_v38 = vsub.f32 %v2112_v30, %v2118_v37  ;;  %v2115_v39 = vpop.xlane.xlu1 %2114 }
 0xf66   :  { %v2119_v40 = vsub.f32 %v2111_v33, %v2115_v39 }
 0xf67   :  { %v2123_v43 = vmul.f32 1.442695, %v2120_v38 }
 0xf68   :  { %v2121_v44 = vmul.f32 1.442695, %v2119_v40 }
 0xf69   :  { %5062 = vpow2.f32 %v2123_v43 }
 0xf6a   :  { %5064 = vpow2.f32 %v2121_v44 }
 0xf73   :  { %v5063_v45 = vpop.eup %5062 }
 0xf74   :  { %v5065_v46 = vpop.eup %5064  ;;  %v2128_v47 = vsel %vm520_vm3, %v5063_v45, 0.0 }
 0xf75   :  { %2129 = vadd.xlane.f32.xlu0 %v2128_v47  ;;  %v2125_v48 = vsel %vm520_vm3, %v5065_v46, 0.0 }
 0xf76   :  { %2126 = vadd.xlane.f32.xlu1 %v2125_v48 }
 0xf87   :  { %2300 = vrot.lane.b32.xlu1 %v1719_v19, %s5234_s15  ;;  %v4950_v19 = vpack.c.bf16 %v2285_v15, %v2284_v13 }
 0xf8b   :  { %2379 = vrot.lane.b32.xlu0 %v1804_v6, %s5234_s15  ;;  %v4958_v6 = vpack.c.bf16 %v2290_v5, %v2289_v4 }
0x1002   :  { %v2130_v2 = vpop.xlane.xlu0 %2129 }
0x1003   :  { %5066 = vrcp.f32 %v2130_v2  ;;  %v2127_v3 = vpop.xlane.xlu1 %2126 }
0x1004   :  { %5068 = vrcp.f32 %v2127_v3 }
0x1006   :  { %v2380_v28 = vpop.permute.xlu0 %2379 }
0x1007   :  { %v2301_v32 = vpop.permute.xlu1 %2300 }
0x100d   :  { %v5067_v10 = vpop.eup %5066 }
0x100e   :  { %v5069_v16 = vpop.eup %5068  ;;  %v2134_v17 = vmul.f32 %v5067_v10, %v5063_v45 }
0x100f   :  { %v2133_v8 = vmul.f32 %v5069_v16, %v5065_v46 }
0x1010   :  { %4734 = vmatmul.mubr.msk.f32.vlgmr.msra.gmra.mrb[24].mxu1 %vm520_vm3, %v2134_v17 }
0x1011   :  { %4957 = vmatpush3.bf16.msra.mxu1 %v4954_v12  ;;  %4729 = vmatmul.mubr.msk.f32.vlgmr.msra.gmra.mrb[20].mxu0 %vm520_vm3, %v2133_v8 }
0x1012   :  { %4949 = vmatpush3.bf16.msra.mxu0 %v4946_v56  ;;  %4755 = vmatprep.mubr.msk.f32.mxu1 %vm50_vm0, %v5526_v11 }
0x1013   :  { %4744 = vmatprep.mubr.msk.f32.mxu0 %vm50_vm0, %v5526_v11  ;;  %4959 = vmatprep.subr.bf16.mxu1 %v4958_v6 }
0x1014   :  { %4951 = vmatprep.subr.bf16.mxu0 %v4950_v19 }
0x1015   :  { %4961 = vmatpush3.bf16.msra.mxu1 %v4958_v6 }
0x1016   :  { %4953 = vmatpush3.bf16.msra.mxu0 %v4950_v19  ;;  %4769 = vmatprep.subr.mxu1 %v5232_v60 }
0x1017   :  { %4963 = vmatprep.subr.bf16.mxu0 %v4962_v22 }
0x1018   :  { %4756 = vmatmul.mubr.msk.f32.vlgmr.msra.gmra.mrb[26].mxu1 %vm50_vm0, %v5533_v18 }
0x1019   :  { %4745 = vmatmul.mubr.msk.f32.vlgmr.msra.gmra.mrb[22].mxu0 %vm50_vm0, %v5533_v18  ;;  %4771 = vmatprep.mubr.msk.f32.mxu1 %vm5233_vm1, %v5232_v60 }
0x101a   :  { %4965 = vmatpush3.bf16.msra.mxu0 %v4962_v22  ;;  %4766 = vmatprep.mubr.msk.f32.mxu0 %vm50_vm0, %v5526_v11 }
0x101b   :  { %4967 = vmatprep.subr.bf16.mxu0 %v4966_v25 }
0x101e   :  { %4969 = vmatpush3.bf16.msra.mxu0 %v4966_v25  ;;  %v4974_v25 = vpack.c.bf16 %v4333_v24, %v4332_v23 }
0x101f   :  { %4779 = vmatprep.subr.mxu0 %v5232_v60 }
0x1021   :  { %4767 = vmatmul.mubr.msk.f32.vlgmr.msra.gmra.mrb[24].mxu0 %vm50_vm0, %v5533_v18 }
0x1022   :  { %4781 = vmatprep.mubr.msk.f32.mxu0 %vm5233_vm1, %v5232_v60 }
0x10e3   :  { %v5595_v26 = vpop.f32.mrb[24].mxu1 }
0x10e4   :  { %v5597_v58 = vpop.f32.mrb[20].mxu0  ;;  %v4735_v0 = vpop.f32.mrb[25].mxu1 }
0x10e5   :  { %v4730_v27 = vpop.f32.mrb[21].mxu0 }
0x10eb   :  { %v4757_v29 = vpop.f32.mrb[26].mxu1 }
0x10ec   :  { %v2448_v41 = vpop.f32.mrb[27].mxu1  ;;  %v4746_v30 = vpop.f32.mrb[22].mxu0  ;;  %v2454_v35 = vadd.f32 %v4757_v29, %v2380_v28 }
0x10ed   :  { %v2449_v31 = vadd.f32 %v2448_v41, %v2380_v28  ;;  %v2369_v33 = vpop.f32.mrb[23].mxu0  ;;  %v2375_v36 = vadd.f32 %v4746_v30, %v2301_v32  ;;  %v3023_v41 = vrot.slane %v5519_v51, %v1471_v42 }
0x10ee   :  { %v2370_v34 = vadd.f32 %v2369_v33, %v2301_v32 }
0x10ef   :  { %4770 = vmatpush3.xpose.msk.msra.mxu1 %vm365_vm2, %v2449_v31 }
0x10f0   :  { %4774 = vmatprep.subr.mxu1 %v5232_v60 }
0x10f2   :  { %4772 = vmatmul.mubr.msk.f32.vlgmr.msra.gmra.mrb[28].mxu1 %vm365_vm2, %v2370_v34 }
0x10f3   :  { %4775 = vmatpush3.xpose.msk.msra.mxu1 %vm365_vm2, %v2454_v35  ;;  %4776 = vmatprep.mubr.msk.f32.mxu1 %vm5233_vm1, %v5232_v60 }
0x10f4   :  { %v4768_v37 = vpop.f32.mrb[24].mxu0  ;;  %4784 = vmatprep.subr.mxu1 %v5232_v60 }
0x10f5   :  { %v2527_v38 = vpop.f32.mrb[25].mxu0 }
0x10f6   :  { %4777 = vmatmul.mubr.msk.f32.vlgmr.msra.gmra.mrb[30].mxu1 %vm365_vm2, %v2375_v36 }
0x10f7   :  { %4786 = vmatprep.mubr.msk.f32.mxu1 %vm5233_vm1, %v5232_v60 }
0x11c5   :  { %v2608_v39 = vpop.f32.mrb[28].mxu1 }
0x11c6   :  { %v2688_v40 = vmul.f32 0.25, %v2608_v39  ;;  %v4773_v43 = vpop.f32.mrb[29].mxu1 }
0x11c8   :  { %v2690_v44 = vsel %vm520_vm3, %v2688_v40, -inf }
0x11c9   :  { %2691 = vmax.xlane.f32.xlu1 %v2690_v44  ;;  %v2684_v45 = vpop.f32.mrb[30].mxu1 }
0x11ca   :  { %v2689_v46 = vmul.f32 0.25, %v2684_v45  ;;  %v4778_v47 = vpop.f32.mrb[31].mxu1 }
0x11cc   :  { %v2693_v48 = vsel %vm520_vm3, %v2689_v46, -inf }
0x11cd   :  { %2694 = vmax.xlane.f32.xlu0 %v2693_v48  ;;  %v4366_v48 = vld [vmem:[%s5907_s6 + $0x50] sm:$0xff] }
0x1256   :  { %v2692_v49 = vpop.xlane.xlu1 %2691 }
0x1257   :  { %v2696_v50 = vsub.f32 %v2688_v40, %v2692_v49  ;;  %v4367_v49 = vld [vmem:[%s5907_s6 + $0x58] sm:$0xff] }
0x1259   :  { %v2698_v12 = vmul.f32 1.442695, %v2696_v50  ;;  %v4982_v50 = vpack.c.bf16 %v4367_v49, %v4366_v48 }
0x125a   :  { %v2695_v54 = vpop.xlane.xlu0 %2694 }
0x125b   :  { %5070 = vpow2.f32 %v2698_v12  ;;  %v2697_v55 = vsub.f32 %v2689_v46, %v2695_v54  ;;  %v4365_v46 = vld [vmem:[%s5907_s6 + $0x48] sm:$0xff]  ;;  %v4370_v12 = vld [vmem:[%s5907_s6 + $0x60] sm:$0xff] }
0x125c   :  { %v4371_v54 = vld [vmem:[%s5907_s6 + $0x68] sm:$0xff] }
0x125d   :  { %v2700_v56 = vmul.f32 1.442695, %v2697_v55  ;;  %v4986_v55 = vpack.c.bf16 %v4371_v54, %v4370_v12 }
0x125f   :  { %5072 = vpow2.f32 %v2700_v56 }
0x1265   :  { %v5071_v2 = vpop.eup %5070 }
0x1266   :  { %v2702_v3 = vsel %vm520_vm3, %v5071_v2, 0.0 }
0x1267   :  { %2703 = vadd.xlane.f32.xlu0 %v2702_v3 }
0x1269   :  { %v5073_v4 = vpop.eup %5072 }
0x126a   :  { %v2705_v5 = vsel %vm520_vm3, %v5073_v4, 0.0 }
0x126b   :  { %2706 = vadd.xlane.f32.xlu1 %v2705_v5 }
0x127d   :  { %2458 = vrot.lane.b32.xlu0 %v5558_v57, %s5234_s15  ;;  %v4346_v57 = vld [vmem:[%s5906_s5 + $0x30] sm:$0xff] }
0x127e   :  { %v4970_v22 = vpack.c.bf16 %v4347_v21, %v4346_v57 }
0x12f4   :  { %v2704_v10 = vpop.xlane.xlu0 %2703 }
0x12f5   :  { %5074 = vrcp.f32 %v2704_v10 }
0x12f8   :  { %v2707_v13 = vpop.xlane.xlu1 %2706  ;;  %v2459_v15 = vpop.permute.xlu0 %2458 }
0x12f9   :  { %5076 = vrcp.f32 %v2707_v13  ;;  %v2528_v16 = vadd.f32 %v2527_v38, %v2459_v15  ;;  %v2533_v17 = vadd.f32 %v4768_v37, %v2459_v15  ;;  %v3057_v13 = vrot.slane %v5519_v51, %v1481_v59  ;;  %v4372_v59 = vld [vmem:[%s5907_s6 + $0x70] sm:$0xff] }
0x12fb   :  { %4780 = vmatpush3.msra.mxu0 %v2528_v16  ;;  %4785 = vmatpush3.msra.mxu1 %v2533_v17  ;;  %v3063_v16 = vrot.slane %v5519_v51, %v1573_v14  ;;  %v4373_v14 = vld [vmem:[%s5907_s6 + $0x78] sm:$0xff] }
0x12fc   :  { %4971 = vmatprep.subr.bf16.mxu0 %v4970_v22  ;;  %v4990_v51 = vpack.c.bf16 %v4373_v14, %v4372_v59 }
0x12ff   :  { %v5075_v8 = vpop.eup %5074 }
0x1300   :  { %v2710_v6 = vmul.f32 %v5075_v8, %v5071_v2 }
0x1302   :  { %4782 = vmatmul.mubr.msk.f32.vlgmr.msra.gmra.mrb[26].mxu0 %vm520_vm3, %v2710_v6 }
0x1303   :  { %v5077_v19 = vpop.eup %5076  ;;  %4973 = vmatpush3.bf16.msra.mxu0 %v4970_v22  ;;  %v105_v22 = vld [vmem:[%s5908_s7 + $0x10] sm:$0xf] }
0x1304   :  { %v2711_v20 = vmul.f32 %v5077_v19, %v5073_v4  ;;  %4975 = vmatprep.subr.bf16.mxu0 %v4974_v25  ;;  %v3074_v23 = vrot.slane %v105_v22, %v5365_v1 }
0x1306   :  { %4787 = vmatmul.mubr.msk.f32.vlgmr.msra.gmra.mrb[32].mxu1 %vm520_vm3, %v2711_v20 }
0x13d5   :  { %v2781_v0 = vpop.f32.mrb[26].mxu0 }
0x13d6   :  { %v4783_v27 = vpop.f32.mrb[27].mxu0  ;;  %4793 = vmatprep.mubr.msk.f32.mxu0 %vm365_vm2, %v2781_v0 }
0x13d9   :  { %v2854_v28 = vpop.f32.mrb[32].mxu1 }
0x13da   :  { %v4788_v29 = vpop.f32.mrb[33].mxu1  ;;  %4794 = vmatmul.mubr.msk.f32.vlgmr.msra.gmra.mrb[28].mxu0 %vm365_vm2, %v2854_v28 }
0x13db   :  { %4977 = vmatpush3.bf16.msra.mxu0 %v4974_v25  ;;  %4800 = vmatprep.mubr.msk.f32.mxu0 %vm365_vm2, %v5597_v58 }
0x13dc   :  { %4987 = vmatprep.subr.bf16.mxu0 %v4986_v55 }
0x13e2   :  { %4801 = vmatmul.mubr.msk.f32.vlgmr.msra.gmra.mrb[28].mxu0 %vm365_vm2, %v5595_v26  ;;  %vm4246_vm2 = vcmask 0  }
0x13e3   :  { %4989 = vmatpush3.bf16.msra.mxu0 %v4986_v55  ;;  %v3285_v55 = vrot.slane %v105_v22, %v5457_v7 }
0x13e4   :  { %4991 = vmatprep.subr.bf16.mxu0 %v4990_v51 }
0x13e7   :  { %4993 = vmatpush3.bf16.msra.mxu0 %v4990_v51 }
0x13e8   :  { %4835 = vmatprep.subr.mxu0 %v5232_v60 }
0x14b5   :  { %v4802_v30 = vpop.f32.mrb[28].mxu0 }
0x14b6   :  { %v3011_v31 = vpop.f32.mrb[29].mxu0  ;;  %v3025_v32 = vadd.f32 %v4802_v30, %v3023_v41 }
0x14b7   :  { %v3024_v33 = vadd.f32 %v3023_v41, %v3011_v31  ;;  %v3166_v41 = vrot.slane %v105_v22, %v5357_v63 }
0x14b8   :  { %v3027_v36 = vadd.f32 %v3025_v32, %v5533_v18  ;;  %v4364_v18 = vld [vmem:[%s5907_s6 + $0x40] sm:$0xff] }
0x14b9   :  { %v3026_v34 = vadd.f32 %v3024_v33, %v5526_v11  ;;  %v4978_v47 = vpack.c.bf16 %v4365_v46, %v4364_v18 }
0x14ba   :  { %v3031_v58 = vsel %vm50_vm0, %v3027_v36, 0.0 }
0x14bb   :  { %v3028_v35 = vsel %vm50_vm0, %v3026_v34, 0.0  ;;  %4979 = vmatprep.subr.bf16.mxu1 %v4978_v47 }
0x14bc   :  { %3029 = vadd.xlane.f32.xlu1 %v3028_v35  ;;  %4981 = vmatpush3.bf16.msra.mxu1 %v4978_v47 }
0x14bd   :  { %4983 = vmatprep.subr.bf16.mxu1 %v4982_v50 }
0x14c0   :  { %3032 = vadd.xlane.f32.xlu1 %v3031_v58  ;;  %4985 = vmatpush3.bf16.msra.mxu1 %v4982_v50  ;;  %v3279_v50 = vrot.slane %v105_v22, %v5372_v9  ;;  %v3318_v9 = vld [vmem:[%s5904_s3 + $0x4] sm:$0x3] }
0x14c1   :  { %4825 = vmatprep.subr.mxu1 %v5232_v60 }
0x1549   :  { %v3030_v37 = vpop.xlane.xlu1 %3029 }
0x154a   :  { %v3034_v26 = vmul.f32 0.03125, %v3030_v37 }
0x154c   :  { %v3036_v38 = vsub.f32 %v3026_v34, %v3034_v26 }
0x154d   :  { %v3033_v39 = vpop.xlane.xlu1 %3032 }
0x154e   :  { %v3035_v40 = vmul.f32 0.03125, %v3033_v39  ;;  %v3038_v42 = vmul.f32 %v3036_v38, %v3036_v38 }
0x1550   :  { %v3037_v43 = vsub.f32 %v3027_v36, %v3035_v40  ;;  %v3040_v44 = vsel %vm50_vm0, %v3038_v42, 0.0 }
0x1551   :  { %3041 = vadd.xlane.f32.xlu1 %v3040_v44 }
0x1552   :  { %v3039_v45 = vmul.f32 %v3037_v43, %v3037_v43 }
0x1554   :  { %v3043_v11 = vsel %vm50_vm0, %v3039_v45, 0.0 }
0x1555   :  { %3044 = vadd.xlane.f32.xlu1 %v3043_v11 }
0x15de   :  { %v3042_v56 = vpop.xlane.xlu1 %3041 }
0x15df   :  { %v3046_v2 = vmul.f32 0.03125, %v3042_v56 }
0x15e1   :  { %v3048_v3 = vadd.f32 1e-05, %v3046_v2 }
0x15e2   :  { %v3045_v4 = vpop.xlane.xlu1 %3044 }
0x15e3   :  { %5078 = vrsqrt.f32 %v3048_v3  ;;  %v3047_v5 = vmul.f32 0.03125, %v3045_v4 }
0x15e5   :  { %v3049_v10 = vadd.f32 1e-05, %v3047_v5 }
0x15e7   :  { %5080 = vrsqrt.f32 %v3049_v10 }
0x15ed   :  { %v5079_v15 = vpop.eup %5078 }
0x15ee   :  { %v3052_v17 = vmul.f32 %v5079_v15, %v3036_v38 }
0x15f0   :  { %v3058_v8 = vmul.f32 %v3057_v13, %v3052_v17 }
0x15f1   :  { %v5081_v6 = vpop.eup %5080 }
0x15f2   :  { %v3053_v19 = vmul.f32 %v5081_v6, %v3037_v43  ;;  %v3064_v20 = vadd.f32 %v3063_v16, %v3058_v8  ;;  %v3321_v6 = vmul.f32 %v3318_v9, %v3318_v9 }
0x15f4   :  { %4811 = vmatprep.mubr.msk.f32.mxu1 %vm50_vm0, %v3064_v20  ;;  %v3059_v57 = vmul.f32 %v3057_v13, %v3053_v19 }
0x15f6   :  { %v3065_v21 = vadd.f32 %v3063_v16, %v3059_v57  ;;  %v3317_v57 = vld [vmem:[%s5904_s3 + $0x2] sm:$0x3] }
0x15f7   :  { %v3320_v59 = vmul.f32 %v3317_v57, %v3317_v57 }
0x15f8   :  { %4812 = vmatmul.mubr.msk.f32.vlgmr.msra.gmra.mrb[34].mxu1 %vm50_vm0, %v3065_v21 }
0x15f9   :  { %4827 = vmatprep.mubr.msk.f32.mxu1 %vm5233_vm1, %v5232_v60  ;;  %v3326_v14 = vsel %vm3322_vm6, %v3320_v59, 0.0 }
0x16cb   :  { %v4813_v24 = vpop.f32.mrb[34].mxu1 }
0x16cc   :  { %v3153_v25 = vadd.f32 %v4813_v24, %v3074_v23  ;;  %v3147_v0 = vpop.f32.mrb[35].mxu1 }
0x16cd   :  { %v3148_v27 = vadd.f32 %v3147_v0, %v3074_v23 }
0x16ce   :  { %v3157_v29 = vmax.f32 %v3153_v25, 0.0 }
0x16cf   :  { %v3156_v28 = vmax.f32 %v3148_v27, 0.0 }
0x16d1   :  { %4822 = vmatprep.mubr.msk.f32.mxu0 %vm50_vm0, %v3156_v28 }
0x16d2   :  { %4823 = vmatmul.mubr.msk.f32.vlgmr.msra.gmra.mrb[30].mxu0 %vm50_vm0, %v3157_v29 }
0x16d3   :  { %4837 = vmatprep.mubr.msk.f32.mxu0 %vm5233_vm1, %v5232_v60 }
0x17a5   :  { %v4824_v30 = vpop.f32.mrb[30].mxu0 }
0x17a6   :  { %v3245_v31 = vadd.f32 %v4824_v30, %v3166_v41  ;;  %v3239_v32 = vpop.f32.mrb[31].mxu0 }
0x17a7   :  { %v3240_v33 = vadd.f32 %v3239_v32, %v3166_v41 }
0x17a8   :  { %v3249_v34 = vadd.f32 %v3245_v31, %v3065_v21 }
0x17a9   :  { %v3248_v35 = vadd.f32 %v3240_v33, %v3064_v20 }
0x17aa   :  { %v3253_v36 = vsel %vm50_vm0, %v3249_v34, 0.0 }
0x17ab   :  { %3254 = vadd.xlane.f32.xlu1 %v3253_v36  ;;  %v3250_v58 = vsel %vm50_vm0, %v3248_v35, 0.0 }
0x17ac   :  { %3251 = vadd.xlane.f32.xlu0 %v3250_v58 }
0x1838   :  { %v3255_v37 = vpop.xlane.xlu1 %3254 }
0x1839   :  { %v3257_v26 = vmul.f32 0.03125, %v3255_v37  ;;  %v3252_v38 = vpop.xlane.xlu0 %3251 }
0x183a   :  { %v3256_v39 = vmul.f32 0.03125, %v3252_v38 }
0x183b   :  { %v3259_v40 = vsub.f32 %v3249_v34, %v3257_v26 }
0x183c   :  { %v3258_v42 = vsub.f32 %v3248_v35, %v3256_v39 }
0x183d   :  { %v3261_v43 = vmul.f32 %v3259_v40, %v3259_v40 }
0x183e   :  { %v3260_v44 = vmul.f32 %v3258_v42, %v3258_v42 }
0x183f   :  { %v3265_v63 = vsel %vm50_vm0, %v3261_v43, 0.0 }
0x1840   :  { %3266 = vadd.xlane.f32.xlu1 %v3265_v63  ;;  %v3262_v45 = vsel %vm50_vm0, %v3260_v44, 0.0 }
0x1844   :  { %3263 = vadd.xlane.f32.xlu1 %v3262_v45 }
0x18cd   :  { %v3267_v11 = vpop.xlane.xlu1 %3266 }
0x18ce   :  { %v3269_v18 = vmul.f32 0.03125, %v3267_v11 }
0x18d0   :  { %v3271_v46 = vadd.f32 1e-05, %v3269_v18 }
0x18d1   :  { %v3264_v47 = vpop.xlane.xlu1 %3263 }
0x18d2   :  { %5082 = vrsqrt.f32 %v3271_v46  ;;  %v3268_v48 = vmul.f32 0.03125, %v3264_v47 }
0x18d4   :  { %v3270_v49 = vadd.f32 1e-05, %v3268_v48 }
0x18d6   :  { %5084 = vrsqrt.f32 %v3270_v49 }
0x18dc   :  { %v5083_v12 = vpop.eup %5082 }
0x18dd   :  { %v3275_v54 = vmul.f32 %v5083_v12, %v3259_v40 }
0x18df   :  { %v3281_v56 = vmul.f32 %v3279_v50, %v3275_v54 }
0x18e0   :  { %v5085_v2 = vpop.eup %5084 }
0x18e1   :  { %v3287_v3 = vadd.f32 %v3285_v55, %v3281_v56  ;;  %v3274_v4 = vmul.f32 %v5085_v2, %v3258_v42 }
0x18e3   :  { %v3289_v5 = vmul.f32 %v3287_v3, %v5327_v53  ;;  %v3280_v10 = vmul.f32 %v3279_v50, %v3274_v4  ;;  %v3316_v53 = vld [vmem:[%s5904_s3] sm:$0x3] }
0x18e4   :  { %v3319_v20 = vmul.f32 %v3316_v53, %v3316_v53 }
0x18e5   :  { %v3291_v13 = vmul.f32 %v3289_v5, %v3289_v5  ;;  %v3286_v15 = vadd.f32 %v3285_v55, %v3280_v10 }
0x18e6   :  { %v3323_v21 = vsel %vm3322_vm6, %v3319_v20, 0.0 }
0x18e7   :  { %v3294_v16 = vrot.slane %v3291_v13, 7  ;;  %v3288_v17 = vmul.f32 %v3286_v15, %v5325_v52  ;;  %v3329_v52 = vsel %vm3322_vm6, %v3321_v6, 0.0 }
0x18e9   :  { %v3302_v8 = vsel %vm3301_vm4, %v3294_v16, 0.0  ;;  %v3290_v7 = vmul.f32 %v3288_v17, %v3288_v17 }
0x18ea   :  { %3303 = vadd.xlane.f32.xlu1 %v3302_v8 }
0x18eb   :  { %v3298_v19 = vsel %vm3297_vm5, %v3290_v7, 0.0 }
0x18ee   :  { %3299 = vadd.xlane.f32.xlu1 %v3298_v19 }
0x18f2   :  { %3330 = vadd.xlane.f32.xlu1 %v3329_v52 }
0x18f6   :  { %3324 = vadd.xlane.f32.xlu1 %v3323_v21 }
0x18fa   :  { %3327 = vadd.xlane.f32.xlu1 %v3326_v14 }
0x1977   :  { %v3304_v51 = vpop.xlane.xlu1 %3303 }
0x1978   :  { %v3306_v22 = vmax.f32 %v3304_v51, 1e-24 }
0x197a   :  { %5086 = vrsqrt.f32 %v3306_v22 }
0x197b   :  { %v3300_v23 = vpop.xlane.xlu1 %3299 }
0x197c   :  { %v3305_v24 = vmax.f32 %v3300_v23, 1e-24 }
0x197e   :  { %5088 = vrsqrt.f32 %v3305_v24 }
0x197f   :  { %v3331_v25 = vpop.xlane.xlu1 %3330 }
0x1980   :  { %v3334_v0 = vmax.f32 %v3331_v25, 1e-24 }
0x1982   :  { %5090 = vrsqrt.f32 %v3334_v0 }
0x1983   :  { %v3325_v27 = vpop.xlane.xlu1 %3324 }
0x1984   :  { %v5087_v28 = vpop.eup %5086  ;;  %v3332_v29 = vmax.f32 %v3325_v27, 1e-24 }
0x1985   :  { %v3311_v41 = vrot.slane %v5087_v28, 1 }
0x1986   :  { %5092 = vrsqrt.f32 %v3332_v29 }
0x1987   :  { %v5711_v30 = vmul.f32 %v3311_v41, %v3289_v5  ;;  %v3328_v31 = vpop.xlane.xlu1 %3327 }
0x1988   :  { %v5089_v32 = vpop.eup %5088  ;;  %v3333_v33 = vmax.f32 %v3328_v31, 1e-24 }
0x1989   :  { %v3314_v34 = vmul.f32 %v5089_v32, %v3288_v17  ;;  %v3577_v35 = vmul.f32 %v5711_v30, %v5711_v30  ;;  %v3592_v37 = vrot.slane %v5711_v30, 6 }
0x198a   :  { %5094 = vrsqrt.f32 %v3333_v33 }
0x198b   :  { %v3580_v36 = vrot.slane %v3577_v35, 7  ;;  %v3591_v58 = vrot.slane %v3314_v34, 7  ;;  %v3576_v26 = vmul.f32 %v3314_v34, %v3314_v34 }
0x198c   :  { %v5091_v38 = vpop.eup %5090 }
0x198d   :  { %v3340_v39 = vmul.f32 %v5091_v38, %v3318_v9  ;;  %v3586_v40 = vsel %vm3301_vm4, %v3580_v36, 0.0  ;;  %v3594_v42 = vsel %vm3593_vm7, %v3592_v37, %v3591_v58  ;;  %v3583_v43 = vsel %vm3297_vm5, %v3576_v26, 0.0 }
0x198e   :  { %3587 = vadd.xlane.f32.xlu0 %v3586_v40  ;;  %4826 = vmatpush3.xpose.msk.msra.mxu1 %vm50_vm0, %v3594_v42 }
0x198f   :  { %3584 = vadd.xlane.f32.xlu1 %v3583_v43  ;;  %4836 = vmatpush3.xpose.msk.msra.mxu0 %vm50_vm0, %v3340_v39  ;;  %v3878_v63 = vmul.f32 %v3340_v39, %v3340_v39  ;;  %v3499_v3 = vrot.slane %v3340_v39, 1  ;;  %v3500_v16 = vrot.slane %v3340_v39, 2 }
0x1990   :  { %v5093_v44 = vpop.eup %5092  ;;  %4830 = vmatprep.subr.mxu1 %v5232_v60  ;;  %4845 = vmatprep.subr.mxu0 %v5232_v60 }
0x1991   :  { %4828 = vmatmul.mubr.msk.f32.vlgmr.msra.gmra.mrb[36].mxu1 %vm50_vm0, %v3594_v42  ;;  %v3879_v45 = vsel %vm3322_vm6, %v3878_v63, 0.0  ;;  %v3338_v11 = vmul.f32 %v5093_v44, %v3316_v53  ;;  %v3503_v9 = vmul.f32 %v3499_v3, %v3314_v34  ;;  %v3504_v6 = vmul.f32 %v3500_v16, %v5711_v30 }
0x1992   :  { %4838 = vmatmul.mubr.msk.f32.vlgmr.msra.gmra.mrb[32].mxu0 %vm50_vm0, %v3340_v39  ;;  %3880 = vadd.xlane.f32.xlu0 %v3879_v45 }
0x1993   :  { %4846 = vmatpush3.xpose.msk.msra.mxu0 %vm50_vm0, %v3340_v39  ;;  %4831 = vmatpush3.xpose.msk.msra.mxu1 %vm50_vm0, %v3338_v11  ;;  %v3747_v18 = vmul.f32 %v3338_v11, %v3338_v11  ;;  %v3342_v46 = vrot.slane %v3338_v11, 1  ;;  %v3343_v47 = vrot.slane %v3338_v11, 2  ;;  %v3510_v53 = vsel %vm3297_vm5, %v3503_v9, 0.0 }
0x1994   :  { %v5095_v48 = vpop.eup %5094  ;;  %4832 = vmatprep.mubr.msk.f32.mxu1 %vm5233_vm1, %v5232_v60  ;;  %4847 = vmatprep.mubr.msk.f32.mxu0 %vm5233_vm1, %v5232_v60  ;;  %v3507_v52 = vrot.slane %v3504_v6, 7 }
0x1995   :  { %4840 = vmatprep.subr.mxu1 %v5232_v60  ;;  %v3748_v49 = vsel %vm3322_vm6, %v3747_v18, 0.0  ;;  %v3339_v50 = vmul.f32 %v5095_v48, %v3317_v57  ;;  %v3346_v12 = vmul.f32 %v3342_v46, %v3314_v34  ;;  %v3347_v54 = vmul.f32 %v3343_v47, %v5711_v30 }
0x1996   :  { %4833 = vmatmul.mubr.msk.f32.vlgmr.msra.gmra.mrb[38].mxu1 %vm50_vm0, %v3338_v11  ;;  %4848 = vmatmul.mubr.msk.f32.vlgmr.msra.gmra.mrb[34].mxu0 %vm50_vm0, %v3594_v42  ;;  %v3513_v20 = vsel %vm3301_vm4, %v3507_v52, 0.0 }
0x1997   :  { %3749 = vadd.xlane.f32.xlu1 %v3748_v49  ;;  %4841 = vmatpush3.xpose.msk.msra.mxu1 %vm50_vm0, %v3339_v50  ;;  %v3353_v55 = vsel %vm3297_vm5, %v3346_v12, 0.0  ;;  %v4009_v56 = vmul.f32 %v3339_v50, %v3339_v50  ;;  %v3410_v2 = vrot.slane %v3339_v50, 1  ;;  %v3411_v4 = vrot.slane %v3339_v50, 2 }
0x1998   :  { %3354 = vadd.xlane.f32.xlu0 %v3353_v55  ;;  %4842 = vmatprep.mubr.msk.f32.mxu1 %vm5233_vm1, %v5232_v60  ;;  %v3350_v13 = vrot.slane %v3347_v54, 7  ;;  %vm3736_vm1 = vcmask 9216  }
0x1999   :  { %v4010_v5 = vsel %vm3322_vm6, %v4009_v56, 0.0  ;;  %v3414_v10 = vmul.f32 %v3410_v2, %v3314_v34  ;;  %v3415_v15 = vmul.f32 %v3411_v4, %v5711_v30 }
0x199a   :  { %4843 = vmatmul.mubr.msk.f32.vlgmr.msra.gmra.mrb[40].mxu1 %vm50_vm0, %v3339_v50  ;;  %v3356_v8 = vsel %vm3301_vm4, %v3350_v13, 0.0 }
0x199b   :  { %4011 = vadd.xlane.f32.xlu1 %v4010_v5  ;;  %v3421_v17 = vsel %vm3297_vm5, %v3414_v10, 0.0  ;;  %v3418_v7 = vrot.slane %v3415_v15, 7 }
0x199c   :  { %3422 = vadd.xlane.f32.xlu0 %v3421_v17 }
0x199d   :  { %v3424_v19 = vsel %vm3301_vm4, %v3418_v7, 0.0 }
0x199f   :  { %3357 = vadd.xlane.f32.xlu1 %v3356_v8 }
0x19a0   :  { %3511 = vadd.xlane.f32.xlu0 %v3510_v53 }
0x19a3   :  { %3425 = vadd.xlane.f32.xlu1 %v3424_v19 }
0x19a7   :  { %3514 = vadd.xlane.f32.xlu1 %v3513_v20 }
0x1a1b   :  { %v5749_v57 = vpop.xlane.xlu0 %3587 }
0x1a1c   :  { %v3670_v21 = vrot.slane %v5749_v57, 7  ;;  %v5752_v59 = vpop.xlane.xlu1 %3584 }
0x1a1d   :  { %v3669_v14 = vrot.slane %v5752_v59, 7 }
0x1a1f   :  { %v3671_v51 = vsel %vm3393_vm8, %v3669_v14, %v3670_v21  ;;  %v5756_v22 = vpop.xlane.xlu0 %3880 }
0x1a20   :  { %3673 = vxpose.xlu0.b32.start.end [1/1] (short) (narrow) %v3671_v51, 8 }
0x1a24   :  { %3954 = vxpose.xlu0.b32.start.end [1/1] (short) (narrow) %v5756_v22, 8  ;;  %v5759_v23 = vpop.xlane.xlu1 %3749 }
0x1a25   :  { %3823 = vxpose.xlu1.b32.start.end [1/1] (short) (narrow) %v5759_v23, 8  ;;  %v3355_v24 = vpop.xlane.xlu0 %3354 }
0x1a26   :  { %v3363_v25 = vand.u32 2147483647, %v3355_v24  ;;  %v3359_v55 = vmax.f32 %v3355_v24, 0.0 }
0x1a28   :  { %v3365_v0 = vsub.f32 0.0, %v3363_v25  ;;  %v5762_v27 = vpop.xlane.xlu1 %4011  ;;  %v3361_v16 = vsub.f32 %v3359_v55, %v3355_v24 }
0x1a29   :  { %4085 = vxpose.xlu0.b32.start.end [1/1] (short) (narrow) %v5762_v27, 8  ;;  %v5765_v28 = vpop.xlane.xlu0 %3422 }
0x1a2a   :  { %v3367_v29 = vmul.f32 1.442695, %v3365_v0  ;;  %v3433_v41 = vand.u32 2147483647, %v5765_v28  ;;  %v3427_v2 = vmax.f32 %v5765_v28, 0.0  ;;  %v3429_v3 = vmul.f32 0.0, %v5765_v28 }
0x1a2c   :  { %5096 = vpow2.f32 %v3367_v29  ;;  %v3435_v30 = vsub.f32 0.0, %v3433_v41  ;;  %v5768_v31 = vpop.xlane.xlu1 %3357  ;;  %v3431_v8 = vsub.f32 %v3427_v2, %v3429_v3  ;;  %v3478_v41 = vsub.f32 %v3427_v2, %v5765_v28 }
0x1a2d   :  { %v3364_v32 = vand.u32 2147483647, %v5768_v31  ;;  %v5771_v33 = vpop.xlane.xlu0 %3511  ;;  %v3360_v7 = vmax.f32 %v5768_v31, 0.0 }
0x1a2e   :  { %v3437_v34 = vmul.f32 1.442695, %v3435_v30  ;;  %v3522_v35 = vand.u32 2147483647, %v5771_v33  ;;  %v3516_v6 = vmax.f32 %v5771_v33, 0.0  ;;  %v3518_v19 = vmul.f32 0.0, %v5771_v33 }
0x1a2f   :  { %v3366_v36 = vsub.f32 0.0, %v3364_v32 }
0x1a30   :  { %5098 = vpow2.f32 %v3437_v34  ;;  %v3524_v58 = vsub.f32 0.0, %v3522_v35  ;;  %v5774_v37 = vpop.xlane.xlu1 %3425 }
0x1a31   :  { %v3369_v26 = vmul.f32 1.442695, %v3366_v36  ;;  %v3434_v38 = vand.u32 2147483647, %v5774_v37  ;;  %v3428_v34 = vmax.f32 %v5774_v37, 0.0  ;;  %v3430_v35 = vmul.f32 0.0, %v5774_v37 }
0x1a32   :  { %v3526_v39 = vmul.f32 1.442695, %v3524_v58  ;;  %v3362_v58 = vsub.f32 %v3360_v7, %v5768_v31 }
0x1a33   :  { %5100 = vpow2.f32 %v3369_v26  ;;  %v3436_v40 = vsub.f32 0.0, %v3434_v38 }
0x1a34   :  { %5102 = vpow2.f32 %v3526_v39  ;;  %v5777_v42 = vpop.xlane.xlu1 %3514 }
0x1a35   :  { %v3439_v43 = vmul.f32 1.442695, %v3436_v40  ;;  %v3523_v63 = vand.u32 2147483647, %v5777_v42 }
0x1a36   :  { %v5097_v44 = vpop.eup %5096 }
0x1a37   :  { %v3371_v45 = vadd.f32 1.0, %v5097_v44  ;;  %5104 = vpow2.f32 %v3439_v43  ;;  %v3525_v11 = vsub.f32 0.0, %v3523_v63  ;;  %v3374_v12 = vmul.f32 -0.5, %v5097_v44 }
0x1a38   :  { %v3377_v17 = vand.u32 2147483647, %v5097_v44 }
0x1a39   :  { %5106 = vlog2.f32 %v3371_v45  ;;  %v3528_v46 = vmul.f32 1.442695, %v3525_v11  ;;  %v3375_v13 = vadd.f32 1.0, %v3374_v12 }
0x1a3a   :  { %v5099_v18 = vpop.eup %5098  ;;  %vm5796_vm9 = vcmp.lt.f32.partialorder %v3377_v17, 0.0004427343 }
0x1a3b   :  { %v3441_v47 = vadd.f32 1.0, %v5099_v18  ;;  %5108 = vpow2.f32 %v3528_v46  ;;  %v3444_v4 = vmul.f32 -0.5, %v5099_v18  ;;  %v3447_v20 = vand.u32 2147483647, %v5099_v18 }
0x1a3c   :  { %v3376_v51 = vmul.f32 %v5097_v44, %v3375_v13 }
0x1a3d   :  { %v5101_v48 = vpop.eup %5100  ;;  %5110 = vlog2.f32 %v3441_v47  ;;  %v3445_v52 = vadd.f32 1.0, %v3444_v4  ;;  %vm3448_vm11 = vcmp.lt.f32.partialorder %v3447_v20, 0.0004427343  ;;  %v3432_v47 = vsub.f32 %v3428_v34, %v3430_v35 }
0x1a3e   :  { %v5780_v49 = vpop.eup %5102  ;;  %v3380_v50 = vadd.f32 1.0, %v5101_v48  ;;  %v3383_v15 = vmul.f32 -0.5, %v5101_v48  ;;  %v3386_v30 = vand.u32 2147483647, %v5101_v48 }
0x1a3f   :  { %v3530_v54 = vadd.f32 1.0, %v5780_v49  ;;  %v3533_v21 = vmul.f32 -0.5, %v5780_v49  ;;  %v3446_v26 = vmul.f32 %v5099_v18, %v3445_v52  ;;  %v3536_v31 = vand.u32 2147483647, %v5780_v49 }
0x1a40   :  { %5112 = vlog2.f32 %v3380_v50  ;;  %v3384_v25 = vadd.f32 1.0, %v3383_v15  ;;  %vm3387_vm12 = vcmp.lt.f32.partialorder %v3386_v30, 0.0004427343  ;;  %v3479_v50 = vsub.f32 %v3428_v34, %v5774_v37 }
0x1a41   :  { %v5783_v56 = vpop.eup %5104  ;;  %5114 = vlog2.f32 %v3530_v54  ;;  %v3534_v38 = vadd.f32 1.0, %v3533_v21  ;;  %v3517_v54 = vmax.f32 %v5777_v42, 0.0  ;;  %v3519_v37 = vmul.f32 0.0, %v5777_v42 }
0x1a42   :  { %v3450_v5 = vadd.f32 1.0, %v5783_v56  ;;  %v3453_v24 = vmul.f32 -0.5, %v5783_v56  ;;  %v3385_v28 = vmul.f32 %v5101_v48, %v3384_v25  ;;  %v3456_v11 = vand.u32 2147483647, %v5783_v56 }
0x1a43   :  { %v5107_v10 = vpop.eup %5106  ;;  %v3535_v48 = vmul.f32 %v5780_v49, %v3534_v38  ;;  %vm5814_vm14 = vcmp.lt.f32.partialorder %v3536_v31, 0.0004427343  ;;  %v3520_v21 = vsub.f32 %v3516_v6, %v3518_v19  ;;  %v3521_v29 = vsub.f32 %v3517_v54, %v3519_v37 }
0x1a44   :  { %5116 = vlog2.f32 %v3450_v5  ;;  %v3373_v9 = vmul.f32 0.6931472, %v5107_v10  ;;  %v3454_v43 = vadd.f32 1.0, %v3453_v24  ;;  %vm3457_vm13 = vcmp.lt.f32.partialorder %v3456_v11, 0.0004427343 }
0x1a45   :  { %v5790_v53 = vpop.eup %5108 }
0x1a46   :  { %v3539_v0 = vadd.f32 1.0, %v5790_v53  ;;  %v3379_v33 = vsel %vm5796_vm9, %v3376_v51, %v3373_v9  ;;  %v3542_v63 = vmul.f32 -0.5, %v5790_v53  ;;  %v3455_v3 = vmul.f32 %v5783_v56, %v3454_v43 }
0x1a47   :  { %v5111_v14 = vpop.eup %5110  ;;  %v3389_v44 = vadd.f32 %v3379_v33, %v3361_v16  ;;  %v3545_v9 = vand.u32 2147483647, %v5790_v53 }
0x1a48   :  { %v3443_v32 = vmul.f32 0.6931472, %v5111_v14  ;;  %5118 = vlog2.f32 %v3539_v0  ;;  %v3543_v5 = vadd.f32 1.0, %v3542_v63 }
0x1a49   :  { %v3394_v10 = vrot.slane %v3389_v44, 7  ;;  %vm3546_vm15 = vcmp.lt.f32.partialorder %v3545_v9, 0.0004427343 }
0x1a4a   :  { %v5113_v36 = vpop.eup %5112  ;;  %v3449_v45 = vsel %vm3448_vm11, %v3446_v26, %v3443_v32  ;;  %v3544_v42 = vmul.f32 %v5790_v53, %v3543_v5 }
0x1a4b   :  { %v5115_v39 = vpop.eup %5114  ;;  %v3382_v40 = vmul.f32 0.6931472, %v5113_v36  ;;  %v3480_v4 = vadd.f32 %v3478_v41, %v3449_v45  ;;  %v3459_v15 = vadd.f32 %v3449_v45, %v3431_v8 }
0x1a4c   :  { %v3532_v55 = vmul.f32 0.6931472, %v5115_v39 }
0x1a4d   :  { %v3388_v46 = vsel %vm3387_vm12, %v3385_v28, %v3382_v40  ;;  %v3484_v14 = vrot.slane %v3480_v4, 7  ;;  %v3463_v25 = vrot.slane %v3459_v15, 7 }
0x1a4e   :  { %v5117_v18 = vpop.eup %5116  ;;  %v3390_v12 = vadd.f32 %v3388_v46, %v3362_v58  ;;  %v3538_v56 = vsel %vm5814_vm14, %v3535_v48, %v3532_v55 }
0x1a4f   :  { %v3452_v2 = vmul.f32 0.6931472, %v5117_v18  ;;  %v3548_v41 = vadd.f32 %v3538_v56, %v3520_v21 }
0x1a50   :  { %v3395_v13 = vrot.slane %v3390_v12, 7 }
0x1a51   :  { %v3458_v16 = vsel %vm3457_vm13, %v3455_v3, %v3452_v2  ;;  %v3552_v53 = vrot.slane %v3548_v41, 7 }
0x1a52   :  { %v3396_v49 = vsel %vm3393_vm8, %v3394_v10, %v3395_v13  ;;  %v3481_v7 = vadd.f32 %v3479_v50, %v3458_v16  ;;  %v3460_v52 = vadd.f32 %v3458_v16, %v3432_v47  ;;  %v5119_v20 = vpop.eup %5118 }
0x1a53   :  { %v3399_v8 = vsel %vm3398_vm10, %v3396_v49, 0.0  ;;  %v3541_v0 = vmul.f32 0.6931472, %v5119_v20 }
0x1a54   :  { %3400 = vadd.xlane.f32.xlu1 %v3399_v8  ;;  %v3485_v51 = vrot.slane %v3481_v7, 7  ;;  %v3464_v24 = vrot.slane %v3460_v52, 7  ;;  %v3572_v52 = vand.u32 127, %v122_v61 }
0x1a55   :  { %v3547_v33 = vsel %vm3546_vm15, %v3544_v42, %v3541_v0 }
0x1a56   :  { %v3486_v30 = vsel %vm3393_vm8, %v3484_v14, %v3485_v51  ;;  %v3465_v32 = vsel %vm3393_vm8, %v3463_v25, %v3464_v24  ;;  %v3549_v34 = vadd.f32 %v3547_v33, %v3521_v29  ;;  %vm3573_vm0 = vcmp.gt.s32.totalorder %v3572_v52, %v5354_v62 }
0x1a57   :  { %v3488_v6 = vsel %vm3398_vm10, %v3486_v30, 0.0  ;;  %v3467_v19 = vsel %vm3398_vm10, %v3465_v32, 0.0 }
0x1a58   :  { %3489 = vadd.xlane.f32.xlu1 %v3488_v6  ;;  %3468 = vadd.xlane.f32.xlu0 %v3467_v19  ;;  %v3553_v35 = vrot.slane %v3549_v34, 7 }
0x1a5a   :  { %v3554_v36 = vsel %vm3393_vm8, %v3552_v53, %v3553_v35 }
0x1a5b   :  { %v3556_v58 = vsel %vm3398_vm10, %v3554_v36, 0.0  ;;  %v4376_v36 = vsel %vm3573_vm0, 1.0, %v5232_v60 }
0x1a5c   :  { %3557 = vadd.xlane.f32.xlu1 %v3556_v58 }
0x1a64   :  { %v3663_v26 = vpop.f32.mrb[36].mxu1 }
0x1a65   :  { %v4829_v38 = vpop.f32.mrb[37].mxu1  ;;  %v3950_v39 = vpop.f32.mrb[32].mxu0  ;;  %v3711_v46 = vmul.f32 2.0, %v3663_v26  ;;  %v3726_v26 = vrot.slane %v4376_v36, 1 }
0x1a66   :  { %v4839_v40 = vpop.f32.mrb[33].mxu0  ;;  %v3991_v5 = vmul.f32 2.0, %v3950_v39 }
0x1a67   :  { %v3713_v18 = vrot.slane %v3711_v46, 1 }
0x1a69   :  { %v3819_v28 = vpop.f32.mrb[38].mxu1  ;;  %v4206_v43 = vpop.f32.mrb[34].mxu0 }
0x1a6a   :  { %v4834_v63 = vpop.f32.mrb[39].mxu1  ;;  %v4849_v44 = vpop.f32.mrb[35].mxu0  ;;  %v4212_v31 = vmul.f32 2.0, %v4206_v43  ;;  %v3860_v9 = vmul.f32 2.0, %v3819_v28 }
0x1a6c   :  { %v4214_v10 = vrot.slane %v4212_v31, 1 }
0x1a6d   :  { %v4081_v45 = vpop.f32.mrb[40].mxu1 }
0x1a6e   :  { %v4844_v11 = vpop.f32.mrb[41].mxu1  ;;  %v4122_v29 = vmul.f32 2.0, %v4081_v45 }
0x1aa0   :  { %v3689_v47 = vpop.trf.xlu0 }
0x1aa1   :  { %v3708_v50 = vrot.slane %v3689_v47, %v5365_v1 }
0x1aa3   :  { %v3709_v12 = vadd.f32 %v3708_v50, %v5752_v59  ;;  %v3710_v54 = vadd.f32 %v3708_v50, %v5749_v57 }
0x1aa4   :  { %v3970_v55 = vpop.trf.xlu0 }
0x1aa5   :  { %v3715_v48 = vsub.f32 %v3709_v12, %v3713_v18  ;;  %v3716_v2 = vsub.f32 %v3710_v54, %v3713_v18  ;;  %v3989_v3 = vrot.slane %v3970_v55, %v5365_v1  ;;  %v3839_v4 = vpop.trf.xlu1 }
0x1aa6   :  { %v3858_v13 = vrot.slane %v3839_v4, %v5365_v1 }
0x1aa7   :  { %v3717_v15 = vmax.f32 %v3715_v48, 0.0  ;;  %v3718_v37 = vmax.f32 %v3716_v2, 0.0  ;;  %v3990_v16 = vadd.f32 %v3989_v3, %v5756_v22  ;;  %v4210_v17 = vadd.f32 %v3989_v3, %v5752_v59 }
0x1aa8   :  { %v4211_v49 = vadd.f32 %v3989_v3, %v5749_v57  ;;  %v3859_v7 = vadd.f32 %v3858_v13, %v5759_v23 }
0x1aa9   :  { %v3719_v56 = vmul.f32 -2.0, %v3717_v15  ;;  %v3720_v20 = vmul.f32 -2.0, %v3718_v37  ;;  %v3992_v21 = vsub.f32 %v3990_v16, %v3991_v5  ;;  %v4216_v8 = vsub.f32 %v4210_v17, %v4214_v10  ;;  %v4101_v14 = vpop.trf.xlu0 }
0x1aaa   :  { %v4217_v42 = vsub.f32 %v4211_v49, %v4214_v10  ;;  %v3861_v51 = vsub.f32 %v3859_v7, %v3860_v9  ;;  %v4120_v25 = vrot.slane %v4101_v14, %v5365_v1 }
0x1aab   :  { %v3721_v24 = vmul.f32 1.442695, %v3719_v56  ;;  %v3723_v22 = vmul.f32 1.442695, %v3720_v20  ;;  %v3993_v0 = vmax.f32 %v3992_v21, 0.0  ;;  %v4218_v59 = vmax.f32 %v4216_v8, 0.0 }
0x1aac   :  { %v4219_v41 = vmax.f32 %v4217_v42, 0.0  ;;  %v3862_v57 = vmax.f32 %v3861_v51, 0.0  ;;  %v4121_v23 = vadd.f32 %v4120_v25, %v5762_v27 }
0x1aad   :  { %5120 = vpow2.f32 %v3721_v24  ;;  %v3994_v61 = vmul.f32 -2.0, %v3993_v0  ;;  %v4220_v30 = vmul.f32 -2.0, %v4218_v59 }
0x1aae   :  { %5122 = vpow2.f32 %v3723_v22  ;;  %v4221_v32 = vmul.f32 -2.0, %v4219_v41  ;;  %v3863_v33 = vmul.f32 -2.0, %v3862_v57  ;;  %v4123_v6 = vsub.f32 %v4121_v23, %v4122_v29 }
0x1aaf   :  { %v3995_v19 = vmul.f32 1.442695, %v3994_v61  ;;  %v4222_v1 = vmul.f32 1.442695, %v4220_v30 }
0x1ab0   :  { %v4224_v34 = vmul.f32 1.442695, %v4221_v32  ;;  %v3864_v53 = vmul.f32 1.442695, %v3863_v33  ;;  %v4124_v35 = vmax.f32 %v4123_v6, 0.0 }
0x1ab1   :  { %5124 = vpow2.f32 %v3995_v19 }
0x1ab2   :  { %5126 = vpow2.f32 %v3864_v53  ;;  %v4125_v58 = vmul.f32 -2.0, %v4124_v35 }
0x1ab3   :  { %5128 = vpow2.f32 %v4222_v1 }
0x1ab4   :  { %v4126_v27 = vmul.f32 1.442695, %v4125_v58  ;;  %5130 = vpow2.f32 %v4224_v34 }
0x1ab6   :  { %5132 = vpow2.f32 %v4126_v27 }
0x1ab7   :  { %v5121_v62 = vpop.eup %5120 }
0x1ab8   :  { %v5123_v38 = vpop.eup %5122  ;;  %v3728_v39 = vmul.f32 %v5121_v62, %v3726_v26 }
0x1ab9   :  { %v3729_v40 = vmul.f32 %v5123_v38, %v3726_v26 }
0x1aba   :  { %v3732_v28 = vrot.slane %v3728_v39, 7 }
0x1abb   :  { %v5125_v43 = vpop.eup %5124  ;;  %v3733_v63 = vrot.slane %v3729_v40, 7 }
0x1abc   :  { %v5127_v44 = vpop.eup %5126  ;;  %v3997_v50 = vmul.f32 %v5125_v43, %v4376_v36 }
0x1abd   :  { %v5129_v45 = vpop.eup %5128  ;;  %v3734_v11 = vsel %vm3393_vm8, %v3732_v28, %v3733_v63  ;;  %v3866_v60 = vmul.f32 %v5127_v44, %v4376_v36 }
0x1abe   :  { %v5131_v46 = vpop.eup %5130  ;;  %v3737_v47 = vsel %vm3736_vm1, %v3734_v11, 0.0  ;;  %v4228_v18 = vrot.slane %v5129_v45, 7  ;;  %v3998_v48 = vsel %vm3736_vm1, %v3997_v50, 0.0 }
0x1abf   :  { %3738 = vadd.xlane.f32.xlu0 %v3737_v47  ;;  %v3867_v31 = vsel %vm3736_vm1, %v3866_v60, 0.0  ;;  %v4229_v12 = vrot.slane %v5131_v46, 7 }
0x1ac0   :  { %v5133_v54 = vpop.eup %5132  ;;  %3868 = vadd.xlane.f32.xlu1 %v3867_v31 }
0x1ac1   :  { %v4128_v55 = vmul.f32 %v5133_v54, %v4376_v36  ;;  %v4230_v3 = vsel %vm3393_vm8, %v4228_v18, %v4229_v12 }
0x1ac2   :  { %v4232_v4 = vsel %vm3736_vm1, %v4230_v3, 0.0 }
0x1ac3   :  { %3999 = vadd.xlane.f32.xlu0 %v3998_v48  ;;  %v4129_v2 = vsel %vm3736_vm1, %v4128_v55, 0.0 }
0x1ac4   :  { %4130 = vadd.xlane.f32.xlu1 %v4129_v2 }
0x1ac7   :  { %4233 = vadd.xlane.f32.xlu0 %v4232_v4 }
0x1ae1   :  { %v3401_v5 = vpop.xlane.xlu1 %3400 }
0x1ae2   :  { %v3402_v10 = vrot.slane %v3401_v5, 4 }
0x1ae4   :  { %v3403_v13 = vadd.f32 %v3402_v10, %v3401_v5 }
0x1ae5   :  { %v3469_v15 = vpop.xlane.xlu0 %3468  ;;  %v3490_v37 = vpop.xlane.xlu1 %3489 }
0x1ae6   :  { %v3404_v16 = vrot.slane %v3403_v13, 2  ;;  %v3470_v17 = vrot.slane %v3469_v15, 4  ;;  %v3491_v9 = vrot.slane %v3490_v37, 4 }
0x1ae8   :  { %v3471_v49 = vadd.f32 %v3470_v17, %v3469_v15  ;;  %v3492_v7 = vadd.f32 %v3491_v9, %v3490_v37  ;;  %v3405_v52 = vadd.f32 %v3404_v16, %v3403_v13 }
0x1ae9   :  { %v3558_v21 = vpop.xlane.xlu1 %3557 }
0x1aea   :  { %v3472_v56 = vrot.slane %v3471_v49, 2  ;;  %v3493_v20 = vrot.slane %v3492_v7, 2  ;;  %v3406_v8 = vrot.slane %v3405_v52, 1  ;;  %v3559_v14 = vrot.slane %v3558_v21, 4 }
0x1aec   :  { %v3407_v42 = vadd.f32 %v3406_v8, %v3405_v52  ;;  %v3473_v51 = vadd.f32 %v3472_v56, %v3471_v49  ;;  %v3494_v25 = vadd.f32 %v3493_v20, %v3492_v7  ;;  %v3560_v24 = vadd.f32 %v3559_v14, %v3558_v21 }
0x1aee   :  { %4998 = vpush %v3407_v42  ;;  %v3474_v22 = vrot.slane %v3473_v51, 1  ;;  %v3495_v0 = vrot.slane %v3494_v25, 1  ;;  %v3561_v59 = vrot.slane %v3560_v24, 2 }
0x1af0   :  { %v3475_v29 = vadd.f32 %v3474_v22, %v3473_v51  ;;  %v3496_v41 = vadd.f32 %v3495_v0, %v3494_v25  ;;  %v3562_v57 = vadd.f32 %v3561_v59, %v3560_v24 }
0x1af2   :  { %5000 = vpush %v3475_v29  ;;  %v3563_v23 = vrot.slane %v3562_v57, 1 }
0x1af3   :  { %5002 = vpush %v3496_v41 }
0x1af4   :  { %v3564_v61 = vadd.f32 %v3563_v23, %v3562_v57 }
0x1af6   :  { %5004 = vpush %v3564_v61 }
0x1b1f   :  { %s4999_s3 = spop %4998 }
0x1b23   :  { %s5001_s23 = spop %5000 }
0x1b24   :  { %s3477_s24 = sadd.f32 %s5001_s23, %s4999_s3  ;;  %s5003_s25 = spop %5002 }
0x1b27   :  { %s5005_s5 = spop %5004 }
0x1b28   :  { %s3566_s28 = sadd.f32 %s5005_s5, %s5003_s25 }
0x1b29   :  { %s3568_s29 = sadd.f32 %s5005_s5, %s4999_s3 }
0x1b2a   :  { %s5851_s30 = sadd.f32 %s3566_s28, %s3477_s24 }
0x1b2b   :  { %v4248_v30 = vstv %s3568_s29 }
0x1b2c   :  { %4249 = vst.msk [vmem:[#allocation6] sm:$0x1] %vm4246_vm2, %v4248_v30 }
0x1b2d   :  { %5167 = shalt.err (!%p5164_p12)
}
0x1b2e   :  { %s5168_s4 = scalar_lea.hbm %s5910_s9, 16 }
0x1b2f   :  { %p5169_p13 = scmp.ne.s32.totalorder %s5910_s9, %s5168_s4  ;;  %p5172_p0 = scmp.lt.u32.totalorder %s5168_s4, %s5910_s9 }
0x1b31   :  { %p5174_p1 = pnand %p5172_p0, %p5169_p13 }
0x1b33   :  { %5177 = shalt.err (!%p5174_p1)
}
0x1b34   :  { %4271 = dma.vmem_to_hbm [thread:$0]  %s4269_s27, 16, %s5910_s9, [#allocation7]  }
0x1b35   :  { %s5236_s23 = smov [#allocation8]   ;;  %s5237_s5 = smov [#allocation5]  }
0x1b36   :  { %s4278_s24 = sshll.u32 %s5236_s23, 4  ;;  %s4258_s26 = sshll.u32 %s5237_s5, 4  ;;  %s4279_s24 = int_to_ptr.vmem [resolvable:$true] %s4278_s24  ;;  %s5868_s26 = int_to_ptr.vmem [resolvable:$true] %s4258_s26 }
0x1b37   :  { %s5178_s28 = scalar_lea.vmem %s4279_s24, 16  ;;  %s5182_s29 = scalar_lea.vmem %s4279_s24, 32 }
0x1b38   :  { %p5179_p2 = scmp.ne.s32.totalorder %s4279_s24, %s5178_s28  ;;  %p5183_p3 = scmp.lt.s32.totalorder %s4279_s24, %s4279_s24 }
0x1b39   :  { %p5184_p4 = scmp.lt.s32.totalorder %s5182_s29, %s5178_s28 }
0x1b3b   :  { %p5185_p5 = por %p5184_p4, %p5183_p3 }
0x1b3d   :  { %p5186_p6 = pnand %p5185_p5, %p5179_p2 }
0x1b4c   :  { %v3739_v32 = vpop.xlane.xlu0 %3738 }
0x1b4d   :  { %v3740_v33 = vrot.slane %v3739_v32, 4  ;;  %v3869_v6 = vpop.xlane.xlu1 %3868 }
0x1b4e   :  { %v3870_v19 = vrot.slane %v3869_v6, 4 }
0x1b4f   :  { %v3741_v1 = vadd.f32 %v3740_v33, %v3739_v32 }
0x1b50   :  { %v3871_v34 = vadd.f32 %v3870_v19, %v3869_v6  ;;  %v4000_v53 = vpop.xlane.xlu0 %3999 }
0x1b51   :  { %v3742_v35 = vrot.slane %v3741_v1, 2  ;;  %v4001_v36 = vrot.slane %v4000_v53, 4  ;;  %v4131_v58 = vpop.xlane.xlu1 %4130 }
0x1b52   :  { %v3872_v27 = vrot.slane %v3871_v34, 2  ;;  %v4132_v26 = vrot.slane %v4131_v58, 4 }
0x1b53   :  { %v4002_v62 = vadd.f32 %v4001_v36, %v4000_v53  ;;  %v3743_v38 = vadd.f32 %v3742_v35, %v3741_v1 }
0x1b54   :  { %v4133_v39 = vadd.f32 %v4132_v26, %v4131_v58  ;;  %v4234_v40 = vpop.xlane.xlu0 %4233  ;;  %v3873_v28 = vadd.f32 %v3872_v27, %v3871_v34 }
0x1b55   :  { %v4003_v43 = vrot.slane %v4002_v62, 2  ;;  %v4235_v63 = vrot.slane %v4234_v40, 4  ;;  %v3744_v44 = vrot.slane %v3743_v38, 1 }
0x1b56   :  { %v4134_v45 = vrot.slane %v4133_v39, 2  ;;  %v3874_v11 = vrot.slane %v3873_v28, 1 }
0x1b57   :  { %v4236_v60 = vadd.f32 %v4235_v63, %v4234_v40  ;;  %v3745_v46 = vadd.f32 %v3744_v44, %v3743_v38  ;;  %v4004_v47 = vadd.f32 %v4003_v43, %v4002_v62 }
0x1b58   :  { %v4135_v50 = vadd.f32 %v4134_v45, %v4133_v39  ;;  %v3875_v31 = vadd.f32 %v3874_v11, %v3873_v28 }
0x1b59   :  { %v4237_v18 = vrot.slane %v4236_v60, 2  ;;  %5006 = vpush %v3745_v46  ;;  %v4005_v12 = vrot.slane %v4004_v47, 1 }
0x1b5a   :  { %5008 = vpush %v3875_v31  ;;  %v4136_v54 = vrot.slane %v4135_v50, 1 }
0x1b5b   :  { %v4238_v55 = vadd.f32 %v4237_v18, %v4236_v60  ;;  %v4006_v48 = vadd.f32 %v4005_v12, %v4004_v47 }
0x1b5c   :  { %v4137_v2 = vadd.f32 %v4136_v54, %v4135_v50 }
0x1b5d   :  { %5010 = vpush %v4006_v48  ;;  %v4239_v3 = vrot.slane %v4238_v55, 1 }
0x1b5e   :  { %5012 = vpush %v4137_v2 }
0x1b5f   :  { %v4240_v4 = vadd.f32 %v4239_v3, %v4238_v55 }
0x1b61   :  { %5014 = vpush %v4240_v4 }
0x1b8a   :  { %s5007_s9 = spop %5006 }
0x1b8b   :  { %s5009_s19 = spop %5008 }
0x1b8c   :  { %s3877_s6 = sadd.f32 %s5009_s19, %s5007_s9 }
0x1b8e   :  { %s5011_s7 = spop %5010 }
0x1b8f   :  { %s4008_s20 = sadd.f32 %s5011_s7, %s3877_s6  ;;  %s5013_s15 = spop %5012 }
0x1b91   :  { %s4139_s21 = sadd.f32 %s5013_s15, %s4008_s20 }
0x1b92   :  { %s5015_s22 = spop %5014 }
0x1b93   :  { %s4242_s3 = sadd.f32 %s5015_s22, %s4139_s21 }
0x1b95   :  { %s4243_s25 = smul.f32 0.05, %s4242_s3 }
0x1b97   :  { %s4244_s27 = sadd.f32 %s4243_s25, %s5851_s30  ;;  %v4250_v5 = vstv %s4243_s25 }
0x1b98   :  { %4251 = vst.msk [vmem:[#allocation8] sm:$0x1] %vm4246_vm2, %v4250_v5 }
0x1b99   :  { %v4245_v10 = vstv %s4244_s27 }
0x1b9a   :  { %5189 = shalt.err (!%p5186_p6)
}
0x1b9b   :  { %s5190_s0 = scalar_lea.hbm %s5911_s10, 16 }
0x1b9c   :  { %p5191_p7 = scmp.ne.s32.totalorder %s5911_s10, %s5190_s0  ;;  %p5194_p8 = scmp.lt.u32.totalorder %s5190_s0, %s5911_s10 }
0x1b9e   :  { %p5196_p9 = pnand %p5194_p8, %p5191_p7 }
0x1ba0   :  { %5199 = shalt.err (!%p5196_p9)
}
0x1ba1   :  { %4281 = dma.vmem_to_hbm [thread:$0]  %s4279_s24, 16, %s5911_s10, [#allocation7]   ;;  %4247 = vst.msk [vmem:[#allocation5] sm:$0x1] %vm4246_vm2, %v4245_v10 }
0x1ba2   :  { %s5200_s16 = scalar_lea.vmem %s5868_s26, 16  ;;  %s5204_s17 = scalar_lea.vmem %s5868_s26, 32 }
0x1ba3   :  { %p5201_p10 = scmp.ne.s32.totalorder %s5868_s26, %s5200_s16  ;;  %p5205_p11 = scmp.lt.s32.totalorder %s5868_s26, %s5868_s26 }
0x1ba4   :  { %p5206_p12 = scmp.lt.s32.totalorder %s5204_s17, %s5200_s16 }
0x1ba6   :  { %p5207_p13 = por %p5206_p12, %p5205_p11 }
0x1ba8   :  { %p5208_p0 = pnand %p5207_p13, %p5201_p10 }
0x1baa   :  { %5211 = shalt.err (!%p5208_p0)
}
0x1bab   :  { %s5212_s19 = scalar_lea.hbm %s5909_s8, 16 }
0x1bac   :  { %p5213_p1 = scmp.ne.s32.totalorder %s5909_s8, %s5212_s19  ;;  %p5216_p2 = scmp.lt.u32.totalorder %s5212_s19, %s5909_s8 }
0x1bae   :  { %p5218_p3 = pnand %p5216_p2, %p5213_p1 }
0x1bb0   :  { %5221 = shalt.err (!%p5218_p3)
}
0x1bb1   :  { %4261 = dma.vmem_to_hbm [thread:$0]  %s5868_s26, 16, %s5909_s8, [#allocation4]  }
0x1bb2   :  { %5224 = dma.done.wait [#allocation4], 16  }
0x1bb3   :  { %5225 = vsyncadd [#allocation4], 4294967280 }
0x1bb4   :  { %5226 = dma.done.wait [#allocation7], 32  }
0x1bb5   :  { %5227 = vsyncadd [#allocation7], 4294967264 }
0x1bb6   :  { %4291 = vsyncpa [#allocation3], 1 }
0x1bb7   :  { %4292 = vsyncpa [#allocation4], 1 }
0x1bb8   :  { %4293 = vsyncpa [#allocation7], 1 }

</bundles_post_ra>
